<compile_context>
chip_gen: v7x
topology: tpu7x:2x2x1
jax: 0.10.0
libtpu: 0.0.40
codegen_flags: <defaults>
</compile_context>

<pallas_src>
import functools
import math

import jax
import jax.numpy as jnp
from jax import lax
from jax.experimental import pallas as pl
from jax.experimental.pallas import tpu as pltpu


# ----------------------------------------------------------------------------
# Pallas kernel: per-kh wide-K implicit GEMM + folded shift + ReLU.
# ----------------------------------------------------------------------------
def _conv_bn_relu_kernel(x_ref, w_ref, shift_ref, out_ref, *, k, stride,
                         dilation, cin, th, wout, with_relu):
    # x_ref     : (th_in, Wp*Cin)   bf16 (lane-dense row window)
    # w_ref     : (k, k*Cin, TCO)   bf16 (BN scale pre-folded)
    # shift_ref : (1, TCO)          f32  (folded conv-bias / BN shift)
    # out_ref   : (TH*Wout, TCO)    bf16 (lane-dense output block)
    xv = x_ref[...]
    m, tco = out_ref.shape
    span = (wout - 1) * stride + 1

    # Accumulator initialised with the folded shift (saves an epilogue add).
    acc = jnp.broadcast_to(shift_ref[...], (m, tco))          # f32

    for kh in range(k):                                        # static unroll
        h0 = kh * dilation
        rows = xv[h0:h0 + (th - 1) * stride + 1:stride, :]     # (th, Wp*Cin)
        taps = []
        for kw in range(k):
            c0 = kw * dilation * cin
            t = rows[:, c0:c0 + span * cin].reshape(th, span, cin)
            if stride > 1:
                # TODO(synk): stride>1 decimation would be cheaper done
                # host-side (space-to-depth); kept in-kernel for generality.
                t = t[:, ::stride, :]
            taps.append(t)                                     # (th, Wout, Cin)
        lhs = jnp.concatenate(taps, axis=-1).reshape(m, k * cin)
        acc = acc + jnp.dot(lhs, w_ref[kh],
                            preferred_element_type=jnp.float32)

    if with_relu:
        acc = jnp.maximum(acc, 0.0)
    out_ref[...] = acc.astype(out_ref.dtype)


# ----------------------------------------------------------------------------
# Wrapper: tiling decisions, host-side layout prep, pallas_call.
# ----------------------------------------------------------------------------
def _round_up(x, m):
    return ((x + m - 1) // m) * m


@functools.partial(jax.jit,
                   static_argnames=("stride", "padding", "dilation",
                                    "with_relu"))
def conv2d_bn_relu(x_nchw, weight_oihw, scale, shift, *, stride, padding,
                   dilation, with_relu):
    """Fused conv + per-output-channel affine (+ ReLU).  x: (N,Cin,H,W) f32."""
    N, Cin, H, W = x_nchw.shape
    Cout = weight_oihw.shape[0]
    k = weight_oihw.shape[2]

    Hout = (H + 2 * padding - dilation * (k - 1) - 1) // stride + 1
    Wout = (W + 2 * padding - dilation * (k - 1) - 1) // stride + 1
    Wp = W + 2 * padding
    WpC = Wp * Cin

    # ---- tile selection ----------------------------------------------------
    Cout_p = _round_up(Cout, 128)
    # Keep the whole weight resident when its (double-buffered) bf16 footprint
    # is small; else use lane-dense 256/128 Cout tiles with Cout outermost.
    if 2 * k * k * Cin * Cout_p * 2 <= 8 * 2 ** 20:
        tco = Cout_p
    elif Cout_p % 256 == 0:
        tco = 256
    else:
        tco = 128
    n_co = Cout_p // tco

    # Row block: target m = th*Wout ~ 1024 with m a multiple of 16.
    row_align = 16 // math.gcd(Wout, 16)
    th = _round_up(max(1, min(Hout, max(1, 1024 // Wout))), row_align)

    def _vmem_need(th_, tco_):
        th_in_ = (th_ - 1) * stride + (k - 1) * dilation + 1
        x_blk = th_in_ * WpC * 2
        w_blk = k * k * Cin * tco_ * 2
        o_blk = th_ * Wout * tco_ * 2
        acc = th_ * Wout * tco_ * 4
        return 2 * (x_blk + w_blk + o_blk) + acc     # 2x = double buffering

    budget = 40 * 2 ** 20                            # safe within v7x's 64 MiB
    while th > row_align and _vmem_need(th, tco) > budget:
        th = _round_up(max(row_align, th // 2), row_align)
    if _vmem_need(th, tco) > budget and tco > 256 and Cout_p % 256 == 0:
        tco = 256
    if _vmem_need(th, tco) > budget and tco > 128:
        tco = 128
    n_co = Cout_p // tco

    n_ho = pl.cdiv(Hout, th)
    Hout_p = n_ho * th
    th_in = (th - 1) * stride + (k - 1) * dilation + 1
    m = th * Wout
    vmem_limit = int(min(96 * 2 ** 20,
                         max(32 * 2 ** 20, 1.4 * _vmem_need(th, tco))))

    # ---- host-side layout prep (single O(size) passes) ----------------------
    Hp_need = (Hout_p - 1) * stride + (k - 1) * dilation + 1
    pad_bot = max(padding, Hp_need - H - padding)
    Hp = H + padding + pad_bot
    # TODO(synk): in a full network keep activations NHWC/bf16 end-to-end to
    #             avoid the per-layer NCHW<->NHWC transposes.
    x_nhwc = jnp.transpose(x_nchw, (0, 2, 3, 1)).astype(jnp.bfloat16)
    x_pad = jnp.pad(x_nhwc, ((0, 0), (padding, pad_bot),
                             (padding, padding), (0, 0)))
    x_flat = x_pad.reshape(N, Hp, WpC)               # lane-dense rows
    if n_ho == 1:
        xw = x_flat[:, :th_in][:, None]              # (N, 1, th_in, WpC)
    else:
        # Row windows with the (k-1)*dilation halo rows duplicated per block
        # so a plain BlockSpec (auto double-buffered DMA) can fetch them.
        xw = jnp.stack(
            [lax.dynamic_slice_in_dim(x_flat, h * th * stride, th_in, axis=1)
             for h in range(n_ho)], axis=1)          # (N, n_ho, th_in, WpC)

    # Fold BN scale into the weights; pad Cout; reshape so each kh tap is a
    # single wide-K (k*Cin) contraction.
    w_hwio = jnp.transpose(weight_oihw * scale[:, None, None, None],
                           (2, 3, 1, 0))             # (k, k, Cin, Cout)
    w_hwio = jnp.pad(w_hwio, ((0, 0), (0, 0), (0, 0), (0, Cout_p - Cout)))
    w3 = w_hwio.reshape(k, k * Cin, Cout_p).astype(jnp.bfloat16)
    shift_p = jnp.pad(shift, (0, Cout_p - Cout)).reshape(1, Cout_p)
    shift_p = shift_p.astype(jnp.float32)

    kernel = functools.partial(
        _conv_bn_relu_kernel, k=k, stride=stride, dilation=dilation,
        cin=Cin, th=th, wout=Wout, with_relu=with_relu)

    out = pl.pallas_call(
        kernel,
        out_shape=jax.ShapeDtypeStruct((N, Hout_p * Wout, Cout_p),
                                       jnp.bfloat16),
        grid=(n_co, N, n_ho),            # Cout tiles outermost -> the weight
        in_specs=[                       # tile is fetched only n_co times.
            pl.BlockSpec((None, None, th_in, WpC),
                         lambda c, n, h: (n, h, 0, 0)),
            pl.BlockSpec((k, k * Cin, tco), lambda c, n, h: (0, 0, c)),
            pl.BlockSpec((1, tco), lambda c, n, h: (0, c)),
        ],
        out_specs=pl.BlockSpec((None, m, tco), lambda c, n, h: (n, h, c)),
        compiler_params=pltpu.CompilerParams(
            dimension_semantics=("arbitrary", "parallel", "parallel"),
            vmem_limit_bytes=vmem_limit,
        ),
    )(xw, w3, shift_p)

    out = out.reshape(N, Hout_p, Wout, Cout_p)[:, :Hout, :, :Cout]
    return jnp.transpose(out, (0, 3, 1, 2)).astype(jnp.float32)   # NHWC->NCHW


# ----------------------------------------------------------------------------
# Module: JAX/Pallas port of the PyTorch Conv2DBatchNormRelu (eval-mode BN).
# ----------------------------------------------------------------------------
class Conv2DBatchNormRelu:

    def __init__(self, in_channels, n_filters, k_size, stride, padding,
                 bias=True, dilation=1, with_bn=True, with_relu=True,
                 key=None):
        if key is None:
            key = jax.random.PRNGKey(0)
        self.in_channels = int(in_channels)
        self.n_filters = int(n_filters)
        self.k_size = int(k_size)
        self.stride = int(stride)
        self.padding = int(padding)
        self.dilation = int(dilation)
        self.with_bias = bool(bias)
        self.with_bn = bool(with_bn)
        self.with_relu = bool(with_relu)

        kw1, kw2, kw3, kw4, kw5, kw6 = jax.random.split(key, 6)
        fan_in = self.in_channels * self.k_size * self.k_size
        bound = 1.0 / (fan_in ** 0.5)
        # PyTorch conv weight layout: (Cout, Cin, Kh, Kw)
        self.weight = jax.random.uniform(
            kw1, (self.n_filters, self.in_channels, self.k_size, self.k_size),
            jnp.float32, -bound, bound)
        self.bias = (jax.random.uniform(kw2, (self.n_filters,), jnp.float32,
                                        -bound, bound)
                     if self.with_bias else jnp.zeros((self.n_filters,),
                                                      jnp.float32))
        if self.with_bn:
            self.gamma = 1.0 + 0.1 * jax.random.normal(kw3, (self.n_filters,),
                                                       jnp.float32)
            self.beta = 0.1 * jax.random.normal(kw4, (self.n_filters,),
                                                jnp.float32)
            self.running_mean = 0.1 * jax.random.normal(
                kw5, (self.n_filters,), jnp.float32)
            self.running_var = jax.random.uniform(
                kw6, (self.n_filters,), jnp.float32, 0.5, 1.5)
            self.eps = 1e-5

    def _folded_scale_shift(self):
        if self.with_bn:
            inv_std = 1.0 / jnp.sqrt(self.running_var + self.eps)
            scale = self.gamma * inv_std
            shift = self.beta + scale * (self.bias - self.running_mean)
        else:
            scale = jnp.ones((self.n_filters,), jnp.float32)
            shift = self.bias
        return scale, shift

    def __call__(self, x_nchw):
        x = jnp.asarray(x_nchw, jnp.float32)
        scale, shift = self._folded_scale_shift()
        return conv2d_bn_relu(x, self.weight, scale, shift,
                              stride=self.stride, padding=self.padding,
                              dilation=self.dilation,
                              with_relu=self.with_relu)


# ----------------------------------------------------------------------------
# Pure-JAX reference for validation.
# ----------------------------------------------------------------------------
def _reference(module, x_nchw):
    y = lax.conv_general_dilated(
        x_nchw.astype(jnp.float32), module.weight,
        window_strides=(module.stride, module.stride),
        padding=[(module.padding, module.padding)] * 2,
        rhs_dilation=(module.dilation, module.dilation),
        dimension_numbers=("NCHW", "OIHW", "NCHW"))
    y = y + module.bias.reshape(1, -1, 1, 1)
    if module.with_bn:
        inv = 1.0 / jnp.sqrt(module.running_var + module.eps)
        y = (y - module.running_mean.reshape(1, -1, 1, 1)) * \
            (module.gamma * inv).reshape(1, -1, 1, 1) + \
            module.beta.reshape(1, -1, 1, 1)
    if module.with_relu:
        y = jnp.maximum(y, 0.0)
    return y


if __name__ == "__main__":
    key = jax.random.PRNGKey(0)
    k_x, k_p = jax.random.split(key)

    # Small shapes consistent with the module: batch=2, Cin=4, H=W=16, Cout=8.
    x = jax.random.normal(k_x, (2, 4, 16, 16), jnp.float32)

    module = Conv2DBatchNormRelu(in_channels=4, n_filters=8, k_size=3,
                                 stride=1, padding=1, bias=True, dilation=1,
                                 with_bn=True, with_relu=True, key=k_p)

    out = module(x)
    out = jax.block_until_ready(out)

    ref = _reference(module, x)
    assert out.shape == ref.shape == (2, 8, 16, 16)
    # bf16 operands / bf16 output (f32 accumulation) -> loose tolerance.
    err = jnp.max(jnp.abs(out - ref))
    assert jnp.allclose(out, ref, atol=5e-2, rtol=5e-2), \
        f"max abs err {err}"

    print("KERNEL_OK")
</pallas_src>

<mosaic_0001>
module attributes {stable_mosaic.version = 11 : i64} {
  func.func @_conv_bn_relu_kernel(%arg0: i32, %arg1: i32, %arg2: i32, %arg3: memref<1x1x18x72xbf16, #tpu.memory_space<vmem>>, %arg4: memref<3x12x128xbf16, #tpu.memory_space<vmem>>, %arg5: memref<1x128xf32, #tpu.memory_space<vmem>>, %arg6: memref<1x256x128xbf16, #tpu.memory_space<vmem>>) attributes {dimension_semantics = [#tpu.dimension_semantics<arbitrary>, #tpu.dimension_semantics<parallel>, #tpu.dimension_semantics<parallel>], iteration_bounds = array<i64: 1, 2, 1>, scalar_prefetch = 0 : i64, scratch_operands = 0 : i64, tpu.core_type = #tpu.core_type<tc>, window_params = [{transform_indices = @transform_0, window_bounds = array<i64: 1, 1, 18, 72>}, {transform_indices = @transform_1, window_bounds = array<i64: 3, 12, 128>}, {transform_indices = @transform_2, window_bounds = array<i64: 1, 128>}, {transform_indices = @transform_3, window_bounds = array<i64: 1, 256, 128>}]} {
    %c0 = arith.constant 0 : index
    %c0_0 = arith.constant 0 : index
    %c0_1 = arith.constant 0 : index
    %c0_2 = arith.constant 0 : index
    %0 = vector.load %arg3[%c0, %c0_0, %c0_1, %c0_2] : memref<1x1x18x72xbf16, #tpu.memory_space<vmem>>, vector<1x1x18x72xbf16>
    %1 = vector.shape_cast %0 : vector<1x1x18x72xbf16> to vector<18x72xbf16>
    %c0_3 = arith.constant 0 : index
    %c0_4 = arith.constant 0 : index
    %2 = vector.load %arg5[%c0_3, %c0_4] : memref<1x128xf32, #tpu.memory_space<vmem>>, vector<1x128xf32>
    %3 = vector.shape_cast %2 : vector<1x128xf32> to vector<1x128xf32>
    %4 = vector.broadcast %3 : vector<1x128xf32> to vector<256x128xf32>
    %5 = vector.extract_strided_slice %1 {offsets = [0, 0], sizes = [16, 72], strides = [1, 1]} : vector<18x72xbf16> to vector<16x72xbf16>
    %6 = vector.extract_strided_slice %5 {offsets = [0, 0], sizes = [16, 64], strides = [1, 1]} : vector<16x72xbf16> to vector<16x64xbf16>
    %7 = vector.shape_cast %6 : vector<16x64xbf16> to vector<16x16x4xbf16>
    %8 = vector.extract_strided_slice %5 {offsets = [0, 4], sizes = [16, 64], strides = [1, 1]} : vector<16x72xbf16> to vector<16x64xbf16>
    %9 = vector.shape_cast %8 : vector<16x64xbf16> to vector<16x16x4xbf16>
    %10 = vector.extract_strided_slice %5 {offsets = [0, 8], sizes = [16, 64], strides = [1, 1]} : vector<16x72xbf16> to vector<16x64xbf16>
    %11 = vector.shape_cast %10 : vector<16x64xbf16> to vector<16x16x4xbf16>
    %12 = tpu.concatenate %7, %9, %11 in 2 : vector<16x16x4xbf16>, vector<16x16x4xbf16>, vector<16x16x4xbf16> -> vector<16x16x12xbf16>
    %13 = vector.shape_cast %12 : vector<16x16x12xbf16> to vector<256x12xbf16>
    %c0_5 = arith.constant 0 : index
    %c0_6 = arith.constant 0 : index
    %c0_7 = arith.constant 0 : index
    %14 = vector.load %arg4[%c0_5, %c0_6, %c0_7] : memref<3x12x128xbf16, #tpu.memory_space<vmem>>, vector<1x12x128xbf16>
    %15 = vector.shape_cast %14 : vector<1x12x128xbf16> to vector<12x128xbf16>
    %cst = arith.constant dense<0.000000e+00> : vector<256x128xf32>
    %16 = tpu.matmul %13, %15, %cst {dimension_numbers = #tpu.dot_dimension_numbers<[1], [0], [0], [1], [0, 0, 1, 1], [], []>} : vector<256x12xbf16>, vector<12x128xbf16>, vector<256x128xf32> -> vector<256x128xf32>
    %17 = arith.addf %4, %16 : vector<256x128xf32>
    %18 = vector.extract_strided_slice %1 {offsets = [1, 0], sizes = [16, 72], strides = [1, 1]} : vector<18x72xbf16> to vector<16x72xbf16>
    %19 = vector.extract_strided_slice %18 {offsets = [0, 0], sizes = [16, 64], strides = [1, 1]} : vector<16x72xbf16> to vector<16x64xbf16>
    %20 = vector.shape_cast %19 : vector<16x64xbf16> to vector<16x16x4xbf16>
    %21 = vector.extract_strided_slice %18 {offsets = [0, 4], sizes = [16, 64], strides = [1, 1]} : vector<16x72xbf16> to vector<16x64xbf16>
    %22 = vector.shape_cast %21 : vector<16x64xbf16> to vector<16x16x4xbf16>
    %23 = vector.extract_strided_slice %18 {offsets = [0, 8], sizes = [16, 64], strides = [1, 1]} : vector<16x72xbf16> to vector<16x64xbf16>
    %24 = vector.shape_cast %23 : vector<16x64xbf16> to vector<16x16x4xbf16>
    %25 = tpu.concatenate %20, %22, %24 in 2 : vector<16x16x4xbf16>, vector<16x16x4xbf16>, vector<16x16x4xbf16> -> vector<16x16x12xbf16>
    %26 = vector.shape_cast %25 : vector<16x16x12xbf16> to vector<256x12xbf16>
    %c1 = arith.constant 1 : index
    %c0_8 = arith.constant 0 : index
    %c0_9 = arith.constant 0 : index
    %27 = vector.load %arg4[%c1, %c0_8, %c0_9] : memref<3x12x128xbf16, #tpu.memory_space<vmem>>, vector<1x12x128xbf16>
    %28 = vector.shape_cast %27 : vector<1x12x128xbf16> to vector<12x128xbf16>
    %cst_10 = arith.constant dense<0.000000e+00> : vector<256x128xf32>
    %29 = tpu.matmul %26, %28, %cst_10 {dimension_numbers = #tpu.dot_dimension_numbers<[1], [0], [0], [1], [0, 0, 1, 1], [], []>} : vector<256x12xbf16>, vector<12x128xbf16>, vector<256x128xf32> -> vector<256x128xf32>
    %30 = arith.addf %17, %29 : vector<256x128xf32>
    %31 = vector.extract_strided_slice %1 {offsets = [2, 0], sizes = [16, 72], strides = [1, 1]} : vector<18x72xbf16> to vector<16x72xbf16>
    %32 = vector.extract_strided_slice %31 {offsets = [0, 0], sizes = [16, 64], strides = [1, 1]} : vector<16x72xbf16> to vector<16x64xbf16>
    %33 = vector.shape_cast %32 : vector<16x64xbf16> to vector<16x16x4xbf16>
    %34 = vector.extract_strided_slice %31 {offsets = [0, 4], sizes = [16, 64], strides = [1, 1]} : vector<16x72xbf16> to vector<16x64xbf16>
    %35 = vector.shape_cast %34 : vector<16x64xbf16> to vector<16x16x4xbf16>
    %36 = vector.extract_strided_slice %31 {offsets = [0, 8], sizes = [16, 64], strides = [1, 1]} : vector<16x72xbf16> to vector<16x64xbf16>
    %37 = vector.shape_cast %36 : vector<16x64xbf16> to vector<16x16x4xbf16>
    %38 = tpu.concatenate %33, %35, %37 in 2 : vector<16x16x4xbf16>, vector<16x16x4xbf16>, vector<16x16x4xbf16> -> vector<16x16x12xbf16>
    %39 = vector.shape_cast %38 : vector<16x16x12xbf16> to vector<256x12xbf16>
    %c2 = arith.constant 2 : index
    %c0_11 = arith.constant 0 : index
    %c0_12 = arith.constant 0 : index
    %40 = vector.load %arg4[%c2, %c0_11, %c0_12] : memref<3x12x128xbf16, #tpu.memory_space<vmem>>, vector<1x12x128xbf16>
    %41 = vector.shape_cast %40 : vector<1x12x128xbf16> to vector<12x128xbf16>
    %cst_13 = arith.constant dense<0.000000e+00> : vector<256x128xf32>
    %42 = tpu.matmul %39, %41, %cst_13 {dimension_numbers = #tpu.dot_dimension_numbers<[1], [0], [0], [1], [0, 0, 1, 1], [], []>} : vector<256x12xbf16>, vector<12x128xbf16>, vector<256x128xf32> -> vector<256x128xf32>
    %43 = arith.addf %30, %42 : vector<256x128xf32>
    %cst_14 = arith.constant 0.000000e+00 : f32
    %44 = vector.broadcast %cst_14 : f32 to vector<256x128xf32>
    %45 = arith.maximumf %43, %44 : vector<256x128xf32>
    %46 = arith.truncf %45 : vector<256x128xf32> to vector<256x128xbf16>
    %c0_15 = arith.constant 0 : index
    %c0_16 = arith.constant 0 : index
    %c0_17 = arith.constant 0 : index
    %47 = vector.load %arg6[%c0_15, %c0_16, %c0_17] : memref<1x256x128xbf16, #tpu.memory_space<vmem>>, vector<1x256x128xbf16>
    %48 = vector.shape_cast %47 : vector<1x256x128xbf16> to vector<256x128xbf16>
    %49 = vector.shape_cast %46 : vector<256x128xbf16> to vector<1x256x128xbf16>
    tpu.vector_store %arg6[%c0_15, %c0_16, %c0_17], %49 {strides = array<i32>} : memref<1x256x128xbf16, #tpu.memory_space<vmem>>, vector<1x256x128xbf16>,
    return
  }
  func.func @transform_0(%arg0: i32, %arg1: i32, %arg2: i32) -> (i32, i32, i32, i32) {
    %c0_i32 = arith.constant 0 : i32
    %c0_i32_0 = arith.constant 0 : i32
    %c0_i32_1 = arith.constant 0 : i32
    return %arg1, %arg2, %c0_i32, %c0_i32_0 : i32, i32, i32, i32
  }
  func.func @transform_1(%arg0: i32, %arg1: i32, %arg2: i32) -> (i32, i32, i32) {
    %c0_i32 = arith.constant 0 : i32
    %c0_i32_0 = arith.constant 0 : i32
    %c0_i32_1 = arith.constant 0 : i32
    return %c0_i32, %c0_i32_0, %arg0 : i32, i32, i32
  }
  func.func @transform_2(%arg0: i32, %arg1: i32, %arg2: i32) -> (i32, i32) {
    %c0_i32 = arith.constant 0 : i32
    %c0_i32_0 = arith.constant 0 : i32
    return %c0_i32, %arg0 : i32, i32
  }
  func.func @transform_3(%arg0: i32, %arg1: i32, %arg2: i32) -> (i32, i32, i32) {
    %c0_i32 = arith.constant 0 : i32
    return %arg1, %arg2, %arg0 : i32, i32, i32
  }
}

</mosaic_0001>

<bundles_post_ra>
// kernel: conv2d_bn_relu.1
= control target key start
LH: loop header
LB: loop body
LE: loop exit
PB: predicated region body
PF: predicated region fallthrough
CT: control target
= control target key end

     0   :  { %s7485_s12 = smov 0   ;;  %s7487_s13 = smov 0   ;;  %s11420_s0 = inlined_call_operand.vmem [shape: bf16[2,1,18,72], index: 0, kind: input, shape index: {}]   ;;  %s11421_s1 = inlined_call_operand.vmem [shape: bf16[3,12,128], index: 1, kind: input, shape index: {}]   ;;  %s11422_s2 = inlined_call_operand.vmem [shape: f32[1,128], index: 2, kind: input, shape index: {}]   ;;  %s11423_s3 = inlined_call_operand.vmem [shape: bf16[2,256,128], index: 3, kind: output, shape index: {}]  }
   0x1   :  { %s7489_s14 = smov 0  }
   0x2 LB: > { %s28_s15 = sadd.s32 1, %s7439_s13  ;;  %p6733_p0 = scmp.ge.s32.totalorder %s7443_s14, 1  ;;  %s7443_s14 = sphi %s7489_s14, %s13_s14   ;;  %s7439_s13 = sphi %s7487_s13, %s12338_s13   ;;  %s7435_s12 = sphi %s7485_s12, %s12337_s12  }
   0x3   : > { %p30_p1 = scmp.ge.s32.totalorder %s28_s15, 2  ;;  %p183_p2 = scmp.lt.s32.totalorder %s7443_s14, 3 }
   0x5   : > { %s12340_s15 = smov (%p30_p1, %s28_s15), 0  ;;  %p184_p3 = pnand %p6733_p0, %p183_p2 }
   0x7   : > { %187 = sbr.rel (%p184_p3) target bundleno = 1165 (0x48d), region = 32 }
   0xe   : > { %p225_p4 = scmp.lt.s32.totalorder %s7435_s12, 1  ;;  %s7445_s20 = smov 120   ;;  %v7460_v10 = vmov 1983009808   ;;  %v361_v12 = vlaneseq  ;;  %v7461_v28 = vmov 1934713408  }
   0xf   : > { %s7446_s21 = smov 124   ;;  %s7447_s22 = smov 116   ;;  %v359_v11 = vunpack.c.l.s4 %v7460_v10  ;;  %v376_v29 = vunpack.c.l.s4 %v7461_v28  ;;  %vm2199_vm0 = vsmask.f32 3328  ;;  %vm2200_vm1 = vsmask.f32 7440 }
  0x10   : > { %s12342_s12 = smov (!%p225_p4, %s7435_s12), 1  ;;  %s7448_s23 = smov 112   ;;  %v362_v16 = vshrl.u32 %v361_v12, 7  ;;  %vm7901_vm2 = vmor %vm2199_vm0, %vm2200_vm1  ;;  %vm1971_vm3 = vcmask 1045504   ;;  %vm4438_vm4 = vcmask 1042432   ;;  %vm4439_vm5 = vcmask 1046532  }
  0x11   : > { %s7370_s16 = smul.u32 12, %s12342_s12  ;;  %s7449_s24 = smov 108   ;;  %v360_v15 = vunpack.c.0.s8 %v359_v11  ;;  %v377_v34 = vunpack.c.0.s8 %v376_v29  ;;  %vm8558_vm6 = vmor %vm4438_vm4, %vm4439_vm5  ;;  %vm1849_vm7 = vcmask 31744   ;;  %vm1898_vm8 = vcmask 64512  }
  0x12   : > { %s7450_s25 = smov 104   ;;  %s7451_s26 = smov 100   ;;  %vm1938_vm9 = vcmask 97280  }
  0x13   : > { %s7509_s19 = scalar_lea.vmem %s11420_s0, %s7370_s16  ;;  %s7452_s27 = smov 96   ;;  %v7627_v21 = vsub.s32 %v360_v15, %v362_v16  ;;  %v7672_v39 = vsub.s32 %v377_v34, %v362_v16 }
  0x14   : > { %v7512_v0 = vld [vmem:[%s7509_s19] sm:$0xf]  ;;  %v7519_v1 = vld [vmem:[%s7509_s19 + $0x4] sm:$0xf]  ;;  %s7453_s28 = smov 92   ;;  %s7454_s29 = smov 88  }
  0x15   : > { %273 = vrot.lane.b32.xlu1 %v7512_v0, %s7445_s20  ;;  %267 = vrot.lane.b32.xlu0 %v7512_v0, %s7446_s21  ;;  %s7455_s30 = smov 84   ;;  %s7456_s4 = smov 80   ;;  %11661 = vst [vmem:[#allocation9_spill] sm:$0xff] %v7627_v21  ;;  %11664 = vst [vmem:[#allocation12_spill] sm:$0xff] %v7672_v39 }
  0x16   : > { %s7457_s5 = smov 76   ;;  %s7458_s6 = smov 72  }
  0x17   : > { %s7459_s7 = smov 68   ;;  %s7463_s8 = smov 4  }
  0x18   : > { %s7464_s11 = smov 8  }
  0x19   : > { %275 = vrot.lane.b32.xlu1 %v7519_v1, %s7445_s20  ;;  %269 = vrot.lane.b32.xlu0 %v7519_v1, %s7446_s21 }
  0x1d   : > { %281 = vrot.lane.b32.xlu1 %v7519_v1, %s7447_s22  ;;  %279 = vrot.lane.b32.xlu0 %v7512_v0, %s7447_s22 }
  0x21   : > { %287 = vrot.lane.b32.xlu1 %v7519_v1, %s7448_s23  ;;  %285 = vrot.lane.b32.xlu0 %v7512_v0, %s7448_s23 }
  0x25   : > { %293 = vrot.lane.b32.xlu1 %v7519_v1, %s7449_s24  ;;  %291 = vrot.lane.b32.xlu0 %v7512_v0, %s7449_s24 }
  0x29   : > { %299 = vrot.lane.b32.xlu1 %v7519_v1, %s7450_s25  ;;  %297 = vrot.lane.b32.xlu0 %v7512_v0, %s7450_s25 }
  0x2d   : > { %305 = vrot.lane.b32.xlu1 %v7519_v1, %s7451_s26  ;;  %303 = vrot.lane.b32.xlu0 %v7512_v0, %s7451_s26 }
  0x31   : > { %311 = vrot.lane.b32.xlu1 %v7519_v1, %s7452_s27  ;;  %309 = vrot.lane.b32.xlu0 %v7512_v0, %s7452_s27 }
  0x35   : > { %317 = vrot.lane.b32.xlu1 %v7519_v1, %s7453_s28  ;;  %315 = vrot.lane.b32.xlu0 %v7512_v0, %s7453_s28 }
  0x39   : > { %323 = vrot.lane.b32.xlu1 %v7519_v1, %s7454_s29  ;;  %321 = vrot.lane.b32.xlu0 %v7512_v0, %s7454_s29 }
  0x3d   : > { %329 = vrot.lane.b32.xlu1 %v7519_v1, %s7455_s30  ;;  %327 = vrot.lane.b32.xlu0 %v7512_v0, %s7455_s30 }
  0x41   : > { %335 = vrot.lane.b32.xlu1 %v7519_v1, %s7456_s4  ;;  %333 = vrot.lane.b32.xlu0 %v7512_v0, %s7456_s4 }
  0x45   : > { %341 = vrot.lane.b32.xlu1 %v7519_v1, %s7457_s5  ;;  %339 = vrot.lane.b32.xlu0 %v7512_v0, %s7457_s5 }
  0x49   : > { %347 = vrot.lane.b32.xlu1 %v7519_v1, %s7458_s6  ;;  %345 = vrot.lane.b32.xlu0 %v7512_v0, %s7458_s6 }
  0x4d   : > { %353 = vrot.lane.b32.xlu1 %v7519_v1, %s7459_s7  ;;  %351 = vrot.lane.b32.xlu0 %v7512_v0, %s7459_s7 }
  0x87   : > { %v7577_v2 = vpop.permute.xlu1 %273  ;;  %v7579_v3 = vpop.permute.xlu0 %267 }
  0x88   : > { %11654 = vst [vmem:[#allocation2_spill] sm:$0xff] %v7579_v3  ;;  %725 = vrot.lane.b32.xlu0 %v7579_v3, %s7446_s21 }
  0x8b   : > { %v7583_v4 = vpop.permute.xlu1 %275  ;;  %v7585_v5 = vpop.permute.xlu0 %269 }
  0x8c   : > { %11655 = vst [vmem:[#allocation3_spill] sm:$0xff] %v7583_v4  ;;  %11656 = vst [vmem:[#allocation4_spill] sm:$0xff] %v7585_v5  ;;  %729 = vrot.lane.b32.xlu0 %v7577_v2, %s7446_s21  ;;  %727 = vrot.lane.b32.xlu1 %v7585_v5, %s7446_s21 }
  0x8f   : > { %v7591_v6 = vpop.permute.xlu1 %281  ;;  %v7593_v7 = vpop.permute.xlu0 %279 }
  0x90   : > { %11657 = vst [vmem:[#allocation5_spill] sm:$0xff] %v7591_v6  ;;  %11658 = vst [vmem:[#allocation6_spill] sm:$0xff] %v7593_v7  ;;  %731 = vrot.lane.b32.xlu1 %v7583_v4, %s7446_s21  ;;  %733 = vrot.lane.b32.xlu0 %v7593_v7, %s7446_s21 }
  0x93   : > { %v7599_v8 = vpop.permute.xlu1 %287  ;;  %v7601_v9 = vpop.permute.xlu0 %285 }
  0x94   : > { %11659 = vst [vmem:[#allocation7_spill] sm:$0xff] %v7599_v8  ;;  %11660 = vst [vmem:[#allocation8_spill] sm:$0xff] %v7601_v9  ;;  %735 = vrot.lane.b32.xlu1 %v7591_v6, %s7446_s21  ;;  %737 = vrot.lane.b32.xlu0 %v7601_v9, %s7446_s21  ;;  %v357_v20 = vcombine.low %v7512_v0, %v7601_v9 }
  0x96   : > { %v7641_v25 = vrot.slane %v357_v20, %v7627_v21 }
  0x97   : > { %v7607_v13 = vpop.permute.xlu1 %293  ;;  %v7609_v14 = vpop.permute.xlu0 %291 }
  0x98   : > { %739 = vrot.lane.b32.xlu1 %v7599_v8, %s7446_s21  ;;  %741 = vrot.lane.b32.xlu0 %v7609_v14, %s7446_s21  ;;  %v391_v35 = vcombine.low %v7579_v3, %v7609_v14 }
  0x9a   : > { %v7679_v40 = vrot.slane %v391_v35, %v7627_v21 }
  0x9b   : > { %v7615_v17 = vpop.permute.xlu1 %299  ;;  %v7617_v18 = vpop.permute.xlu0 %297 }
  0x9c   : > { %v365_v19 = vcombine.low %v7577_v2, %v7617_v18  ;;  %743 = vrot.lane.b32.xlu1 %v7607_v13, %s7446_s21  ;;  %745 = vrot.lane.b32.xlu0 %v7617_v18, %s7446_s21 }
  0x9e   : > { %v7634_v24 = vrot.slane %v365_v19, %v7627_v21 }
  0x9f   : > { %v7629_v22 = vpop.permute.xlu1 %305  ;;  %v7631_v23 = vpop.permute.xlu0 %303 }
  0xa0   : > { %747 = vrot.lane.b32.xlu1 %v7615_v17, %s7446_s21  ;;  %749 = vrot.lane.b32.xlu0 %v7631_v23, %s7446_s21  ;;  %v374_v30 = vcombine.high %v7641_v25, %v7634_v24  ;;  %v399_v31 = vcombine.low %v7593_v7, %v7631_v23  ;;  %v373_v35 = vcombine.low %v7641_v25, %v7634_v24 }
  0xa2   : > { %v7666_v36 = vrot.slane %v399_v31, %v7627_v21  ;;  %v7688_v44 = vrot.slane %v374_v30, %v7672_v39 }
  0xa3   : > { %v7643_v26 = vpop.permute.xlu1 %311  ;;  %v7645_v27 = vpop.permute.xlu0 %309 }
  0xa4   : > { %751 = vrot.lane.b32.xlu1 %v7629_v22, %s7446_s21  ;;  %753 = vrot.lane.b32.xlu0 %v7645_v27, %s7446_s21  ;;  %v408_v41 = vcombine.high %v7679_v40, %v7666_v36  ;;  %v644_v49 = vshrl.u32 %v7688_v44, 16 }
  0xa6   : > { %v7695_v45 = vrot.slane %v408_v41, %v7672_v39  ;;  %v407_v41 = vcombine.low %v7679_v40, %v7666_v36  ;;  %v11424_v36 = vmov 0  }
  0xa7   : > { %v7655_v32 = vpop.permute.xlu1 %317  ;;  %v7657_v33 = vpop.permute.xlu0 %315 }
  0xa8   : > { %11662 = vst [vmem:[#allocation10_spill] sm:$0xff] %v7655_v32  ;;  %755 = vrot.lane.b32.xlu1 %v7643_v26, %s7446_s21  ;;  %757 = vrot.lane.b32.xlu0 %v7657_v33, %s7446_s21  ;;  %v643_v48 = vpack.i.b16 %v7695_v45, %v7688_v44  ;;  %v645_v50 = vshrl.u32 %v7695_v45, 16 }
  0xaa   : > { %v7709_v51 = vpack.i.b16 %v645_v50, %v644_v49  ;;  %v7784_v50 = vrot.slane %v373_v35, %v7672_v39 }
  0xab   : > { %v7668_v37 = vpop.permute.xlu1 %323  ;;  %v7670_v38 = vpop.permute.xlu0 %321 }
  0xac   : > { %11663 = vst [vmem:[#allocation11_spill] sm:$0xff] %v7668_v37  ;;  %759 = vrot.lane.b32.xlu1 %v7655_v32, %s7446_s21  ;;  %761 = vrot.lane.b32.xlu0 %v7670_v38, %s7446_s21  ;;  %11669 = vst [vmem:[#allocation17_spill] sm:$0xff] %v7709_v51  ;;  %v389_v40 = vcombine.high %v7784_v50, %v11424_v36  ;;  %v11689_v51 = vmov 0 }
  0xad   : > { %11678 = vst [vmem:[#allocation26_spill] sm:$0xff] %v7784_v50  ;;  %v11690_v51 = vsel %vm7901_vm2, 4294967295, %v11689_v51 }
  0xae   : > { %11691 = vst [vmem:[#allocation37_spill] sm:$0xff] %v11690_v51 }
  0xaf   : > { %v7683_v42 = vpop.permute.xlu1 %329  ;;  %v7685_v43 = vpop.permute.xlu0 %327 }
  0xb0   : > { %11665 = vst [vmem:[#allocation13_spill] sm:$0xff] %v7683_v42  ;;  %11666 = vst [vmem:[#allocation14_spill] sm:$0xff] %v7685_v43  ;;  %763 = vrot.lane.b32.xlu1 %v7668_v37, %s7446_s21  ;;  %765 = vrot.lane.b32.xlu0 %v7685_v43, %s7446_s21 }
  0xb3   : > { %v7697_v46 = vpop.permute.xlu1 %335  ;;  %v7699_v47 = vpop.permute.xlu0 %333 }
  0xb4   : > { %11667 = vst [vmem:[#allocation15_spill] sm:$0xff] %v7697_v46  ;;  %11668 = vst [vmem:[#allocation16_spill] sm:$0xff] %v7699_v47  ;;  %767 = vrot.lane.b32.xlu1 %v7683_v42, %s7446_s21  ;;  %769 = vrot.lane.b32.xlu0 %v7699_v47, %s7446_s21  ;;  %v425_v56 = vcombine.low %v7645_v27, %v7699_v47 }
  0xb6   : > { %v432_v62 = vrot.slane %v425_v56, %v7627_v21 }
  0xb7   : > { %v7711_v52 = vpop.permute.xlu1 %341  ;;  %v7713_v53 = vpop.permute.xlu0 %339 }
  0xb8   : > { %11670 = vst [vmem:[#allocation18_spill] sm:$0xff] %v7711_v52  ;;  %11671 = vst [vmem:[#allocation19_spill] sm:$0xff] %v7713_v53  ;;  %771 = vrot.lane.b32.xlu1 %v7697_v46, %s7446_s21  ;;  %773 = vrot.lane.b32.xlu0 %v7713_v53, %s7446_s21  ;;  %v459_v58 = vcombine.low %v7657_v33, %v7713_v53 }
  0xba   : > { %v466_v11 = vrot.slane %v459_v58, %v7627_v21 }
  0xbb   : > { %v7719_v54 = vpop.permute.xlu0 %345  ;;  %v7729_v57 = vpop.permute.xlu1 %347 }
  0xbc   : > { %11672 = vst [vmem:[#allocation20_spill] sm:$0xff] %v7719_v54  ;;  %v433_v55 = vcombine.low %v7670_v38, %v7719_v54  ;;  %775 = vrot.lane.b32.xlu1 %v7711_v52, %s7446_s21  ;;  %777 = vrot.lane.b32.xlu0 %v7719_v54, %s7446_s21  ;;  %11673 = vst [vmem:[#allocation21_spill] sm:$0xff] %v7729_v57 }
  0xbe   : > { %v440_v60 = vrot.slane %v433_v55, %v7627_v21  ;;  %v7787_v55 = vrot.slane %v407_v41, %v7672_v39 }
  0xbf   : > { %v7733_v59 = vpop.permute.xlu0 %351  ;;  %v7744_v10 = vpop.permute.xlu1 %353 }
  0xc0   : > { %11674 = vst [vmem:[#allocation22_spill] sm:$0xff] %v7733_v59  ;;  %v467_v61 = vcombine.low %v7685_v43, %v7733_v59  ;;  %779 = vrot.lane.b32.xlu1 %v7729_v57, %s7446_s21  ;;  %781 = vrot.lane.b32.xlu0 %v7733_v59, %s7446_s21  ;;  %11675 = vst [vmem:[#allocation23_spill] sm:$0xff] %v7744_v10  ;;  %v442_v12 = vcombine.high %v432_v62, %v440_v60 }
  0xc1   : > { %11679 = vst [vmem:[#allocation27_spill] sm:$0xff] %v7787_v55  ;;  %v423_v56 = vcombine.high %v7787_v55, %v11424_v36  ;;  %v2260_v55 = vshll.u32 %v7583_v4, 16 }
  0xc2   : > { %v474_v63 = vrot.slane %v467_v61, %v7627_v21  ;;  %v456_v15 = vrot.slane %v442_v12, %v7672_v39 }
  0xc3   : > { %v637_v61 = vpack.i.b16 %v423_v56, %v389_v40 }
  0xc4   : > { %783 = vrot.lane.b32.xlu1 %v7744_v10, %s7446_s21  ;;  %1183 = vrot.lane.b32.xlu0 %v7579_v3, %s7445_s20  ;;  %v476_v16 = vcombine.high %v466_v11, %v474_v63  ;;  %v692_v28 = vshrl.u32 %v456_v15, 16  ;;  %v475_v49 = vcombine.low %v466_v11, %v474_v63  ;;  %v639_v63 = vshrl.u32 %v423_v56, 16 }
  0xc6   : > { %v490_v19 = vrot.slane %v476_v16, %v7672_v39  ;;  %v7797_v25 = vrot.slane %v475_v49, %v7672_v39 }
  0xc8   : > { %1185 = vrot.lane.b32.xlu1 %v7585_v5, %s7445_s20  ;;  %1187 = vrot.lane.b32.xlu0 %v7577_v2, %s7445_s20  ;;  %v691_v20 = vpack.i.b16 %v490_v19, %v456_v15  ;;  %v693_v29 = vshrl.u32 %v490_v19, 16  ;;  %11681 = vst [vmem:[#allocation29_spill] sm:$0xff] %v7797_v25  ;;  %v492_v49 = vcombine.high %v490_v19, %v11424_v36 }
  0xca   : > { %v7757_v30 = vcombine.low %v643_v48, %v691_v20  ;;  %v7759_v31 = vpack.i.b16 %v693_v29, %v692_v28  ;;  %v441_v48 = vcombine.low %v432_v62, %v440_v60  ;;  %v491_v60 = vcombine.high %v7797_v25, %v11424_v36 }
  0xcb   : > { %v638_v62 = vshrl.u32 %v389_v40, 16  ;;  %v390_v28 = vcombine.high %v7688_v44, %v11424_v36  ;;  %v424_v29 = vcombine.high %v7695_v45, %v11424_v36  ;;  %v2212_v44 = vshll.u32 %v7519_v1, 16 }
  0xcc   : > { %11676 = vst [vmem:[#allocation24_spill] sm:$0xff] %v7757_v30  ;;  %11677 = vst [vmem:[#allocation25_spill] sm:$0xff] %v7759_v31  ;;  %1189 = vrot.lane.b32.xlu1 %v7583_v4, %s7445_s20  ;;  %1191 = vrot.lane.b32.xlu0 %v7593_v7, %s7445_s20  ;;  %v7794_v24 = vrot.slane %v441_v48, %v7672_v39  ;;  %v687_v20 = vshrl.u32 %v491_v60, 16  ;;  %v458_v48 = vcombine.high %v456_v15, %v11424_v36 }
  0xcd   : > { %v7815_v16 = vpack.i.b16 %v639_v63, %v638_v62  ;;  %v649_v40 = vpack.i.b16 %v424_v29, %v390_v28  ;;  %v650_v45 = vshrl.u32 %v390_v28, 16  ;;  %v2230_v63 = vshll.u32 %v7579_v3, 16 }
  0xce   : > { %11680 = vst [vmem:[#allocation28_spill] sm:$0xff] %v7794_v24  ;;  %v457_v58 = vcombine.high %v7794_v24, %v11424_v36  ;;  %v697_v56 = vpack.i.b16 %v492_v49, %v458_v48 }
  0xcf   : > { %11682 = vst [vmem:[#allocation30_spill] sm:$0xff] %v7815_v16 }
  0xd0   : > { %1193 = vrot.lane.b32.xlu1 %v7591_v6, %s7445_s20  ;;  %1195 = vrot.lane.b32.xlu0 %v7601_v9, %s7445_s20  ;;  %v685_v11 = vpack.i.b16 %v491_v60, %v457_v58  ;;  %v686_v12 = vshrl.u32 %v457_v58, 16  ;;  %v651_v58 = vshrl.u32 %v424_v29, 16  ;;  %v698_v60 = vshrl.u32 %v458_v48, 16 }
  0xd1   : > { %v7833_v62 = vcombine.low %v649_v40, %v697_v56  ;;  %v2203_v29 = vshrl.u32 %v7512_v0, 16  ;;  %v2206_v48 = vshll.u32 %v7512_v0, 16 }
  0xd2   : > { %v7821_v35 = vcombine.low %v637_v61, %v685_v11  ;;  %v7823_v41 = vpack.i.b16 %v687_v20, %v686_v12  ;;  %v699_v61 = vshrl.u32 %v492_v49, 16  ;;  %v7835_v15 = vpack.i.b16 %v651_v58, %v650_v45  ;;  %v7864_v12 = vld [vmem:[%s7509_s19 + $0x8] sm:$0x1] }
  0xd3   : > { %11685 = vst [vmem:[#allocation33_spill] sm:$0xff] %v7833_v62  ;;  %v2205_v56 = vrot.slane %v2203_v29, 4  ;;  %v2208_v45 = vrot.slane %v2206_v48, 5  ;;  %v2232_v48 = vrot.slane %v2230_v63, 5 }
  0xd4   : > { %1197 = vrot.lane.b32.xlu1 %v7599_v8, %s7445_s20  ;;  %1199 = vrot.lane.b32.xlu0 %v7609_v14, %s7445_s20  ;;  %11683 = vst [vmem:[#allocation31_spill] sm:$0xff] %v7821_v35  ;;  %11684 = vst [vmem:[#allocation32_spill] sm:$0xff] %v7823_v41  ;;  %v7837_v19 = vpack.i.b16 %v699_v61, %v698_v60  ;;  %v2227_v61 = vshrl.u32 %v7579_v3, 16  ;;  %v2275_v41 = vshrl.u32 %v7593_v7, 16 }
  0xd5   : > { %11686 = vst [vmem:[#allocation34_spill] sm:$0xff] %v7835_v15  ;;  %v2209_v0 = vor.u32 %v2208_v45, %v2205_v56  ;;  %v2254_v15 = vshll.u32 %v7577_v2, 16  ;;  %v7897_v56 = vrot.slane %v2212_v44, 5 }
  0xd6   : > { %11687 = vst [vmem:[#allocation35_spill] sm:$0xff] %v7837_v19  ;;  %v2229_v29 = vrot.slane %v2227_v61, 4  ;;  %v2251_v19 = vshrl.u32 %v7577_v2, 16 }
  0xd7   : > { %v2210_v62 = vrot.slane %v2209_v0, 4  ;;  %11688 = vst [vmem:[#allocation36_spill] sm:$0xff] %v7897_v56  ;;  %v2256_v35 = vrot.slane %v2254_v15, 5  ;;  %v2278_v15 = vshll.u32 %v7593_v7, 16 }
  0xd8   : > { %1201 = vrot.lane.b32.xlu1 %v7607_v13, %s7445_s20  ;;  %1203 = vrot.lane.b32.xlu0 %v7617_v18, %s7445_s20  ;;  %v2233_v63 = vor.u32 %v2232_v48, %v2229_v29  ;;  %v2253_v16 = vrot.slane %v2251_v19, 4 }
  0xd9   : > { %v7913_v44 = vsel %vm7901_vm2, %v2210_v62, %v7897_v56 }
  0xda   : > { %11692 = vst [vmem:[#allocation38_spill] sm:$0xff] %v7913_v44  ;;  %v2234_v48 = vrot.slane %v2233_v63, 4  ;;  %v2257_v50 = vor.u32 %v2256_v35, %v2253_v16  ;;  %v2302_v16 = vshll.u32 %v7601_v9, 16 }
  0xdc   : > { %1205 = vrot.lane.b32.xlu1 %v7615_v17, %s7445_s20  ;;  %1207 = vrot.lane.b32.xlu0 %v7631_v23, %s7445_s20 }
  0xe0   : > { %1209 = vrot.lane.b32.xlu1 %v7629_v22, %s7445_s20  ;;  %1211 = vrot.lane.b32.xlu0 %v7645_v27, %s7445_s20 }
  0xe4   : > { %1213 = vrot.lane.b32.xlu1 %v7643_v26, %s7445_s20  ;;  %1215 = vrot.lane.b32.xlu0 %v7657_v33, %s7445_s20 }
  0xe8   : > { %1217 = vrot.lane.b32.xlu1 %v7655_v32, %s7445_s20  ;;  %1219 = vrot.lane.b32.xlu0 %v7670_v38, %s7445_s20 }
  0xec   : > { %1221 = vrot.lane.b32.xlu1 %v7668_v37, %s7445_s20  ;;  %1223 = vrot.lane.b32.xlu0 %v7685_v43, %s7445_s20 }
  0xf0   : > { %1225 = vrot.lane.b32.xlu1 %v7683_v42, %s7445_s20  ;;  %1227 = vrot.lane.b32.xlu0 %v7699_v47, %s7445_s20 }
  0xf4   : > { %1229 = vrot.lane.b32.xlu1 %v7697_v46, %s7445_s20  ;;  %1231 = vrot.lane.b32.xlu0 %v7713_v53, %s7445_s20 }
  0xf8   : > { %1233 = vrot.lane.b32.xlu1 %v7711_v52, %s7445_s20  ;;  %1235 = vrot.lane.b32.xlu0 %v7719_v54, %s7445_s20 }
  0xfa   : > { %v7857_v11 = vpop.permute.xlu0 %725 }
  0xfc   : > { %1237 = vrot.lane.b32.xlu1 %v7729_v57, %s7445_s20  ;;  %1239 = vrot.lane.b32.xlu0 %v7733_v59, %s7445_s20 }
  0xfe   : > { %v7866_v20 = vpop.permute.xlu1 %727  ;;  %v730_v28 = vpop.permute.xlu0 %729 }
 0x100   : > { %1241 = vrot.lane.b32.xlu1 %v7744_v10, %s7445_s20  ;;  %2169 = vrot.lane.b32.xlu0 %v7864_v12, %s7446_s21 }
 0x102   : > { %v7874_v49 = vpop.permute.xlu1 %731  ;;  %v7876_v40 = vpop.permute.xlu0 %733 }
 0x104   : > { %2171 = vrot.lane.b32.xlu1 %v7864_v12, %s7445_s20  ;;  %2173 = vrot.lane.b32.xlu0 %v7864_v12, %s7447_s22  ;;  %s6987_s22 = sshll.u32 %s12342_s12, 7 }
 0x106   : > { %v7882_v58 = vpop.permute.xlu1 %735  ;;  %v738_v60 = vpop.permute.xlu0 %737 }
 0x107   : > { %v815_v1 = vcombine.low %v7579_v3, %v738_v60 }
 0x108   : > { %2175 = vrot.lane.b32.xlu1 %v7864_v12, %s7448_s23  ;;  %2177 = vrot.lane.b32.xlu0 %v7864_v12, %s7449_s24 }
 0x109   : > { %v822_v19 = vrot.slane %v815_v1, %v7627_v21 }
 0x10a   : > { %v740_v34 = vpop.permute.xlu1 %739  ;;  %v742_v36 = vpop.permute.xlu0 %741 }
 0x10b   : > { %v951_v30 = vcombine.low %v7585_v5, %v740_v34  ;;  %v2236_v34 = vshll.u32 %v7585_v5, 16 }
 0x10c   : > { %2179 = vrot.lane.b32.xlu1 %v7864_v12, %s7450_s25  ;;  %2181 = vrot.lane.b32.xlu0 %v7864_v12, %s7451_s26  ;;  %s11361_s25 = scalar_lea.vmem %s11423_s3, %s6987_s22 }
 0x10d   : > { %v958_v1 = vrot.slane %v951_v30, %v7627_v21 }
 0x10e   : > { %v744_v45 = vpop.permute.xlu1 %743  ;;  %v746_v61 = vpop.permute.xlu0 %745 }
 0x10f   : > { %v823_v31 = vcombine.low %v730_v28, %v746_v61  ;;  %v849_v28 = vcombine.low %v7857_v11, %v742_v36  ;;  %v2277_v61 = vrot.slane %v2275_v41, 4  ;;  %v2299_v36 = vshrl.u32 %v7601_v9, 16 }
 0x110   : > { %2183 = vrot.lane.b32.xlu1 %v7864_v12, %s7452_s27  ;;  %2185 = vrot.lane.b32.xlu0 %v7864_v12, %s7453_s28 }
 0x111   : > { %v830_v60 = vrot.slane %v823_v31, %v7627_v21  ;;  %v2280_v31 = vrot.slane %v2278_v15, 5  ;;  %v856_v35 = vrot.slane %v849_v28, %v7627_v21 }
 0x112   : > { %v748_v0 = vpop.permute.xlu1 %747  ;;  %v750_v29 = vpop.permute.xlu0 %749 }
 0x113   : > { %v831_v24 = vcombine.low %v822_v19, %v830_v60  ;;  %v832_v62 = vcombine.high %v822_v19, %v830_v60  ;;  %v959_v56 = vcombine.low %v7874_v49, %v748_v0  ;;  %v857_v25 = vcombine.low %v7876_v40, %v750_v29 }
 0x114   : > { %2187 = vrot.lane.b32.xlu1 %v7864_v12, %s7454_s29  ;;  %2189 = vrot.lane.b32.xlu0 %v7864_v12, %s7455_s30  ;;  %v985_v49 = vcombine.low %v7866_v20, %v744_v45  ;;  %v7942_v19 = vrot.slane %v2236_v34, 5  ;;  %v2258_v60 = vrot.slane %v2257_v50, 4  ;;  %v2301_v20 = vrot.slane %v2299_v36, 4 }
 0x115   : > { %v7932_v41 = vrot.slane %v831_v24, %v7672_v39  ;;  %v966_v11 = vrot.slane %v959_v56, %v7627_v21  ;;  %v864_v30 = vrot.slane %v857_v25, %v7627_v21  ;;  %v7938_v40 = vrot.slane %v832_v62, %v7672_v39 }
 0x116   : > { %v752_v63 = vpop.permute.xlu1 %751  ;;  %v7940_v15 = vpop.permute.xlu0 %753  ;;  %11693 = vst [vmem:[#allocation39_spill] sm:$0xff] %v7942_v19  ;;  %v2284_v24 = vshll.u32 %v7591_v6, 16  ;;  %v2281_v25 = vor.u32 %v2280_v31, %v2277_v61  ;;  %v2304_v45 = vrot.slane %v2302_v16, 5  ;;  %v7976_v16 = vsel %vm7901_vm2, %v2234_v48, %v7942_v19 }
 0x117   : > { %v967_v0 = vcombine.low %v958_v1, %v966_v11  ;;  %v865_v28 = vcombine.low %v856_v35, %v864_v30  ;;  %v866_v29 = vcombine.high %v856_v35, %v864_v30  ;;  %v993_v56 = vcombine.low %v7882_v58, %v752_v63  ;;  %11695 = vst [vmem:[#allocation40_spill] sm:$0xff] %v7976_v16 }
 0x118   : > { %2191 = vrot.lane.b32.xlu1 %v7864_v12, %s7456_s4  ;;  %2193 = vrot.lane.b32.xlu0 %v7864_v12, %s7457_s5  ;;  %v968_v62 = vcombine.high %v958_v1, %v966_v11  ;;  %v11694_v35 = vmov 0   ;;  %v992_v58 = vrot.slane %v985_v49, %v7627_v21  ;;  %v7978_v11 = vrot.slane %v2284_v24, 5 }
 0x119   : > { %v7951_v34 = vrot.slane %v865_v28, %v7672_v39  ;;  %v7954_v50 = vrot.slane %v866_v29, %v7672_v39  ;;  %v7958_v30 = vcombine.high %v7932_v41, %v11694_v35  ;;  %v7962_v63 = vrot.slane %v967_v0, %v7672_v39 }
 0x11a   : > { %v1000_v61 = vrot.slane %v993_v56, %v7627_v21  ;;  %v7965_v31 = vpop.permute.xlu1 %755  ;;  %v7967_v1 = vpop.permute.xlu0 %757  ;;  %v7971_v36 = vcombine.high %v7938_v40, %v11694_v35  ;;  %11696 = vst [vmem:[#allocation41_spill] sm:$0xff] %v7978_v11  ;;  %v7980_v49 = vrot.slane %v2260_v55, 5  ;;  %v2308_v0 = vshll.u32 %v7599_v8, 16 }
 0x11b   : > { %v2282_v56 = vrot.slane %v2281_v25, 4  ;;  %v2305_v9 = vor.u32 %v2304_v45, %v2301_v20  ;;  %v7988_v6 = vrot.slane %v968_v62, %v7672_v39  ;;  %v7992_v48 = vcombine.high %v7951_v34, %v11694_v35 }
 0x11c   : > { %11697 = vst [vmem:[#allocation42_spill] sm:$0xff] %v7980_v49  ;;  %v1001_v28 = vcombine.low %v992_v58, %v1000_v61  ;;  %v1002_v29 = vcombine.high %v992_v58, %v1000_v61  ;;  %2195 = vrot.lane.b32.xlu1 %v7864_v12, %s7458_s6  ;;  %2197 = vrot.lane.b32.xlu0 %v7864_v12, %s7459_s7  ;;  %v1096_v55 = vshrl.u32 %v7958_v30, 16  ;;  %v1108_v45 = vshrl.u32 %v7971_v36, 16 }
 0x11d   : > { %v7997_v24 = vcombine.high %v7954_v50, %v11694_v35  ;;  %v8010_v62 = vcombine.high %v7962_v63, %v11694_v35  ;;  %v1097_v19 = vshrl.u32 %v7992_v48, 16  ;;  %v8025_v8 = vsel %vm7901_vm2, %v2258_v60, %v7980_v49 }
 0x11e   : > { %v8000_v58 = vrot.slane %v1001_v28, %v7672_v39  ;;  %v8003_v12 = vrot.slane %v1002_v29, %v7672_v39  ;;  %v8005_v25 = vpop.permute.xlu1 %759  ;;  %v762_v20 = vpop.permute.xlu0 %761  ;;  %11698 = vst [vmem:[#allocation43_spill] sm:$0xff] %v8025_v8  ;;  %v8038_v5 = vsel %vm7901_vm2, %v2282_v56, %v7978_v11  ;;  %v8044_v60 = vcombine.high %v7988_v6, %v11694_v35 }
 0x11f   : > { %v1109_v29 = vshrl.u32 %v7997_v24, 16  ;;  %v8027_v7 = vpack.i.b16 %v1097_v19, %v1096_v55  ;;  %11699 = vst [vmem:[#allocation44_spill] sm:$0xff] %v8038_v5  ;;  %v2306_v55 = vrot.slane %v2305_v9, 4  ;;  %v1091_v42 = vshrl.u32 %v7951_v34, 16 }
 0x120   : > { %2990 = vrot.lane.b32.xlu0 %v7976_v16, %s7446_s21  ;;  %2986 = vrot.lane.b32.xlu1 %v7913_v44, %s7446_s21  ;;  %v8033_v28 = vcombine.high %v8000_v58, %v11694_v35  ;;  %v8040_v16 = vrot.slane %v2308_v0, 5  ;;  %v8048_v19 = vcombine.high %v8003_v12, %v11694_v35  ;;  %v1132_v56 = vshrl.u32 %v8044_v60, 16 }
 0x121   : > { %v8029_v61 = vpack.i.b16 %v1109_v29, %v1108_v45  ;;  %v1120_v29 = vshrl.u32 %v8010_v62, 16  ;;  %v1115_v53 = vshrl.u32 %v8000_v58, 16 }
 0x122   : > { %v764_v4 = vpop.permute.xlu1 %763  ;;  %v766_v3 = vpop.permute.xlu0 %765  ;;  %11700 = vst [vmem:[#allocation45_spill] sm:$0xff] %v8040_v16  ;;  %v1121_v49 = vshrl.u32 %v8033_v28, 16  ;;  %v1133_v9 = vshrl.u32 %v8048_v19, 16 }
 0x124   : > { %2998 = vrot.lane.b32.xlu0 %v8038_v5, %s7446_s21  ;;  %2994 = vrot.lane.b32.xlu1 %v8025_v8, %s7446_s21  ;;  %v8062_v11 = vpack.i.b16 %v1121_v49, %v1120_v29  ;;  %v8064_v10 = vpack.i.b16 %v1133_v9, %v1132_v56  ;;  %v8069_v5 = vsel %vm7901_vm2, %v2306_v55, %v8040_v16 }
 0x125   : > { %11701 = vst [vmem:[#allocation46_spill] sm:$0xff] %v8069_v5 }
 0x126   : > { %v768_v45 = vpop.permute.xlu1 %767  ;;  %v770_v44 = vpop.permute.xlu0 %769 }
 0x127   : > { %v883_v57 = vcombine.low %v7940_v15, %v770_v44 }
 0x128   : > { %3002 = vrot.lane.b32.xlu1 %v8069_v5, %s7446_s21  ;;  %v1090_v5 = vshrl.u32 %v7932_v41, 16 }
 0x129   : > { %v890_v56 = vrot.slane %v883_v57, %v7627_v21  ;;  %v1089_v57 = vpack.i.b16 %v7951_v34, %v7932_v41  ;;  %v1114_v41 = vshrl.u32 %v7962_v63, 16 }
 0x12a   : > { %v772_v8 = vpop.permute.xlu1 %771  ;;  %v774_v0 = vpop.permute.xlu0 %773 }
 0x12b   : > { %v1019_v52 = vcombine.low %v7965_v31, %v772_v8  ;;  %v917_v9 = vcombine.low %v7967_v1, %v774_v0  ;;  %v1102_v1 = vshrl.u32 %v7938_v40, 16 }
 0x12d   : > { %v1026_v55 = vrot.slane %v1019_v52, %v7627_v21  ;;  %v924_v52 = vrot.slane %v917_v9, %v7627_v21  ;;  %v1092_v9 = vpack.i.b16 %v1091_v42, %v1090_v5 }
 0x12e   : > { %v776_v49 = vpop.permute.xlu1 %775  ;;  %v778_v29 = vpop.permute.xlu0 %777 }
 0x12f   : > { %v891_v46 = vcombine.low %v762_v20, %v778_v29  ;;  %v1053_v20 = vcombine.low %v8005_v25, %v776_v49 }
 0x131   : > { %v898_v59 = vrot.slane %v891_v46, %v7627_v21  ;;  %v1103_v46 = vshrl.u32 %v7954_v50, 16 }
 0x132   : > { %v780_v16 = vpop.permute.xlu1 %779  ;;  %v782_v54 = vpop.permute.xlu0 %781 }
 0x133   : > { %v899_v44 = vcombine.low %v890_v56, %v898_v59  ;;  %v900_v15 = vcombine.high %v890_v56, %v898_v59  ;;  %v1027_v8 = vcombine.low %v764_v4, %v780_v16  ;;  %v925_v31 = vcombine.low %v766_v3, %v782_v54 }
 0x134   : > { %v1101_v59 = vpack.i.b16 %v7954_v50, %v7938_v40  ;;  %v1104_v40 = vpack.i.b16 %v1103_v46, %v1102_v1 }
 0x135   : > { %v1034_v0 = vrot.slane %v1027_v8, %v7627_v21  ;;  %v932_v29 = vrot.slane %v925_v31, %v7627_v21  ;;  %v907_v3 = vrot.slane %v899_v44, %v7672_v39  ;;  %v914_v4 = vrot.slane %v900_v15, %v7672_v39 }
 0x136   : > { %v784_v54 = vpop.permute.xlu1 %783  ;;  %v8093_v16 = vpop.permute.xlu0 %1183  ;;  %v1060_v8 = vrot.slane %v1053_v20, %v7627_v21  ;;  %v1113_v15 = vpack.i.b16 %v8000_v58, %v7962_v63 }
 0x137   : > { %v1035_v25 = vcombine.low %v1026_v55, %v1034_v0  ;;  %v933_v49 = vcombine.low %v924_v52, %v932_v29  ;;  %v934_v56 = vcombine.high %v924_v52, %v932_v29  ;;  %v1036_v31 = vcombine.high %v1026_v55, %v1034_v0 }
 0x138   : > { %v1061_v37 = vcombine.low %v768_v45, %v784_v54  ;;  %v1138_v52 = vshrl.u32 %v907_v3, 16  ;;  %v1150_v5 = vshrl.u32 %v914_v4, 16  ;;  %v915_v42 = vcombine.high %v907_v3, %v11694_v35 }
 0x139   : > { %v941_v50 = vrot.slane %v933_v49, %v7672_v39  ;;  %v948_v44 = vrot.slane %v934_v56, %v7672_v39  ;;  %v1043_v45 = vrot.slane %v1035_v25, %v7672_v39  ;;  %v8109_v46 = vrot.slane %v1036_v31, %v7672_v39 }
 0x13a   : > { %v1068_v34 = vrot.slane %v1061_v37, %v7627_v21  ;;  %v8104_v47 = vpop.permute.xlu0 %1187  ;;  %v916_v49 = vcombine.high %v914_v4, %v11694_v35  ;;  %v1144_v31 = vshrl.u32 %v915_v42, 16 }
 0x13b   : > { %v1137_v55 = vpack.i.b16 %v941_v50, %v907_v3  ;;  %v1139_v20 = vshrl.u32 %v941_v50, 16  ;;  %v1151_v1 = vshrl.u32 %v948_v44, 16  ;;  %v1149_v29 = vpack.i.b16 %v948_v44, %v914_v4 }
 0x13c   : > { %v1069_v0 = vcombine.low %v1060_v8, %v1068_v34  ;;  %v1070_v63 = vcombine.high %v1060_v8, %v1068_v34  ;;  %v949_v3 = vcombine.high %v941_v50, %v11694_v35  ;;  %v950_v25 = vcombine.high %v948_v44, %v11694_v35 }
 0x13d   : > { %v6754_v58 = vcombine.low %v1089_v57, %v1137_v55  ;;  %v1140_v54 = vpack.i.b16 %v1139_v20, %v1138_v52  ;;  %v1152_v37 = vpack.i.b16 %v1151_v1, %v1150_v5  ;;  %v1162_v8 = vshrl.u32 %v1043_v45, 16 }
 0x13e   : > { %v1077_v56 = vrot.slane %v1069_v0, %v7672_v39  ;;  %v1084_v32 = vrot.slane %v1070_v63, %v7672_v39  ;;  %v8114_v51 = vpop.permute.xlu0 %1191  ;;  %v1127_v57 = vshrl.u32 %v8003_v12, 16  ;;  %v6758_v52 = vcombine.low %v1101_v59, %v1149_v29 }
 0x13f   : > { %1737 = vrot.lane.b32.xlu0 %v6754_v58, %s7463_s8  ;;  %v6755_v34 = vcombine.low %v1092_v9, %v1140_v54  ;;  %v1051_v55 = vcombine.high %v1043_v45, %v11694_v35  ;;  %v1143_v20 = vpack.i.b16 %v949_v3, %v915_v42  ;;  %v1145_v1 = vshrl.u32 %v949_v3, 16 }
 0x140   : > { %v1161_v4 = vpack.i.b16 %v1077_v56, %v1043_v45  ;;  %v1163_v5 = vshrl.u32 %v1077_v56, 16  ;;  %v1155_v50 = vpack.i.b16 %v950_v25, %v916_v49  ;;  %v1157_v0 = vshrl.u32 %v950_v25, 16 }
 0x141   : > { %1739 = vrot.lane.b32.xlu1 %v6755_v34, %s7463_s8  ;;  %v6759_v63 = vcombine.low %v1104_v40, %v1152_v37  ;;  %v1174_v58 = vshrl.u32 %v8109_v46, 16  ;;  %v1175_v9 = vshrl.u32 %v1084_v32, 16  ;;  %v1156_v54 = vshrl.u32 %v916_v49, 16 }
 0x142   : > { %v1196_v44 = vpop.permute.xlu0 %1195  ;;  %v1164_v43 = vpack.i.b16 %v1163_v5, %v1162_v8  ;;  %v11702_v59 = vpack.i.b16 %v7992_v48, %v7958_v30  ;;  %v8129_v45 = vpack.i.b16 %v1145_v1, %v1144_v31  ;;  %v11703_v42 = vpack.i.b16 %v7997_v24, %v7971_v36  ;;  %v8145_v36 = vpop.permute.xlu1 %1185 }
 0x143   : > { %1745 = vrot.lane.b32.xlu0 %v6758_v52, %s7463_s8  ;;  %v1116_v40 = vpack.i.b16 %v1115_v53, %v1114_v41  ;;  %v1173_v37 = vpack.i.b16 %v1084_v32, %v8109_v46  ;;  %v8137_v25 = vpack.i.b16 %v1157_v0, %v1156_v54  ;;  %v1085_v49 = vcombine.high %v1077_v56, %v11694_v35 }
 0x144   : > { %v8127_v29 = vcombine.low %v11702_v59, %v1143_v20  ;;  %v8134_v3 = vcombine.low %v11703_v42, %v1155_v50  ;;  %v6762_v34 = vcombine.low %v1113_v15, %v1161_v4  ;;  %v1168_v48 = vshrl.u32 %v1051_v55, 16  ;;  %11704 = vst [vmem:[#allocation47_spill] sm:$0xff] %v8145_v36 }
 0x145   : > { %1747 = vrot.lane.b32.xlu1 %v6759_v63, %s7463_s8  ;;  %v1052_v8 = vcombine.high %v8109_v46, %v11694_v35  ;;  %v1167_v41 = vpack.i.b16 %v1085_v49, %v1051_v55  ;;  %v1169_v31 = vshrl.u32 %v1085_v49, 16  ;;  %v1086_v56 = vcombine.high %v1084_v32, %v11694_v35 }
 0x146   : > { %v1200_v24 = vpop.permute.xlu0 %1199  ;;  %v6763_v15 = vcombine.low %v1116_v40, %v1164_v43  ;;  %v1125_v52 = vpack.i.b16 %v8003_v12, %v7988_v6  ;;  %v1176_v4 = vpack.i.b16 %v1175_v9, %v1174_v58  ;;  %v11705_v46 = vpack.i.b16 %v8033_v28, %v8010_v62  ;;  %v8175_v59 = vpop.permute.xlu1 %1189 }
 0x147   : > { %1753 = vrot.lane.b32.xlu0 %v6762_v34, %s7463_s8  ;;  %v1180_v5 = vshrl.u32 %v1052_v8, 16  ;;  %v8158_v1 = vpack.i.b16 %v1169_v31, %v1168_v48  ;;  %v1179_v50 = vpack.i.b16 %v1086_v56, %v1052_v8  ;;  %v1181_v55 = vshrl.u32 %v1086_v56, 16  ;;  %11708 = vst [vmem:[#allocation48_spill] sm:$0xff] %v8175_v59 }
 0x148   : > { %v8156_v20 = vcombine.low %v11705_v46, %v1167_v41  ;;  %v1273_v0 = vcombine.low %v7577_v2, %v1196_v44  ;;  %v6766_v32 = vcombine.low %v1125_v52, %v1173_v37  ;;  %v11706_v43 = vshrl.u32 %v7988_v6, 16 }
 0x149   : > { %1755 = vrot.lane.b32.xlu1 %v6763_v15, %s7463_s8  ;;  %v11707_v62 = vpack.i.b16 %v8048_v19, %v8044_v60  ;;  %v8171_v9 = vpack.i.b16 %v1181_v55, %v1180_v5  ;;  %v1307_v42 = vcombine.low %v8093_v16, %v1200_v24  ;;  %v2323_v58 = vshrl.u32 %v7609_v14, 16 }
 0x14a   : > { %v1128_v63 = vpack.i.b16 %v1127_v57, %v11706_v43  ;;  %v1204_v12 = vpop.permute.xlu0 %1203  ;;  %v1280_v57 = vrot.slane %v1273_v0, %v7627_v21  ;;  %v8189_v8 = vpop.permute.xlu1 %1193  ;;  %v2347_v36 = vshrl.u32 %v7617_v18, 16 }
 0x14b   : > { %v8169_v28 = vcombine.low %v11707_v62, %v1179_v50  ;;  %v1281_v54 = vcombine.low %v8104_v47, %v1204_v12  ;;  %1761 = vrot.lane.b32.xlu0 %v6766_v32, %s7463_s8  ;;  %v1314_v49 = vrot.slane %v1307_v42, %v7627_v21  ;;  %11709 = vst [vmem:[#allocation49_spill] sm:$0xff] %v8189_v8 }
 0x14c   : > { %v6767_v44 = vcombine.low %v1128_v63, %v1176_v4 }
 0x14d   : > { %v1288_v60 = vrot.slane %v1281_v54, %v7627_v21 }
 0x14e   : > { %1763 = vrot.lane.b32.xlu1 %v6767_v44, %s7463_s8  ;;  %v1208_v19 = vpop.permute.xlu0 %1207  ;;  %v8211_v50 = vpop.permute.xlu1 %1197 }
 0x14f   : > { %v1289_v40 = vcombine.low %v1280_v57, %v1288_v60  ;;  %v1290_v37 = vcombine.high %v1280_v57, %v1288_v60  ;;  %v1315_v47 = vcombine.low %v8114_v51, %v1208_v19  ;;  %11710 = vst [vmem:[#allocation50_spill] sm:$0xff] %v8211_v50 }
 0x151   : > { %v8186_v34 = vrot.slane %v1289_v40, %v7672_v39  ;;  %v1322_v48 = vrot.slane %v1315_v47, %v7627_v21  ;;  %v8192_v16 = vrot.slane %v1290_v37, %v7672_v39 }
 0x152   : > { %v1212_v41 = vpop.permute.xlu0 %1211  ;;  %v8233_v40 = vpop.permute.xlu1 %1201 }
 0x153   : > { %v1323_v24 = vcombine.low %v1314_v49, %v1322_v48  ;;  %v1324_v31 = vcombine.high %v1314_v49, %v1322_v48  ;;  %v8200_v51 = vcombine.high %v8186_v34, %v11694_v35  ;;  %v8209_v46 = vcombine.high %v8192_v16, %v11694_v35  ;;  %11714 = vst [vmem:[#allocation54_spill] sm:$0xff] %v8233_v40 }
 0x154   : > { %v1560_v55 = vshrl.u32 %v8192_v16, 16  ;;  %v1548_v43 = vshrl.u32 %v8186_v34, 16 }
 0x155   : > { %v1331_v56 = vrot.slane %v1323_v24, %v7672_v39  ;;  %v8196_v15 = vrot.slane %v1324_v31, %v7672_v39  ;;  %v1554_v63 = vshrl.u32 %v8200_v51, 16  ;;  %v1566_v42 = vshrl.u32 %v8209_v46, 16 }
 0x156   : > { %v1216_v52 = vpop.permute.xlu0 %1215  ;;  %v8235_v49 = vpop.permute.xlu1 %1205 }
 0x157   : > { %v8203_v4 = vcombine.high %v1331_v56, %v11694_v35  ;;  %v1561_v0 = vshrl.u32 %v8196_v15, 16  ;;  %v8217_v32 = vcombine.high %v8196_v15, %v11694_v35  ;;  %11715 = vst [vmem:[#allocation55_spill] sm:$0xff] %v8235_v49  ;;  %v1549_v5 = vshrl.u32 %v1331_v56, 16 }
 0x159   : > { %v1555_v12 = vshrl.u32 %v8203_v4, 16  ;;  %v8223_v54 = vpack.i.b16 %v1561_v0, %v1560_v55  ;;  %v1567_v60 = vshrl.u32 %v8217_v32, 16  ;;  %v1550_v30 = vpack.i.b16 %v1549_v5, %v1548_v43 }
 0x15a   : > { %v1220_v62 = vpop.permute.xlu0 %1219  ;;  %v8237_v31 = vpop.permute.xlu1 %1209  ;;  %v2350_v5 = vshll.u32 %v7617_v18, 16  ;;  %v2398_v43 = vshll.u32 %v7645_v27, 16 }
 0x15b   : > { %11711 = vst [vmem:[#allocation51_spill] sm:$0xff] %v8223_v54  ;;  %v8227_v57 = vpack.i.b16 %v1555_v12, %v1554_v63  ;;  %v8231_v19 = vpack.i.b16 %v1567_v60, %v1566_v42  ;;  %11716 = vst [vmem:[#allocation56_spill] sm:$0xff] %v8237_v31  ;;  %v7415_v63 = vld [vmem:[%s11421_s1] sm:$0x3f]  }
 0x15c   : > { %7366 = vmatprep.subr.msk.bf16.mxu1 %vm1971_vm3, %v7415_v63 }
 0x15d   : > { %11712 = vst [vmem:[#allocation52_spill] sm:$0xff] %v8227_v57  ;;  %11713 = vst [vmem:[#allocation53_spill] sm:$0xff] %v8231_v19  ;;  %v7418_v19 = vld [vmem:[%s7509_s19] sm:$0xf]  ;;  %v11788_v57 = vld [vmem:[#allocation3_spill] sm:$0xff] }
 0x15e   : > { %v1224_v37 = vpop.permute.xlu0 %1223 }
 0x162   : > { %v1228_v47 = vpop.permute.xlu0 %1227 }
 0x163   : > { %v1341_v24 = vcombine.low %v1212_v41, %v1228_v47  ;;  %v1973_v41 = vsel %vm1971_vm3, %v7415_v63, 0  ;;  %v2326_v63 = vshll.u32 %v7609_v14, 16 }
 0x164   : > { %7167 = vmatpush3.bf16.msra.mxu1 %v1973_v41 }
 0x165   : > { %v8243_v12 = vrot.slane %v1341_v24, %v7627_v21 }
 0x166   : > { %v1232_v48 = vpop.permute.xlu0 %1231 }
 0x167   : > { %v1375_v42 = vcombine.low %v1216_v52, %v1232_v48 }
 0x169   : > { %v8257_v52 = vrot.slane %v1375_v42, %v7627_v21  ;;  %v1547_v42 = vpack.i.b16 %v1331_v56, %v8186_v34  ;;  %v2328_v34 = vrot.slane %v2326_v63, 5 }
 0x16a   : > { %v1236_v55 = vpop.permute.xlu0 %1235 }
 0x16b   : > { %v1349_v0 = vcombine.low %v1220_v62, %v1236_v55  ;;  %v8252_v55 = vpop.permute.xlu1 %1213 }
 0x16c   : > { %11717 = vst [vmem:[#allocation57_spill] sm:$0xff] %v8252_v55 }
 0x16d   : > { %v8246_v60 = vrot.slane %v1349_v0, %v7627_v21 }
 0x16e   : > { %v1240_v44 = vpop.permute.xlu0 %1239 }
 0x16f   : > { %v1383_v47 = vcombine.low %v1224_v37, %v1240_v44  ;;  %v1357_v24 = vcombine.low %v8243_v12, %v8246_v60  ;;  %v8268_v41 = vpop.permute.xlu1 %1217 }
 0x170   : > { %11718 = vst [vmem:[#allocation58_spill] sm:$0xff] %v8268_v41  ;;  %v2325_v41 = vrot.slane %v2323_v58, 4  ;;  %v2395_v58 = vshrl.u32 %v7645_v27, 16 }
 0x171   : > { %v8260_v48 = vrot.slane %v1383_v47, %v7627_v21  ;;  %v1365_v44 = vrot.slane %v1357_v24, %v7672_v39 }
 0x172   : > { %v2329_v63 = vor.u32 %v2328_v34, %v2325_v41  ;;  %v2397_v40 = vrot.slane %v2395_v58, 4  ;;  %v2404_v58 = vshll.u32 %v7643_v26, 16 }
 0x173   : > { %v1391_v0 = vcombine.low %v8257_v52, %v8260_v48  ;;  %v1596_v47 = vshrl.u32 %v1365_v44, 16  ;;  %v8274_v24 = vpop.permute.xlu1 %1221 }
 0x174   : > { %11719 = vst [vmem:[#allocation59_spill] sm:$0xff] %v8274_v24  ;;  %v2330_v34 = vrot.slane %v2329_v63, 4  ;;  %v8340_v31 = vrot.slane %v2404_v58, 5  ;;  %v11739_v58 = vld [vmem:[#allocation11_spill] sm:$0xff] }
 0x175   : > { %v1399_v37 = vrot.slane %v1391_v0, %v7672_v39 }
 0x177   : > { %v1595_v62 = vpack.i.b16 %v1399_v37, %v1365_v44  ;;  %v1597_v6 = vshrl.u32 %v1399_v37, 16  ;;  %v8279_v56 = vcombine.high %v1399_v37, %v11694_v35  ;;  %v2349_v37 = vrot.slane %v2347_v36, 4 }
 0x178   : > { %v2356_v36 = vshll.u32 %v7615_v17, 16 }
 0x179   : > { %v6770_v53 = vcombine.low %v1547_v42, %v1595_v62  ;;  %v1598_v55 = vpack.i.b16 %v1597_v6, %v1596_v47  ;;  %v8286_v6 = vcombine.high %v1365_v44, %v11694_v35  ;;  %v8292_v62 = vpop.permute.xlu1 %1225  ;;  %v2352_v42 = vrot.slane %v2350_v5, 5 }
 0x17a   : > { %11720 = vst [vmem:[#allocation60_spill] sm:$0xff] %v8292_v62  ;;  %v2419_v47 = vshrl.u32 %v7657_v33, 16  ;;  %v8324_v63 = vrot.slane %v2356_v36, 5 }
 0x17b   : > { %1817 = vrot.lane.b32.xlu0 %v6770_v53, %s7464_s11  ;;  %v6771_v0 = vcombine.low %v1550_v30, %v1598_v55  ;;  %v2371_v53 = vshrl.u32 %v7631_v23, 16  ;;  %v2374_v30 = vshll.u32 %v7631_v23, 16  ;;  %v11721_v55 = vcombine.low %v8027_v7, %v8129_v45 }
 0x17c   : > { %v2400_v7 = vrot.slane %v2398_v43, 5  ;;  %v11722_v45 = vcombine.low %v8029_v61, %v8137_v25  ;;  %v2353_v5 = vor.u32 %v2352_v42, %v2349_v37  ;;  %v2380_v61 = vshll.u32 %v7629_v22, 16  ;;  %11726 = vst [vmem:[#allocation63_spill] sm:$0xff] %v8324_v63 }
 0x17d   : > { %1819 = vrot.lane.b32.xlu1 %v6771_v0, %s7464_s11  ;;  %v2422_v0 = vshll.u32 %v7657_v33, 16  ;;  %v2373_v24 = vrot.slane %v2371_v53, 4  ;;  %v2376_v62 = vrot.slane %v2374_v30, 5  ;;  %v8312_v50 = vpop.permute.xlu1 %1229  ;;  %v2446_v53 = vshll.u32 %v7670_v38, 16 }
 0x17e   : > { %11724 = vst [vmem:[#allocation62_spill] sm:$0xff] %v8312_v50  ;;  %v2401_v25 = vor.u32 %v2400_v7, %v2397_v40  ;;  %v11725_v43 = vcombine.low %v8062_v11, %v8158_v1  ;;  %v11731_v7 = vld [vmem:[#allocation16_spill] sm:$0xff]  ;;  %v8338_v50 = vrot.slane %v2380_v61, 5 }
 0x17f   : > { %1741 = vrot.lane.b32.xlu0 %v8127_v29, %s7463_s8  ;;  %v2332_v29 = vshll.u32 %v7607_v13, 16  ;;  %v2424_v44 = vrot.slane %v2422_v0, 5  ;;  %v2377_v30 = vor.u32 %v2376_v62, %v2373_v24  ;;  %v2354_v62 = vrot.slane %v2353_v5, 4 }
 0x180   : > { %v2448_v1 = vrot.slane %v2446_v53, 5  ;;  %v2494_v36 = vshll.u32 %v11731_v7, 16  ;;  %11732 = vst [vmem:[#allocation37_spill] sm:$0xff] %v8338_v50  ;;  %v2402_v8 = vrot.slane %v2401_v25, 4 }
 0x181   : > { %1743 = vrot.lane.b32.xlu1 %v11721_v55, %s7463_s8  ;;  %v8309_v41 = vrot.slane %v2332_v29, 5  ;;  %v2421_v55 = vrot.slane %v2419_v47, 4  ;;  %v11727_v29 = vld [vmem:[#allocation14_spill] sm:$0xff] }
 0x182   : > { %v2467_v37 = vshrl.u32 %v11727_v29, 16  ;;  %v11730_v47 = vld [vmem:[#allocation10_spill] sm:$0xff] }
 0x183   : > { %1749 = vrot.lane.b32.xlu0 %v8134_v3, %s7463_s8  ;;  %11723 = vst [vmem:[#allocation61_spill] sm:$0xff] %v8309_v41  ;;  %v2443_v3 = vshrl.u32 %v7670_v38, 16  ;;  %v8331_v24 = vsel %vm7901_vm2, %v2330_v34, %v8309_v41  ;;  %v2425_v40 = vor.u32 %v2424_v44, %v2421_v55  ;;  %v2428_v0 = vshll.u32 %v11730_v47, 16  ;;  %11733 = vst [vmem:[#allocation10_spill] sm:$0xff] %v8340_v31  ;;  %v8342_v34 = vpop.permute.xlu1 %1233  ;;  %v11736_v55 = vld [vmem:[#allocation19_spill] sm:$0xff] }
 0x184   : > { %11729 = vst [vmem:[#allocation14_spill] sm:$0xff] %v8331_v24  ;;  %11734 = vst [vmem:[#allocation64_spill] sm:$0xff] %v8342_v34  ;;  %v11735_v44 = vcombine.low %v8064_v10, %v8171_v9  ;;  %v2518_v53 = vshll.u32 %v11736_v55, 16  ;;  %v2452_v34 = vshll.u32 %v11739_v58, 16  ;;  %v11740_v9 = vld [vmem:[#allocation13_spill] sm:$0xff] }
 0x185   : > { %1751 = vrot.lane.b32.xlu1 %v11722_v45, %s7463_s8  ;;  %v2445_v11 = vrot.slane %v2443_v3, 4  ;;  %v2491_v45 = vshrl.u32 %v11731_v7, 16  ;;  %v2515_v3 = vshrl.u32 %v11736_v55, 16  ;;  %v2426_v61 = vrot.slane %v2425_v40, 4  ;;  %v11743_v40 = vld [vmem:[#allocation20_spill] sm:$0xff] }
 0x186   : > { %v8355_v25 = vrot.slane %v2428_v0, 5  ;;  %v2539_v0 = vshrl.u32 %v11743_v40, 16  ;;  %v2542_v49 = vshll.u32 %v11743_v40, 16  ;;  %v1602_v40 = vshrl.u32 %v8286_v6, 16 }
 0x187   : > { %1757 = vrot.lane.b32.xlu0 %v8156_v20, %s7463_s8  ;;  %v2470_v20 = vshll.u32 %v11727_v29, 16  ;;  %v2449_v10 = vor.u32 %v2448_v1, %v2445_v11  ;;  %v2517_v1 = vrot.slane %v2515_v3, 4 }
 0x188   : > { %11738 = vst [vmem:[#allocation66_spill] sm:$0xff] %v8355_v25 }
 0x189   : > { %1759 = vrot.lane.b32.xlu1 %v11725_v43, %s7463_s8  ;;  %v2378_v43 = vrot.slane %v2377_v30, 4  ;;  %v2472_v5 = vrot.slane %v2470_v20, 5  ;;  %v8353_v30 = vsel %vm7901_vm2, %v2354_v62, %v8324_v63  ;;  %v2493_v20 = vrot.slane %v2491_v45, 4  ;;  %v8385_v63 = vpop.permute.xlu1 %1237 }
 0x18a   : > { %11737 = vst [vmem:[#allocation65_spill] sm:$0xff] %v8353_v30  ;;  %v8369_v62 = vsel %vm7901_vm2, %v2402_v8, %v8340_v31  ;;  %v2520_v45 = vrot.slane %v2518_v53, 5  ;;  %v1603_v31 = vshrl.u32 %v8279_v56, 16  ;;  %11746 = vst [vmem:[#allocation68_spill] sm:$0xff] %v8385_v63  ;;  %v11747_v53 = vld [vmem:[#allocation15_spill] sm:$0xff] }
 0x18b   : > { %1765 = vrot.lane.b32.xlu0 %v8169_v28, %s7463_s8  ;;  %v2469_v28 = vrot.slane %v2467_v37, 4  ;;  %v2476_v37 = vshll.u32 %v11740_v9, 16  ;;  %v8364_v59 = vsel %vm7901_vm2, %v2378_v43, %v8338_v50  ;;  %11742 = vst [vmem:[#allocation13_spill] sm:$0xff] %v8369_v62  ;;  %v8379_v43 = vsel %vm7901_vm2, %v2426_v61, %v8355_v25 }
 0x18c   : > { %11741 = vst [vmem:[#allocation11_spill] sm:$0xff] %v8364_v59  ;;  %11745 = vst [vmem:[#allocation67_spill] sm:$0xff] %v8379_v43  ;;  %v8381_v50 = vrot.slane %v2452_v34, 5  ;;  %v2500_v41 = vshll.u32 %v11747_v53, 16  ;;  %v11748_v34 = vcombine.high %v8257_v52, %v8260_v48  ;;  %v2541_v25 = vrot.slane %v2539_v0, 4 }
 0x18d   : > { %1767 = vrot.lane.b32.xlu1 %v11735_v44, %s7463_s8  ;;  %v2496_v44 = vrot.slane %v2494_v36, 5  ;;  %v2473_v11 = vor.u32 %v2472_v5, %v2469_v28  ;;  %v11744_v36 = vld [vmem:[#allocation22_spill] sm:$0xff]  ;;  %v2450_v28 = vrot.slane %v2449_v10, 4  ;;  %v8389_v5 = vrot.slane %v2476_v37, 5 }
 0x18e   : > { %v2563_v21 = vshrl.u32 %v11744_v36, 16  ;;  %v2566_v8 = vshll.u32 %v11744_v36, 16  ;;  %v1406_v61 = vrot.slane %v11748_v34, %v7672_v39  ;;  %v2544_v36 = vrot.slane %v2542_v49, 5  ;;  %v11749_v10 = vld [vmem:[#allocation18_spill] sm:$0xff] }
 0x18f   : > { %3006 = vrot.lane.b32.xlu0 %v8331_v24, %s7446_s21  ;;  %v2497_v3 = vor.u32 %v2496_v44, %v2493_v20  ;;  %v2474_v63 = vrot.slane %v2473_v11, 4  ;;  %v2521_v55 = vor.u32 %v2520_v45, %v2517_v1  ;;  %v2524_v37 = vshll.u32 %v11749_v10, 16  ;;  %v11760_v45 = vld [vmem:[#allocation23_spill] sm:$0xff] }
 0x190   : > { %v2565_v7 = vrot.slane %v2563_v21, 4  ;;  %v11750_v20 = vcombine.high %v8243_v12, %v8246_v60  ;;  %v2568_v53 = vrot.slane %v2566_v8, 5  ;;  %v11751_v52 = vpack.i.b16 %v8279_v56, %v8286_v6  ;;  %v11756_v56 = vld [vmem:[#allocation21_spill] sm:$0xff] }
 0x191   : > { %3010 = vrot.lane.b32.xlu1 %v8353_v30, %s7446_s21  ;;  %v11752_v49 = vpack.i.b16 %v8203_v4, %v8200_v51  ;;  %v8412_v0 = vpack.i.b16 %v1603_v31, %v1602_v40  ;;  %v8419_v21 = vsel %vm7901_vm2, %v2450_v28, %v8381_v50  ;;  %v2498_v12 = vrot.slane %v2497_v3, 4  ;;  %v8426_v31 = vpop.permute.xlu1 %1241 }
 0x192   : > { %v1372_v44 = vrot.slane %v11750_v20, %v7672_v39  ;;  %11755 = vst [vmem:[#allocation70_spill] sm:$0xff] %v8419_v21  ;;  %v8421_v60 = vrot.slane %v2500_v41, 5  ;;  %v2545_v11 = vor.u32 %v2544_v36, %v2541_v25  ;;  %v2548_v6 = vshll.u32 %v11756_v56, 16  ;;  %11757 = vst [vmem:[#allocation21_spill] sm:$0xff] %v8426_v31 }
 0x193   : > { %3014 = vrot.lane.b32.xlu0 %v8364_v59, %s7446_s21  ;;  %v8410_v48 = vcombine.low %v11752_v49, %v11751_v52  ;;  %11754 = vst [vmem:[#allocation69_spill] sm:$0xff] %v8412_v0  ;;  %v8433_v40 = vsel %vm7901_vm2, %v2474_v63, %v8389_v5  ;;  %v2522_v1 = vrot.slane %v2521_v55, 4  ;;  %v8435_v41 = vrot.slane %v2524_v37, 5  ;;  %v11781_v0 = vld [vmem:[#allocation4_spill] sm:$0xff] }
 0x194   : > { %v1607_v4 = vpack.i.b16 %v1406_v61, %v1372_v44  ;;  %11758 = vst [vmem:[#allocation71_spill] sm:$0xff] %v8433_v40  ;;  %v2569_v25 = vor.u32 %v2568_v53, %v2565_v7  ;;  %v2572_v36 = vshll.u32 %v11760_v45, 16  ;;  %v11761_v8 = vpack.i.b16 %v8196_v15, %v8192_v16  ;;  %v8452_v7 = vpop.permute.xlu0 %2169 }
 0x195   : > { %3018 = vrot.lane.b32.xlu1 %v8369_v62, %s7446_s21  ;;  %11753 = vst [vmem:[#allocation18_spill] sm:$0xff] %v8410_v48  ;;  %11759 = vst [vmem:[#allocation72_spill] sm:$0xff] %v8435_v41  ;;  %v1608_v3 = vshrl.u32 %v1372_v44, 16  ;;  %v1609_v34 = vshrl.u32 %v1406_v61, 16  ;;  %v8448_v63 = vsel %vm7901_vm2, %v2498_v12, %v8421_v60  ;;  %v2546_v55 = vrot.slane %v2545_v11, 4  ;;  %v8467_v12 = vpop.permute.xlu1 %2171 }
 0x196   : > { %v8443_v28 = vcombine.low %v11761_v8, %v1607_v4  ;;  %11763 = vst [vmem:[#allocation73_spill] sm:$0xff] %v8448_v63  ;;  %v8450_v37 = vrot.slane %v2548_v6, 5  ;;  %v1374_v16 = vcombine.high %v1372_v44, %v11694_v35  ;;  %v1408_v15 = vcombine.high %v1406_v61, %v11694_v35  ;;  %v11787_v35 = vld [vmem:[#allocation2_spill] sm:$0xff] }
 0x197   : > { %3022 = vrot.lane.b32.xlu0 %v8379_v43, %s7446_s21  ;;  %v8456_v53 = vpack.i.b16 %v1609_v34, %v1608_v3  ;;  %v8463_v20 = vsel %vm7901_vm2, %v2522_v1, %v8435_v41  ;;  %v2570_v52 = vrot.slane %v2569_v25, 4  ;;  %v8465_v49 = vrot.slane %v2572_v36, 5 }
 0x198   : > { %11762 = vst [vmem:[#allocation23_spill] sm:$0xff] %v8443_v28  ;;  %11764 = vst [vmem:[#allocation74_spill] sm:$0xff] %v8450_v37  ;;  %v1613_v6 = vpack.i.b16 %v1408_v15, %v1374_v16  ;;  %v1614_v44 = vshrl.u32 %v1374_v16, 16  ;;  %v1615_v4 = vshrl.u32 %v1408_v15, 16  ;;  %v8476_v61 = vsel %vm7901_vm2, %v2546_v55, %v8450_v37  ;;  %v8492_v3 = vpop.permute.xlu0 %2173  ;;  %v11775_v15 = vld [vmem:[#allocation43_spill] sm:$0xff] }
 0x199   : > { %3026 = vrot.lane.b32.xlu1 %v8419_v21, %s7446_s21  ;;  %11765 = vst [vmem:[#allocation75_spill] sm:$0xff] %v8456_v53  ;;  %11766 = vst [vmem:[#allocation76_spill] sm:$0xff] %v8463_v20  ;;  %v11769_v1 = vpack.i.b16 %v8217_v32, %v8209_v46  ;;  %v8490_v8 = vsel %vm7901_vm2, %v2570_v52, %v8465_v49  ;;  %v8498_v55 = vpop.permute.xlu1 %2175  ;;  %v11773_v46 = vld [vmem:[#allocation38_spill] sm:$0xff]  ;;  %v11774_v32 = vld [vmem:[#allocation40_spill] sm:$0xff]  ;;  %v11783_v31 = vmov 0 }
 0x19a   : > { %11767 = vst [vmem:[#allocation77_spill] sm:$0xff] %v8465_v49  ;;  %11768 = vst [vmem:[#allocation78_spill] sm:$0xff] %v8476_v61  ;;  %v8485_v36 = vpack.i.b16 %v1615_v4, %v1614_v44  ;;  %v11777_v44 = vld [vmem:[#allocation46_spill] sm:$0xff]  ;;  %v11784_v31 = vsel %vm8558_vm6, 4294967295, %v11783_v31 }
 0x19b   : > { %3030 = vrot.lane.b32.xlu0 %v8433_v40, %s7446_s21  ;;  %v8483_v25 = vcombine.low %v11769_v1, %v1613_v6  ;;  %11772 = vst [vmem:[#allocation81_spill] sm:$0xff] %v8490_v8  ;;  %v11776_v6 = vld [vmem:[#allocation44_spill] sm:$0xff]  ;;  %v8546_v53 = vld [vmem:[%s7509_s19 + $0x4] sm:$0xf]  ;;  %11785 = vst [vmem:[#allocation85_spill] sm:$0xff] %v11784_v31 }
 0x19c   : > { %11771 = vst [vmem:[#allocation80_spill] sm:$0xff] %v8485_v36  ;;  %v8504_v16 = vpop.permute.xlu0 %2177  ;;  %v11519_v54 = vrot.slane %v8546_v53, 5 }
 0x19d   : > { %3034 = vrot.lane.b32.xlu1 %v8448_v63, %s7446_s21  ;;  %11770 = vst [vmem:[#allocation79_spill] sm:$0xff] %v8483_v25  ;;  %v8508_v52 = vpop.permute.xlu1 %2179  ;;  %v6870_v25 = vrot.slane %v7418_v19, 9 }
 0x19f   : > { %3038 = vrot.lane.b32.xlu0 %v8463_v20, %s7446_s21  ;;  %v8566_v19 = vsel %vm8558_vm6, %v6870_v25, %v11519_v54 }
 0x1a0   : > { %v8514_v4 = vpop.permute.xlu0 %2181  ;;  %11786 = vst [vmem:[#allocation86_spill] sm:$0xff] %v8566_v19 }
 0x1a1   : > { %3042 = vrot.lane.b32.xlu1 %v8476_v61, %s7446_s21  ;;  %v8518_v1 = vpop.permute.xlu1 %2183 }
 0x1a2   : > { %11778 = vst [vmem:[#allocation82_spill] sm:$0xff] %v8518_v1 }
 0x1a3   : > { %3046 = vrot.lane.b32.xlu0 %v8490_v8, %s7446_s21 }
 0x1a4   : > { %v8524_v34 = vpop.permute.xlu0 %2185 }
 0x1a5   : > { %3450 = vrot.lane.b32.xlu1 %v11773_v46, %s7445_s20  ;;  %v8528_v11 = vpop.permute.xlu1 %2187 }
 0x1a7   : > { %3454 = vrot.lane.b32.xlu0 %v11774_v32, %s7445_s20 }
 0x1a8   : > { %v8534_v51 = vpop.permute.xlu0 %2189 }
 0x1a9   : > { %3458 = vrot.lane.b32.xlu1 %v11775_v15, %s7445_s20  ;;  %v8538_v36 = vpop.permute.xlu1 %2191  ;;  %v11536_v15 = vrot.slane %v11749_v10, 5 }
 0x1aa   : > { %11779 = vst [vmem:[#allocation83_spill] sm:$0xff] %v8538_v36 }
 0x1ab   : > { %3462 = vrot.lane.b32.xlu0 %v11776_v6, %s7445_s20  ;;  %v11795_v6 = vld [vmem:[#allocation7_spill] sm:$0xff] }
 0x1ac   : > { %v8549_v28 = vpop.permute.xlu0 %2193 }
 0x1ad   : > { %3466 = vrot.lane.b32.xlu1 %v11777_v44, %s7445_s20  ;;  %11780 = vst [vmem:[#allocation84_spill] sm:$0xff] %v8549_v28  ;;  %v8554_v48 = vpop.permute.xlu1 %2195 }
 0x1ae   : > { %11782 = vst [vmem:[#allocation4_spill] sm:$0xff] %v8554_v48 }
 0x1af   : > { %3470 = vrot.lane.b32.xlu0 %v8331_v24, %s7445_s20  ;;  %v11808_v24 = vld [vmem:[#allocation15_spill] sm:$0xff] }
 0x1b0   : > { %v8581_v54 = vpop.permute.xlu0 %2197  ;;  %v11535_v46 = vrot.slane %v11808_v24, 5 }
 0x1b1   : > { %3474 = vrot.lane.b32.xlu1 %v8353_v30, %s7445_s20  ;;  %11793 = vst [vmem:[#allocation3_spill] sm:$0xff] %v8581_v54  ;;  %v11537_v30 = vrot.slane %v11756_v56, 5  ;;  %v11823_v54 = vld [vmem:[#allocation27_spill] sm:$0xff] }
 0x1b2   : > { %v633_v37 = vshrl.u32 %v11823_v54, 16 }
 0x1b3   : > { %3478 = vrot.lane.b32.xlu0 %v8364_v59, %s7445_s20  ;;  %v6875_v59 = vrot.slane %v7609_v14, 9 }
 0x1b4   : > { %v8615_v32 = vpop.permute.xlu0 %2990 }
 0x1b5   : > { %3482 = vrot.lane.b32.xlu1 %v8369_v62, %s7445_s20 }
 0x1b7   : > { %3486 = vrot.lane.b32.xlu0 %v8379_v43, %s7445_s20  ;;  %v6871_v43 = vrot.slane %v11787_v35, 9  ;;  %v11794_v35 = vld [vmem:[#allocation8_spill] sm:$0xff] }
 0x1b8   : > { %11798 = vst [vmem:[#allocation8_spill] sm:$0xff] %v8615_v32  ;;  %v8649_v32 = vpop.permute.xlu0 %2998 }
 0x1b9   : > { %3490 = vrot.lane.b32.xlu1 %v8419_v21, %s7445_s20  ;;  %v11792_v21 = vld [vmem:[#allocation5_spill] sm:$0xff]  ;;  %11802 = vst [vmem:[#allocation89_spill] sm:$0xff] %v8649_v32 }
 0x1ba   : > { %v11524_v25 = vrot.slane %v11792_v21, 5 }
 0x1bb   : > { %3494 = vrot.lane.b32.xlu0 %v8433_v40, %s7445_s20  ;;  %v11522_v40 = vrot.slane %v11788_v57, 5 }
 0x1bd   : > { %3498 = vrot.lane.b32.xlu1 %v8448_v63, %s7445_s20  ;;  %v11791_v63 = vld [vmem:[#allocation6_spill] sm:$0xff] }
 0x1be   : > { %v6873_v39 = vrot.slane %v11791_v63, 9 }
 0x1bf   : > { %3502 = vrot.lane.b32.xlu0 %v8463_v20, %s7445_s20  ;;  %v6872_v20 = vrot.slane %v7577_v2, 9 }
 0x1c0   : > { %v8601_v63 = vsel %vm8558_vm6, %v6873_v39, %v11524_v25  ;;  %v6877_v39 = vrot.slane %v7631_v23, 9  ;;  %v6878_v25 = vrot.slane %v7645_v27, 9 }
 0x1c1   : > { %3506 = vrot.lane.b32.xlu1 %v8476_v61, %s7445_s20  ;;  %v8589_v2 = vsel %vm8558_vm6, %v6872_v20, %v11522_v40  ;;  %v6874_v61 = vrot.slane %v11794_v35, 9  ;;  %11797 = vst [vmem:[#allocation5_spill] sm:$0xff] %v8601_v63  ;;  %v11525_v20 = vrot.slane %v7607_v13, 5  ;;  %v6876_v40 = vrot.slane %v7617_v18, 9 }
 0x1c3   : > { %3510 = vrot.lane.b32.xlu0 %v8490_v8, %s7445_s20  ;;  %v11789_v8 = vrot.slane %v11781_v0, 5  ;;  %v8623_v14 = vsel %vm8558_vm6, %v6875_v59, %v11525_v20  ;;  %v11528_v59 = vrot.slane %v7643_v26, 5  ;;  %v6879_v20 = vrot.slane %v7657_v33, 9 }
 0x1c4   : > { %11799 = vst [vmem:[#allocation7_spill] sm:$0xff] %v8623_v14 }
 0x1c5   : > { %4953 = vrot.lane.b32.xlu1 %v8566_v19, %s7446_s21  ;;  %v8577_v62 = vsel %vm8558_vm6, %v6871_v43, %v11789_v8  ;;  %v11523_v43 = vrot.slane %v11795_v6, 5  ;;  %v8593_v8 = vpop.permute.xlu1 %2986  ;;  %v8657_v27 = vsel %vm8558_vm6, %v6878_v25, %v11528_v59  ;;  %v11534_v25 = vrot.slane %v11740_v9, 5  ;;  %v1738_v59 = vpop.permute.xlu0 %1737 }
 0x1c6   : > { %11790 = vst [vmem:[#allocation2_spill] sm:$0xff] %v8577_v62  ;;  %11796 = vst [vmem:[#allocation6_spill] sm:$0xff] %v8593_v8  ;;  %v11527_v8 = vrot.slane %v7615_v17, 5 }
 0x1c7   : > { %4957 = vrot.lane.b32.xlu0 %v8577_v62, %s7446_s21  ;;  %v8611_v35 = vsel %vm8558_vm6, %v6874_v61, %v11523_v43  ;;  %v11526_v61 = vrot.slane %v7629_v22, 5  ;;  %11803 = vst [vmem:[#allocation90_spill] sm:$0xff] %v8657_v27 }
 0x1c8   : > { %v8635_v18 = vsel %vm8558_vm6, %v6876_v40, %v11527_v8  ;;  %v6880_v40 = vrot.slane %v7670_v38, 9  ;;  %v6881_v8 = vrot.slane %v11727_v29, 9 }
 0x1c9   : > { %4961 = vrot.lane.b32.xlu1 %v8589_v2, %s7446_s21  ;;  %v8627_v43 = vpop.permute.xlu1 %2994  ;;  %v8645_v23 = vsel %vm8558_vm6, %v6877_v39, %v11526_v61  ;;  %v11531_v39 = vrot.slane %v11739_v58, 5  ;;  %v8703_v49 = vpop.permute.xlu0 %1745 }
 0x1ca   : > { %11800 = vst [vmem:[#allocation87_spill] sm:$0xff] %v8627_v43  ;;  %11801 = vst [vmem:[#allocation88_spill] sm:$0xff] %v8645_v23  ;;  %v11530_v43 = vrot.slane %v11730_v47, 5  ;;  %v8689_v29 = vsel %vm8558_vm6, %v6881_v8, %v11534_v25  ;;  %v11815_v8 = vld [vmem:[#allocation22_spill] sm:$0xff] }
 0x1cb   : > { %4965 = vrot.lane.b32.xlu0 %v8601_v63, %s7446_s21  ;;  %v8679_v38 = vsel %vm8558_vm6, %v6880_v40, %v11531_v39  ;;  %v11812_v40 = vld [vmem:[#allocation20_spill] sm:$0xff]  ;;  %v6885_v25 = vrot.slane %v11815_v8, 9 }
 0x1cc   : > { %v8669_v33 = vsel %vm8558_vm6, %v6879_v20, %v11530_v43  ;;  %11806 = vst [vmem:[#allocation93_spill] sm:$0xff] %v8679_v38  ;;  %v11810_v43 = vld [vmem:[#allocation19_spill] sm:$0xff]  ;;  %v6884_v39 = vrot.slane %v11812_v40, 9 }
 0x1cd   : > { %4969 = vrot.lane.b32.xlu1 %v8611_v35, %s7446_s21  ;;  %v8661_v61 = vpop.permute.xlu1 %3002  ;;  %11805 = vst [vmem:[#allocation92_spill] sm:$0xff] %v8669_v33  ;;  %v6883_v44 = vrot.slane %v11810_v43, 9  ;;  %11813 = vst [vmem:[#allocation19_spill] sm:$0xff] %v8703_v49  ;;  %v8733_v8 = vpop.permute.xlu0 %1753 }
 0x1ce   : > { %11804 = vst [vmem:[#allocation91_spill] sm:$0xff] %v8661_v61  ;;  %v11807_v61 = vld [vmem:[#allocation16_spill] sm:$0xff]  ;;  %v8723_v40 = vsel %vm8558_vm6, %v6884_v39, %v11537_v30  ;;  %11819 = vst [vmem:[#allocation96_spill] sm:$0xff] %v8733_v8 }
 0x1cf   : > { %4973 = vrot.lane.b32.xlu0 %v8623_v14, %s7446_s21  ;;  %v6882_v32 = vrot.slane %v11807_v61, 9  ;;  %11809 = vst [vmem:[#allocation16_spill] sm:$0xff] %v8689_v29  ;;  %v8711_v43 = vsel %vm8558_vm6, %v6883_v44, %v11536_v15  ;;  %11817 = vst [vmem:[#allocation94_spill] sm:$0xff] %v8723_v40  ;;  %v11820_v15 = vld [vmem:[#allocation29_spill] sm:$0xff]  ;;  %v11822_v39 = vld [vmem:[#allocation28_spill] sm:$0xff] }
 0x1d0   : > { %11814 = vst [vmem:[#allocation20_spill] sm:$0xff] %v8711_v43  ;;  %v679_v30 = vpack.i.b16 %v11820_v15, %v11822_v39 }
 0x1d1   : > { %4977 = vrot.lane.b32.xlu1 %v8635_v18, %s7446_s21  ;;  %v1740_v20 = vpop.permute.xlu1 %1739  ;;  %v8699_v61 = vsel %vm8558_vm6, %v6882_v32, %v11535_v46  ;;  %v11540_v32 = vrot.slane %v11760_v45, 5 }
 0x1d2   : > { %11811 = vst [vmem:[#allocation15_spill] sm:$0xff] %v8699_v61 }
 0x1d3   : > { %4981 = vrot.lane.b32.xlu0 %v8645_v23, %s7446_s21  ;;  %v8731_v44 = vsel %vm8558_vm6, %v6885_v25, %v11540_v32  ;;  %v680_v25 = vshrl.u32 %v11822_v39, 16  ;;  %v11824_v32 = vld [vmem:[#allocation26_spill] sm:$0xff] }
 0x1d4   : > { %11818 = vst [vmem:[#allocation95_spill] sm:$0xff] %v8731_v44  ;;  %v631_v8 = vpack.i.b16 %v11823_v54, %v11824_v32  ;;  %v632_v31 = vshrl.u32 %v11824_v32, 16 }
 0x1d5   : > { %4985 = vrot.lane.b32.xlu1 %v8657_v27, %s7446_s21  ;;  %v8715_v46 = vpop.permute.xlu1 %1747 }
 0x1d6   : > { %11816 = vst [vmem:[#allocation22_spill] sm:$0xff] %v8715_v46  ;;  %v681_v46 = vshrl.u32 %v11820_v15, 16  ;;  %v6738_v15 = vcombine.low %v631_v8, %v679_v30  ;;  %v2240_v8 = vshrl.u32 %v11781_v0, 16 }
 0x1d7   : > { %4989 = vrot.lane.b32.xlu0 %v8669_v33, %s7446_s21 }
 0x1d8   : > { %v682_v48 = vpack.i.b16 %v681_v46, %v680_v25  ;;  %v1852_v54 = vsel %vm1849_vm7, %v6738_v15, %v1738_v59 }
 0x1d9   : > { %4993 = vrot.lane.b32.xlu1 %v8679_v38, %s7446_s21  ;;  %v8738_v49 = vpop.permute.xlu1 %1755 }
 0x1da   : > { %11821 = vst [vmem:[#allocation29_spill] sm:$0xff] %v8738_v49  ;;  %v8751_v49 = vpop.permute.xlu0 %1761 }
 0x1db   : > { %4997 = vrot.lane.b32.xlu0 %v8689_v29, %s7446_s21  ;;  %11825 = vst [vmem:[#allocation28_spill] sm:$0xff] %v8751_v49 }
 0x1dd   : > { %5001 = vrot.lane.b32.xlu1 %v8699_v61, %s7446_s21  ;;  %v8755_v41 = vpop.permute.xlu1 %1763 }
 0x1de   : > { %11826 = vst [vmem:[#allocation27_spill] sm:$0xff] %v8755_v41  ;;  %v8799_v41 = vld [vmem:[%s7509_s19 + $0x8] sm:$0x1] }
 0x1df   : > { %5005 = vrot.lane.b32.xlu0 %v8711_v43, %s7446_s21 }
 0x1e1   : > { %5009 = vrot.lane.b32.xlu1 %v8723_v40, %s7446_s21 }
 0x1e3   : > { %5013 = vrot.lane.b32.xlu0 %v8731_v44, %s7446_s21 }
 0x1e5   : > { %5417 = vrot.lane.b32.xlu1 %v8566_v19, %s7445_s20  ;;  %v634_v19 = vpack.i.b16 %v633_v37, %v632_v31 }
 0x1e7   : > { %5421 = vrot.lane.b32.xlu0 %v8577_v62, %s7445_s20  ;;  %v6739_v39 = vcombine.low %v634_v19, %v682_v48  ;;  %v2216_v19 = vshrl.u32 %v8546_v53, 16  ;;  %v11853_v62 = vld [vmem:[#allocation37_spill] sm:$0xff] }
 0x1e9   : > { %5425 = vrot.lane.b32.xlu1 %v8589_v2, %s7445_s20  ;;  %v1855_v25 = vsel %vm1849_vm7, %v6739_v39, %v1740_v20  ;;  %v2218_v15 = vrot.slane %v2216_v19, 4  ;;  %v2264_v39 = vshrl.u32 %v11788_v57, 16  ;;  %v2222_v19 = vshll.u32 %v8799_v41, 16 }
 0x1eb   : > { %5429 = vrot.lane.b32.xlu0 %v8601_v63, %s7445_s20 }
 0x1ed   : > { %v1818_v32 = vpop.permute.xlu0 %1817  ;;  %5433 = vrot.lane.b32.xlu1 %v8611_v35, %s7445_s20 }
 0x1ee   : > { %v1900_v46 = vsel %vm1898_vm8, %v1852_v54, %v1818_v32 }
 0x1ef   : > { %5437 = vrot.lane.b32.xlu0 %v8623_v14, %s7445_s20  ;;  %7168 = vmatprep.mubr.msk.bf16.mxu1 %vm1938_vm9, %v1900_v46  ;;  %v1820_v30 = vpop.permute.xlu1 %1819  ;;  %v2242_v46 = vrot.slane %v2240_v8, 4 }
 0x1f0   : > { %v1902_v31 = vsel %vm1898_vm8, %v1855_v25, %v1820_v30  ;;  %v2288_v25 = vshrl.u32 %v11792_v21, 16  ;;  %v11833_v30 = vld [vmem:[#allocation36_spill] sm:$0xff] }
 0x1f1   : > { %v8768_v37 = vpop.permute.xlu0 %1741  ;;  %5441 = vrot.lane.b32.xlu1 %v8635_v18, %s7445_s20  ;;  %7169 = vmatmul.mubr.msk.bf16.vlgmr.msra.gmra.mrb[0].mxu1 %vm1938_vm9, %v1902_v31  ;;  %v2219_v31 = vor.u32 %v2218_v15, %v11833_v30  ;;  %v11836_v15 = vld [vmem:[#allocation39_spill] sm:$0xff] }
 0x1f2   : > { %11827 = vst [vmem:[#allocation26_spill] sm:$0xff] %v8768_v37  ;;  %v2243_v30 = vor.u32 %v2242_v46, %v11836_v15 }
 0x1f3   : > { %5445 = vrot.lane.b32.xlu0 %v8645_v23, %s7445_s20  ;;  %v8775_v48 = vpop.permute.xlu1 %1743  ;;  %v2220_v37 = vrot.slane %v2219_v31, 4 }
 0x1f4   : > { %11828 = vst [vmem:[#allocation97_spill] sm:$0xff] %v8775_v48  ;;  %v2336_v48 = vshrl.u32 %v7607_v13, 16  ;;  %v2244_v31 = vrot.slane %v2243_v30, 4  ;;  %v2408_v30 = vshrl.u32 %v7643_v26, 16 }
 0x1f5   : > { %v8778_v59 = vpop.permute.xlu0 %1749  ;;  %5449 = vrot.lane.b32.xlu1 %v8657_v27, %s7445_s20 }
 0x1f6   : > { %11829 = vst [vmem:[#allocation98_spill] sm:$0xff] %v8778_v59  ;;  %v2312_v59 = vshrl.u32 %v11795_v6, 16 }
 0x1f7   : > { %5453 = vrot.lane.b32.xlu0 %v8669_v33, %s7445_s20  ;;  %v8784_v20 = vpop.permute.xlu1 %1751 }
 0x1f8   : > { %11830 = vst [vmem:[#allocation99_spill] sm:$0xff] %v8784_v20  ;;  %v2246_v20 = vshll.u32 %v8452_v7, 16  ;;  %v2314_v46 = vrot.slane %v2312_v59, 4 }
 0x1f9   : > { %v8787_v54 = vpop.permute.xlu0 %1757  ;;  %5457 = vrot.lane.b32.xlu1 %v8679_v38, %s7445_s20 }
 0x1fa   : > { %11831 = vst [vmem:[#allocation100_spill] sm:$0xff] %v8787_v54  ;;  %v2266_v54 = vrot.slane %v2264_v39, 4  ;;  %v11838_v39 = vld [vmem:[#allocation42_spill] sm:$0xff] }
 0x1fb   : > { %5461 = vrot.lane.b32.xlu0 %v8689_v29, %s7445_s20  ;;  %v8794_v32 = vpop.permute.xlu1 %1759  ;;  %v2224_v29 = vrot.slane %v2222_v19, 5  ;;  %v11840_v19 = vld [vmem:[#allocation41_spill] sm:$0xff] }
 0x1fc   : > { %11832 = vst [vmem:[#allocation101_spill] sm:$0xff] %v8794_v32  ;;  %v2290_v32 = vrot.slane %v2288_v25, 4  ;;  %v2267_v27 = vor.u32 %v2266_v54, %v11838_v39 }
 0x1fd   : > { %v8802_v49 = vpop.permute.xlu0 %1765  ;;  %5465 = vrot.lane.b32.xlu1 %v8699_v61, %s7445_s20  ;;  %v2248_v61 = vrot.slane %v2246_v20, 5  ;;  %v8830_v54 = vsel %vm7901_vm2, %v2220_v37, %v2224_v29  ;;  %v2384_v20 = vshrl.u32 %v7629_v22, 16  ;;  %v11844_v29 = vld [vmem:[#allocation45_spill] sm:$0xff] }
 0x1fe   : > { %11834 = vst [vmem:[#allocation36_spill] sm:$0xff] %v8802_v49  ;;  %v2270_v49 = vshll.u32 %v8467_v12, 16  ;;  %v2291_v15 = vor.u32 %v2290_v32, %v11840_v19  ;;  %11841 = vst [vmem:[#allocation41_spill] sm:$0xff] %v8830_v54  ;;  %v2268_v59 = vrot.slane %v2267_v27, 4  ;;  %v2315_v37 = vor.u32 %v2314_v46, %v11844_v29  ;;  %v11849_v46 = vld [vmem:[#allocation63_spill] sm:$0xff] }
 0x1ff   : > { %5469 = vrot.lane.b32.xlu0 %v8711_v43, %s7445_s20  ;;  %v8810_v8 = vpop.permute.xlu1 %1767  ;;  %v2360_v43 = vshrl.u32 %v7615_v17, 16 }
 0x200   : > { %11835 = vst [vmem:[#allocation102_spill] sm:$0xff] %v8810_v8  ;;  %v2294_v8 = vshll.u32 %v8492_v3, 16  ;;  %v2272_v38 = vrot.slane %v2270_v49, 5  ;;  %v2342_v49 = vshll.u32 %v8504_v16, 16 }
 0x201   : > { %v8815_v33 = vpop.permute.xlu0 %3006  ;;  %5473 = vrot.lane.b32.xlu1 %v8723_v40, %s7445_s20  ;;  %v2318_v40 = vshll.u32 %v8498_v55, 16 }
 0x202   : > { %11837 = vst [vmem:[#allocation39_spill] sm:$0xff] %v8815_v33  ;;  %v2338_v33 = vrot.slane %v2336_v48, 4  ;;  %v2296_v32 = vrot.slane %v2294_v8, 5  ;;  %v8841_v48 = vsel %vm7901_vm2, %v2244_v31, %v2248_v61  ;;  %v2366_v8 = vshll.u32 %v8508_v52, 16 }
 0x203   : > { %5477 = vrot.lane.b32.xlu0 %v8731_v44, %s7445_s20  ;;  %v8824_v25 = vpop.permute.xlu1 %3010  ;;  %11843 = vst [vmem:[#allocation104_spill] sm:$0xff] %v8841_v48  ;;  %v11846_v44 = vld [vmem:[#allocation61_spill] sm:$0xff]  ;;  %v2320_v63 = vrot.slane %v2318_v40, 5  ;;  %v8853_v23 = vsel %vm7901_vm2, %v2268_v59, %v2272_v38  ;;  %v2386_v61 = vrot.slane %v2384_v20, 4  ;;  %v2390_v40 = vshll.u32 %v8514_v4, 16 }
 0x204   : > { %11839 = vst [vmem:[#allocation42_spill] sm:$0xff] %v8824_v25  ;;  %v2362_v25 = vrot.slane %v2360_v43, 4  ;;  %v2339_v27 = vor.u32 %v2338_v33, %v11846_v44  ;;  %v2432_v43 = vshrl.u32 %v11730_v47, 16  ;;  %11847 = vst [vmem:[#allocation61_spill] sm:$0xff] %v8853_v23  ;;  %v2456_v33 = vshrl.u32 %v11739_v58, 16 }
 0x205   : > { %v8833_v39 = vpop.permute.xlu0 %3014  ;;  %2988 = vrot.lane.b32.xlu1 %v8830_v54, %s7446_s21  ;;  %v2344_v44 = vrot.slane %v2342_v49, 5  ;;  %v2316_v38 = vrot.slane %v2315_v37, 4  ;;  %v2392_v14 = vrot.slane %v2390_v40, 5  ;;  %v2462_v40 = vshll.u32 %v8528_v11, 16 }
 0x206   : > { %11842 = vst [vmem:[#allocation103_spill] sm:$0xff] %v8833_v39  ;;  %v2292_v39 = vrot.slane %v2291_v15, 4  ;;  %v2363_v29 = vor.u32 %v2362_v25, %v11849_v46  ;;  %v2410_v15 = vrot.slane %v2408_v30, 4  ;;  %v2340_v59 = vrot.slane %v2339_v27, 4 }
 0x207   : > { %2992 = vrot.lane.b32.xlu0 %v8841_v48, %s7446_s21  ;;  %v8846_v19 = vpop.permute.xlu1 %3018  ;;  %v2480_v25 = vshrl.u32 %v11740_v9, 16  ;;  %v2368_v30 = vrot.slane %v2366_v8, 5  ;;  %v2414_v46 = vshll.u32 %v8518_v1, 16  ;;  %v8874_v49 = vsel %vm7901_vm2, %v2316_v38, %v2320_v63 }
 0x208   : > { %11845 = vst [vmem:[#allocation45_spill] sm:$0xff] %v8846_v19  ;;  %v8864_v19 = vsel %vm7901_vm2, %v2292_v39, %v2296_v32  ;;  %11852 = vst [vmem:[#allocation107_spill] sm:$0xff] %v8874_v49  ;;  %v2387_v39 = vor.u32 %v2386_v61, %v11853_v62  ;;  %v2364_v37 = vrot.slane %v2363_v29, 4  ;;  %v2438_v8 = vshll.u32 %v8524_v34, 16  ;;  %v11858_v61 = vld [vmem:[#allocation66_spill] sm:$0xff] }
 0x209   : > { %v8855_v31 = vpop.permute.xlu0 %3022  ;;  %2996 = vrot.lane.b32.xlu1 %v8853_v23, %s7446_s21  ;;  %11850 = vst [vmem:[#allocation63_spill] sm:$0xff] %v8864_v19  ;;  %v8885_v1 = vsel %vm7901_vm2, %v2340_v59, %v2344_v44  ;;  %v2504_v63 = vshrl.u32 %v11808_v24, 16  ;;  %v2482_v29 = vrot.slane %v2480_v25, 4 }
 0x20a   : > { %11848 = vst [vmem:[#allocation105_spill] sm:$0xff] %v8855_v31  ;;  %v2434_v31 = vrot.slane %v2432_v43, 4  ;;  %v2458_v43 = vrot.slane %v2456_v33, 4  ;;  %v2416_v33 = vrot.slane %v2414_v46, 5  ;;  %v2388_v44 = vrot.slane %v2387_v39, 4 }
 0x20b   : > { %3000 = vrot.lane.b32.xlu0 %v8864_v19, %s7446_s21  ;;  %v8868_v20 = vpop.permute.xlu1 %3026  ;;  %v2440_v25 = vrot.slane %v2438_v8, 5  ;;  %v2486_v46 = vshll.u32 %v8534_v51, 16 }
 0x20c   : > { %11851 = vst [vmem:[#allocation106_spill] sm:$0xff] %v8868_v20  ;;  %v11855_v20 = vld [vmem:[#allocation10_spill] sm:$0xff]  ;;  %v2435_v38 = vor.u32 %v2434_v31, %v11858_v61  ;;  %v2552_v31 = vshrl.u32 %v11756_v56, 16  ;;  %v8908_v61 = vsel %vm7901_vm2, %v2388_v44, %v2392_v14  ;;  %v2576_v14 = vshrl.u32 %v11760_v45, 16 }
 0x20d   : > { %v8877_v32 = vpop.permute.xlu0 %3030  ;;  %3004 = vrot.lane.b32.xlu1 %v8874_v49, %s7446_s21  ;;  %v2411_v27 = vor.u32 %v2410_v15, %v11855_v20  ;;  %11856 = vst [vmem:[#allocation10_spill] sm:$0xff] %v8885_v1  ;;  %v2528_v15 = vshrl.u32 %v11749_v10, 16  ;;  %v8897_v20 = vsel %vm7901_vm2, %v2364_v37, %v2368_v30  ;;  %11861 = vst [vmem:[#allocation110_spill] sm:$0xff] %v8908_v61  ;;  %v2506_v30 = vrot.slane %v2504_v63, 4 }
 0x20e   : > { %11854 = vst [vmem:[#allocation37_spill] sm:$0xff] %v8877_v32  ;;  %11859 = vst [vmem:[#allocation66_spill] sm:$0xff] %v8897_v20  ;;  %v2436_v37 = vrot.slane %v2435_v38, 4  ;;  %v2488_v38 = vrot.slane %v2486_v46, 5 }
 0x20f   : > { %3008 = vrot.lane.b32.xlu0 %v8885_v1, %s7446_s21  ;;  %v8890_v62 = vpop.permute.xlu1 %3034  ;;  %v2412_v32 = vrot.slane %v2411_v27, 4  ;;  %v2483_v27 = vor.u32 %v2482_v29, %v8389_v5  ;;  %v2534_v5 = vshll.u32 %v8549_v28, 16  ;;  %v2578_v28 = vrot.slane %v2576_v14, 4 }
 0x210   : > { %11857 = vst [vmem:[#allocation108_spill] sm:$0xff] %v8890_v62  ;;  %v2459_v62 = vor.u32 %v2458_v43, %v8381_v50  ;;  %v2464_v50 = vrot.slane %v2462_v40, 5  ;;  %v2510_v43 = vshll.u32 %v8538_v36, 16  ;;  %v8928_v29 = vsel %vm7901_vm2, %v2436_v37, %v2440_v25  ;;  %v11867_v40 = vld [vmem:[#allocation72_spill] sm:$0xff] }
 0x211   : > { %v8899_v59 = vpop.permute.xlu0 %3038  ;;  %3012 = vrot.lane.b32.xlu1 %v8897_v20, %s7446_s21  ;;  %v8918_v8 = vsel %vm7901_vm2, %v2412_v32, %v2416_v33  ;;  %11865 = vst [vmem:[#allocation114_spill] sm:$0xff] %v8928_v29  ;;  %v2484_v33 = vrot.slane %v2483_v27, 4  ;;  %v2536_v37 = vrot.slane %v2534_v5, 5 }
 0x212   : > { %11860 = vst [vmem:[#allocation109_spill] sm:$0xff] %v8899_v59  ;;  %v2530_v59 = vrot.slane %v2528_v15, 4  ;;  %11863 = vst [vmem:[#allocation112_spill] sm:$0xff] %v8918_v8  ;;  %v2460_v63 = vrot.slane %v2459_v62, 4  ;;  %v2507_v15 = vor.u32 %v2506_v30, %v8421_v60  ;;  %v2512_v36 = vrot.slane %v2510_v43, 5  ;;  %v11868_v62 = vld [vmem:[#allocation4_spill] sm:$0xff] }
 0x213   : > { %3016 = vrot.lane.b32.xlu0 %v8908_v61, %s7446_s21  ;;  %v8912_v39 = vpop.permute.xlu1 %3042  ;;  %v11871_v60 = vld [vmem:[#allocation74_spill] sm:$0xff] }
 0x214   : > { %11862 = vst [vmem:[#allocation111_spill] sm:$0xff] %v8912_v39  ;;  %v2554_v39 = vrot.slane %v2552_v31, 4  ;;  %v2558_v31 = vshll.u32 %v11868_v62, 16  ;;  %v8939_v46 = vsel %vm7901_vm2, %v2460_v63, %v2464_v50  ;;  %v2508_v43 = vrot.slane %v2507_v15, 4 }
 0x215   : > { %v8921_v44 = vpop.permute.xlu0 %3046  ;;  %3020 = vrot.lane.b32.xlu1 %v8918_v8, %s7446_s21  ;;  %11869 = vst [vmem:[#allocation72_spill] sm:$0xff] %v8939_v46 }
 0x216   : > { %11864 = vst [vmem:[#allocation113_spill] sm:$0xff] %v8921_v44  ;;  %v2531_v44 = vor.u32 %v2530_v59, %v11867_v40  ;;  %v2555_v30 = vor.u32 %v2554_v39, %v11871_v60  ;;  %v8949_v59 = vsel %vm7901_vm2, %v2484_v33, %v2488_v38  ;;  %v2560_v14 = vrot.slane %v2558_v31, 5  ;;  %v11876_v39 = vld [vmem:[#allocation77_spill] sm:$0xff] }
 0x217   : > { %3024 = vrot.lane.b32.xlu0 %v8928_v29, %s7446_s21  ;;  %v8933_v32 = vpop.permute.xlu1 %3450  ;;  %11873 = vst [vmem:[#allocation74_spill] sm:$0xff] %v8949_v59  ;;  %v8957_v63 = vsel %vm7901_vm2, %v2508_v43, %v2512_v36  ;;  %v2579_v5 = vor.u32 %v2578_v28, %v11876_v39 }
 0x218   : > { %11866 = vst [vmem:[#allocation115_spill] sm:$0xff] %v8933_v32  ;;  %v11872_v32 = vld [vmem:[#allocation3_spill] sm:$0xff]  ;;  %11875 = vst [vmem:[#allocation116_spill] sm:$0xff] %v8957_v63  ;;  %v2532_v40 = vrot.slane %v2531_v44, 4  ;;  %v2556_v33 = vrot.slane %v2555_v30, 4 }
 0x219   : > { %v8941_v25 = vpop.permute.xlu0 %3454  ;;  %3028 = vrot.lane.b32.xlu1 %v8939_v46, %s7446_s21  ;;  %v2582_v27 = vshll.u32 %v11872_v32, 16  ;;  %v2580_v28 = vrot.slane %v2579_v5, 4 }
 0x21a   : > { %11870 = vst [vmem:[#allocation4_spill] sm:$0xff] %v8941_v25  ;;  %v8966_v15 = vsel %vm7901_vm2, %v2532_v40, %v2536_v37  ;;  %v8974_v36 = vsel %vm7901_vm2, %v2556_v33, %v2560_v14  ;;  %v569_v25 = vcombine.low %v11739_v58, %v11756_v56 }
 0x21b   : > { %3032 = vrot.lane.b32.xlu0 %v8949_v59, %s7446_s21  ;;  %v8953_v50 = vpop.permute.xlu1 %3458  ;;  %v2584_v38 = vrot.slane %v2582_v27, 5  ;;  %11878 = vst [vmem:[#allocation117_spill] sm:$0xff] %v8966_v15  ;;  %11880 = vst [vmem:[#allocation119_spill] sm:$0xff] %v8974_v36 }
 0x21c   : > { %11874 = vst [vmem:[#allocation3_spill] sm:$0xff] %v8953_v50  ;;  %v11904_v50 = vld [vmem:[#allocation9_spill] sm:$0xff] }
 0x21d   : > { %v8960_v60 = vpop.permute.xlu0 %3462  ;;  %3036 = vrot.lane.b32.xlu1 %v8957_v63, %s7446_s21  ;;  %v8982_v37 = vsel %vm7901_vm2, %v2580_v28, %v2584_v38 }
 0x21e   : > { %11877 = vst [vmem:[#allocation77_spill] sm:$0xff] %v8960_v60  ;;  %11882 = vst [vmem:[#allocation121_spill] sm:$0xff] %v8982_v37 }
 0x21f   : > { %3040 = vrot.lane.b32.xlu0 %v8966_v15, %s7446_s21  ;;  %v8970_v31 = vpop.permute.xlu1 %3466 }
 0x220   : > { %11879 = vst [vmem:[#allocation118_spill] sm:$0xff] %v8970_v31  ;;  %v11901_v31 = vld [vmem:[#allocation11_spill] sm:$0xff] }
 0x221   : > { %v8976_v44 = vpop.permute.xlu0 %3470  ;;  %3044 = vrot.lane.b32.xlu1 %v8974_v36, %s7446_s21 }
 0x222   : > { %11881 = vst [vmem:[#allocation120_spill] sm:$0xff] %v8976_v44 }
 0x223   : > { %3048 = vrot.lane.b32.xlu0 %v8982_v37, %s7446_s21  ;;  %v8986_v30 = vpop.permute.xlu1 %3474 }
 0x224   : > { %11883 = vst [vmem:[#allocation122_spill] sm:$0xff] %v8986_v30 }
 0x225   : > { %v8988_v27 = vpop.permute.xlu0 %3478  ;;  %3452 = vrot.lane.b32.xlu1 %v8830_v54, %s7445_s20 }
 0x226   : > { %11884 = vst [vmem:[#allocation123_spill] sm:$0xff] %v8988_v27  ;;  %v11930_v27 = vld [vmem:[#allocation67_spill] sm:$0xff] }
 0x227   : > { %3456 = vrot.lane.b32.xlu0 %v8841_v48, %s7445_s20  ;;  %v8994_v43 = vpop.permute.xlu1 %3482  ;;  %v11894_v48 = vld [vmem:[#allocation65_spill] sm:$0xff] }
 0x228   : > { %11885 = vst [vmem:[#allocation124_spill] sm:$0xff] %v8994_v43 }
 0x229   : > { %v8996_v14 = vpop.permute.xlu0 %3486  ;;  %3460 = vrot.lane.b32.xlu1 %v8853_v23, %s7445_s20  ;;  %v11898_v23 = vld [vmem:[#allocation38_spill] sm:$0xff] }
 0x22a   : > { %11886 = vst [vmem:[#allocation125_spill] sm:$0xff] %v8996_v14  ;;  %v11919_v14 = vld [vmem:[#allocation73_spill] sm:$0xff] }
 0x22b   : > { %3464 = vrot.lane.b32.xlu0 %v8864_v19, %s7445_s20  ;;  %v9002_v42 = vpop.permute.xlu1 %3490  ;;  %v493_v19 = vcombine.low %v8546_v53, %v11795_v6 }
 0x22c   : > { %11887 = vst [vmem:[#allocation126_spill] sm:$0xff] %v9002_v42 }
 0x22d   : > { %v9004_v40 = vpop.permute.xlu0 %3494  ;;  %3468 = vrot.lane.b32.xlu1 %v8874_v49, %s7445_s20 }
 0x22e   : > { %11888 = vst [vmem:[#allocation127_spill] sm:$0xff] %v9004_v40 }
 0x22f   : > { %3472 = vrot.lane.b32.xlu0 %v8885_v1, %s7445_s20  ;;  %v9010_v39 = vpop.permute.xlu1 %3498  ;;  %v11895_v1 = vld [vmem:[#allocation43_spill] sm:$0xff] }
 0x230   : > { %11889 = vst [vmem:[#allocation128_spill] sm:$0xff] %v9010_v39  ;;  %v2626_v54 = vcombine.low %v11895_v1, %v11894_v48  ;;  %v535_v1 = vcombine.low %v11792_v21, %v7629_v22  ;;  %v11899_v48 = vld [vmem:[#allocation14_spill] sm:$0xff] }
 0x231   : > { %v9012_v5 = vpop.permute.xlu0 %3502  ;;  %3476 = vrot.lane.b32.xlu1 %v8897_v20, %s7445_s20 }
 0x232   : > { %11890 = vst [vmem:[#allocation129_spill] sm:$0xff] %v9012_v5  ;;  %v2633_v30 = vrot.slane %v2626_v54, %v11904_v50  ;;  %v9067_v54 = vrot.slane %v493_v19, %v11904_v50  ;;  %v11920_v5 = vld [vmem:[#allocation13_spill] sm:$0xff] }
 0x233   : > { %3480 = vrot.lane.b32.xlu0 %v8908_v61, %s7445_s20  ;;  %v9018_v38 = vpop.permute.xlu1 %3506  ;;  %v527_v61 = vcombine.low %v11781_v0, %v7607_v13 }
 0x234   : > { %11891 = vst [vmem:[#allocation130_spill] sm:$0xff] %v9018_v38  ;;  %v11908_v38 = vrot.slane %v8546_v53, 5  ;;  %v4453_v53 = vrot.slane %v8452_v7, 5  ;;  %v4460_v7 = vrot.slane %v8467_v12, 5 }
 0x235   : > { %v9020_v33 = vpop.permute.xlu0 %3510  ;;  %3484 = vrot.lane.b32.xlu1 %v8918_v8, %s7445_s20  ;;  %v11897_v8 = vld [vmem:[#allocation46_spill] sm:$0xff] }
 0x236   : > { %11892 = vst [vmem:[#allocation131_spill] sm:$0xff] %v9020_v33  ;;  %v2618_v20 = vcombine.low %v11898_v23, %v11897_v8  ;;  %v561_v23 = vcombine.low %v7643_v26, %v11808_v24  ;;  %v595_v8 = vcombine.low %v11730_v47, %v11749_v10 }
 0x237   : > { %3488 = vrot.lane.b32.xlu0 %v8928_v29, %s7445_s20  ;;  %v9026_v28 = vpop.permute.xlu1 %4953  ;;  %v501_v29 = vcombine.low %v11788_v57, %v7615_v17 }
 0x238   : > { %11893 = vst [vmem:[#allocation132_spill] sm:$0xff] %v9026_v28  ;;  %v11900_v28 = vld [vmem:[#allocation40_spill] sm:$0xff] }
 0x239   : > { %v9030_v49 = vpop.permute.xlu0 %4957  ;;  %3492 = vrot.lane.b32.xlu1 %v8939_v46, %s7445_s20  ;;  %v11902_v46 = vld [vmem:[#allocation44_spill] sm:$0xff] }
 0x23a   : > { %11896 = vst [vmem:[#allocation65_spill] sm:$0xff] %v9030_v49  ;;  %v2652_v49 = vcombine.low %v11900_v28, %v11899_v48  ;;  %v2660_v43 = vcombine.low %v11902_v46, %v11901_v31  ;;  %v603_v28 = vcombine.low %v11740_v9, %v11760_v45  ;;  %v2625_v31 = vrot.slane %v2618_v20, %v11904_v50 }
 0x23b   : > { %3496 = vrot.lane.b32.xlu0 %v8949_v59, %s7445_s20  ;;  %v9050_v39 = vpop.permute.xlu1 %4961  ;;  %v9070_v48 = vrot.slane %v527_v61, %v11904_v50  ;;  %v11906_v59 = vld [vmem:[#allocation86_spill] sm:$0xff] }
 0x23c   : > { %11903 = vst [vmem:[#allocation43_spill] sm:$0xff] %v9050_v39  ;;  %v4585_v39 = vcombine.low %v11906_v59, %v8611_v35  ;;  %v2659_v44 = vrot.slane %v2652_v49, %v11904_v50  ;;  %v2667_v42 = vrot.slane %v2660_v43, %v11904_v50  ;;  %v2634_v20 = vcombine.low %v2625_v31, %v2633_v30 }
 0x23d   : > { %v9061_v46 = vpop.permute.xlu0 %4965  ;;  %3500 = vrot.lane.b32.xlu1 %v8957_v63, %s7445_s20  ;;  %v9080_v63 = vrot.slane %v535_v1, %v11904_v50  ;;  %v2635_v61 = vcombine.high %v2625_v31, %v2633_v30  ;;  %v4445_v35 = vrot.slane %v11908_v38, 4  ;;  %v4446_v49 = vrot.slane %v8799_v41, 5 }
 0x23e   : > { %11905 = vst [vmem:[#allocation46_spill] sm:$0xff] %v9061_v46  ;;  %v9077_v46 = vrot.slane %v501_v29, %v11904_v50  ;;  %v9090_v59 = vrot.slane %v561_v23, %v11904_v50  ;;  %v9093_v29 = vrot.slane %v569_v25, %v11904_v50  ;;  %v9096_v43 = vrot.slane %v595_v8, %v11904_v50  ;;  %v11911_v23 = vld [vmem:[#allocation78_spill] sm:$0xff] }
 0x23f   : > { %3504 = vrot.lane.b32.xlu0 %v8966_v15, %s7445_s20  ;;  %v9084_v19 = vpop.permute.xlu1 %4969  ;;  %v9099_v1 = vrot.slane %v603_v28, %v11904_v50  ;;  %v11910_v41 = vrot.slane %v11781_v0, 5  ;;  %v2668_v38 = vcombine.low %v2659_v44, %v2667_v42  ;;  %v11912_v25 = vld [vmem:[#allocation70_spill] sm:$0xff]  ;;  %v543_v28 = vcombine.low %v9070_v48, %v9080_v63 }
 0x240   : > { %11907 = vst [vmem:[#allocation38_spill] sm:$0xff] %v9084_v19  ;;  %v2694_v31 = vcombine.low %v11912_v25, %v11911_v23  ;;  %v509_v8 = vcombine.low %v9067_v54, %v9077_v46  ;;  %v9127_v25 = vsel %vm8558_vm6, %v4445_v35, %v4446_v49  ;;  %v2669_v35 = vcombine.high %v2659_v44, %v2667_v42  ;;  %v11925_v42 = vld [vmem:[#allocation81_spill] sm:$0xff] }
 0x241   : > { %v9101_v15 = vpop.permute.xlu0 %4973  ;;  %3508 = vrot.lane.b32.xlu1 %v8974_v36, %s7445_s20  ;;  %v4452_v30 = vrot.slane %v11910_v41, 4  ;;  %v11914_v36 = vld [vmem:[#allocation12_spill] sm:$0xff]  ;;  %v9123_v41 = vrot.slane %v4585_v39, %v11904_v50  ;;  %11917 = vst [vmem:[#allocation44_spill] sm:$0xff] %v9127_v25  ;;  %v611_v12 = vcombine.low %v9096_v43, %v9099_v1  ;;  %v4467_v39 = vrot.slane %v8492_v3, 5 }
 0x242   : > { %11909 = vst [vmem:[#allocation14_spill] sm:$0xff] %v9101_v15  ;;  %v9120_v0 = vrot.slane %v2634_v20, %v11914_v36  ;;  %v9130_v15 = vrot.slane %v2635_v61, %v11914_v36  ;;  %v9150_v49 = vrot.slane %v2668_v38, %v11914_v36  ;;  %v9157_v60 = vrot.slane %v543_v28, %v11914_v36 }
 0x243   : > { %3512 = vrot.lane.b32.xlu0 %v8982_v37, %s7445_s20  ;;  %v9116_v19 = vpop.permute.xlu1 %4977  ;;  %11915 = vst [vmem:[#allocation11_spill] sm:$0xff] %v9123_v41  ;;  %v2686_v37 = vcombine.low %v11920_v5, %v11919_v14  ;;  %v9145_v61 = vsel %vm8558_vm6, %v4452_v30, %v4453_v53  ;;  %v11923_v14 = vrot.slane %v11788_v57, 5  ;;  %v4474_v44 = vrot.slane %v8498_v55, 5  ;;  %v11926_v53 = vld [vmem:[#allocation71_spill] sm:$0xff] }
 0x244   : > { %11913 = vst [vmem:[#allocation40_spill] sm:$0xff] %v9116_v19  ;;  %11918 = vst [vmem:[#allocation86_spill] sm:$0xff] %v9130_v15  ;;  %v577_v19 = vcombine.low %v9090_v59, %v9093_v29  ;;  %v2701_v15 = vrot.slane %v2694_v31, %v11904_v50  ;;  %v2728_v30 = vcombine.low %v11926_v53, %v11925_v42  ;;  %v11928_v31 = vrot.slane %v11792_v21, 5 }
 0x245   : > { %v9138_v20 = vpop.permute.xlu0 %4981  ;;  %4955 = vrot.lane.b32.xlu1 %v9127_v25, %s7446_s21  ;;  %11922 = vst [vmem:[#allocation70_spill] sm:$0xff] %v9145_v61  ;;  %v4459_v5 = vrot.slane %v11923_v14, 4  ;;  %v2693_v28 = vrot.slane %v2686_v37, %v11904_v50  ;;  %v11929_v14 = vld [vmem:[#allocation76_spill] sm:$0xff]  ;;  %v9179_v55 = vrot.slane %v611_v12, %v11914_v36  ;;  %v9187_v21 = vrot.slane %v2669_v35, %v11914_v36 }
 0x246   : > { %11921 = vst [vmem:[#allocation78_spill] sm:$0xff] %v9138_v20  ;;  %v9154_v20 = vrot.slane %v509_v8, %v11914_v36  ;;  %v4466_v8 = vrot.slane %v11928_v31, 4  ;;  %v2720_v40 = vcombine.low %v11930_v27, %v11929_v14  ;;  %v9176_v33 = vrot.slane %v577_v19, %v11914_v36 }
 0x247   : > { %4959 = vrot.lane.b32.xlu0 %v9145_v61, %s7446_s21  ;;  %v9161_v3 = vpop.permute.xlu1 %4985  ;;  %v9168_v38 = vsel %vm8558_vm6, %v4459_v5, %v4460_v7  ;;  %v4481_v7 = vrot.slane %v8504_v16, 5  ;;  %11932 = vst [vmem:[#allocation13_spill] sm:$0xff] %v9187_v21  ;;  %v11934_v27 = vrot.slane %v11795_v6, 5  ;;  %v2702_v5 = vcombine.low %v2693_v28, %v2701_v15 }
 0x248   : > { %11924 = vst [vmem:[#allocation12_spill] sm:$0xff] %v9161_v3  ;;  %11927 = vst [vmem:[#allocation85_spill] sm:$0xff] %v9168_v38  ;;  %v9191_v37 = vsel %vm8558_vm6, %v4466_v8, %v4467_v39  ;;  %v2703_v12 = vcombine.high %v2693_v28, %v2701_v15  ;;  %v656_v42 = vshrl.u32 %v9154_v20, 16  ;;  %v657_v53 = vshrl.u32 %v9157_v60, 16 }
 0x249   : > { %v9181_v3 = vpop.permute.xlu0 %4989  ;;  %4963 = vrot.lane.b32.xlu1 %v9168_v38, %s7446_s21  ;;  %11933 = vst [vmem:[#allocation81_spill] sm:$0xff] %v9191_v37  ;;  %v4473_v19 = vrot.slane %v11934_v27, 4  ;;  %v4488_v35 = vrot.slane %v8508_v52, 5  ;;  %v2735_v31 = vrot.slane %v2728_v30, %v11904_v50  ;;  %v11937_v6 = vrot.slane %v7607_v13, 5 }
 0x24a   : > { %11931 = vst [vmem:[#allocation73_spill] sm:$0xff] %v9181_v3  ;;  %v2727_v8 = vrot.slane %v2720_v40, %v11904_v50  ;;  %v655_v28 = vpack.i.b16 %v9157_v60, %v9154_v20  ;;  %v704_v14 = vshrl.u32 %v9176_v33, 16  ;;  %v705_v27 = vshrl.u32 %v9179_v55, 16 }
 0x24b   : > { %4967 = vrot.lane.b32.xlu0 %v9191_v37, %s7446_s21  ;;  %v9199_v16 = vpop.permute.xlu1 %4993  ;;  %v9205_v39 = vsel %vm8558_vm6, %v4473_v19, %v4474_v44  ;;  %v4480_v15 = vrot.slane %v11937_v6, 4  ;;  %v4495_v52 = vrot.slane %v8514_v4, 5  ;;  %v703_v13 = vpack.i.b16 %v9179_v55, %v9176_v33 }
 0x24c   : > { %11935 = vst [vmem:[#allocation71_spill] sm:$0xff] %v9199_v16  ;;  %11936 = vst [vmem:[#allocation76_spill] sm:$0xff] %v9205_v39  ;;  %v11939_v44 = vrot.slane %v7615_v17, 5  ;;  %v9228_v19 = vrot.slane %v2702_v5, %v11914_v36  ;;  %v9231_v6 = vrot.slane %v2703_v12, %v11914_v36  ;;  %v9233_v16 = vpack.i.b16 %v657_v53, %v656_v42 }
 0x24d   : > { %v9214_v21 = vpop.permute.xlu0 %4997  ;;  %4971 = vrot.lane.b32.xlu1 %v9205_v39, %s7446_s21  ;;  %v9223_v40 = vsel %vm8558_vm6, %v4480_v15, %v4481_v7  ;;  %v4593_v4 = vcombine.low %v8589_v2, %v8635_v18  ;;  %v11942_v7 = vld [vmem:[#allocation82_spill] sm:$0xff]  ;;  %v2736_v17 = vcombine.low %v2727_v8, %v2735_v31  ;;  %v11944_v12 = vrot.slane %v7629_v22, 5 }
 0x24e   : > { %11938 = vst [vmem:[#allocation67_spill] sm:$0xff] %v9223_v40  ;;  %v4487_v30 = vrot.slane %v11939_v44, 4  ;;  %11940 = vst [vmem:[#allocation133_spill] sm:$0xff] %v9231_v6  ;;  %v4502_v15 = vrot.slane %v11942_v7, 5  ;;  %v2737_v42 = vcombine.high %v2727_v8, %v2735_v31  ;;  %v9248_v53 = vpack.i.b16 %v705_v27, %v704_v14  ;;  %v11952_v27 = vld [vmem:[#allocation88_spill] sm:$0xff] }
 0x24f   : > { %11941 = vst [vmem:[#allocation134_spill] sm:$0xff] %v9233_v16  ;;  %4975 = vrot.lane.b32.xlu0 %v9223_v40, %s7446_s21  ;;  %v9239_v3 = vpop.permute.xlu1 %5001  ;;  %v4494_v44 = vrot.slane %v11944_v12, 4  ;;  %v510_v2 = vcombine.high %v9067_v54, %v9077_v46  ;;  %v544_v18 = vcombine.high %v9070_v48, %v9080_v63  ;;  %v11948_v31 = vrot.slane %v7643_v26, 5  ;;  %v11949_v63 = vld [vmem:[#allocation7_spill] sm:$0xff]  ;;  %v11950_v54 = vld [vmem:[#allocation2_spill] sm:$0xff]  ;;  %v11971_v46 = vld [vmem:[#allocation56_spill] sm:$0xff] }
 0x250   : > { %v9244_v5 = vsel %vm8558_vm6, %v4487_v30, %v4488_v35  ;;  %11945 = vst [vmem:[#allocation135_spill] sm:$0xff] %v9248_v53  ;;  %v4509_v35 = vrot.slane %v8524_v34, 5  ;;  %v9259_v30 = vcombine.low %v655_v28, %v703_v13  ;;  %v4619_v48 = vcombine.low %v11950_v54, %v11949_v63  ;;  %v11953_v34 = vld [vmem:[#allocation5_spill] sm:$0xff]  ;;  %v11968_v63 = vld [vmem:[#allocation83_spill] sm:$0xff]  ;;  %v11975_v16 = vld [vmem:[#allocation20_spill] sm:$0xff] }
 0x251   : > { %11943 = vst [vmem:[#allocation82_spill] sm:$0xff] %v9244_v5  ;;  %v9254_v6 = vpop.permute.xlu0 %5005  ;;  %4979 = vrot.lane.b32.xlu1 %v9244_v5, %s7446_s21  ;;  %v9263_v22 = vsel %vm8558_vm6, %v4494_v44, %v4495_v52  ;;  %v4501_v8 = vrot.slane %v11948_v31, 4  ;;  %v9272_v14 = vrot.slane %v4593_v4, %v11904_v50  ;;  %v4627_v28 = vcombine.low %v11953_v34, %v11952_v27 }
 0x252   : > { %11946 = vst [vmem:[#allocation136_spill] sm:$0xff] %v9259_v30  ;;  %11947 = vst [vmem:[#allocation137_spill] sm:$0xff] %v9263_v22  ;;  %v4516_v26 = vrot.slane %v8528_v11, 5  ;;  %v11955_v4 = vrot.slane %v11730_v47, 5  ;;  %v9290_v44 = vrot.slane %v2736_v17, %v11914_v36  ;;  %v9293_v31 = vrot.slane %v2737_v42, %v11914_v36  ;;  %v11976_v30 = vld [vmem:[#allocation92_spill] sm:$0xff] }
 0x253   : > { %11951 = vst [vmem:[#allocation7_spill] sm:$0xff] %v9272_v14  ;;  %4983 = vrot.lane.b32.xlu0 %v9263_v22, %s7446_s21  ;;  %v9278_v52 = vpop.permute.xlu1 %5009  ;;  %v9285_v7 = vsel %vm8558_vm6, %v4501_v8, %v4502_v15  ;;  %v9298_v11 = vrot.slane %v510_v2, %v11914_v36  ;;  %v4523_v47 = vrot.slane %v8534_v51, 5  ;;  %v9306_v15 = vrot.slane %v544_v18, %v11914_v36  ;;  %v11963_v51 = vld [vmem:[#allocation94_spill] sm:$0xff] }
 0x254   : > { %11954 = vst [vmem:[#allocation2_spill] sm:$0xff] %v9285_v7  ;;  %v4508_v12 = vrot.slane %v11955_v4, 4  ;;  %11956 = vst [vmem:[#allocation88_spill] sm:$0xff] %v9293_v31  ;;  %v11960_v42 = vrot.slane %v11739_v58, 5  ;;  %v9315_v2 = vrot.slane %v4619_v48, %v11904_v50  ;;  %v9320_v34 = vrot.slane %v4627_v28, %v11904_v50  ;;  %v11964_v4 = vld [vmem:[#allocation93_spill] sm:$0xff]  ;;  %v11967_v58 = vld [vmem:[#allocation48_spill] sm:$0xff] }
 0x255   : > { %11957 = vst [vmem:[#allocation5_spill] sm:$0xff] %v9298_v11  ;;  %v9300_v54 = vpop.permute.xlu0 %5013  ;;  %4987 = vrot.lane.b32.xlu1 %v9285_v7, %s7446_s21  ;;  %11958 = vst [vmem:[#allocation138_spill] sm:$0xff] %v9306_v15  ;;  %v4661_v18 = vcombine.low %v11964_v4, %v11963_v51  ;;  %v4530_v48 = vrot.slane %v11968_v63, 5  ;;  %v11970_v28 = vrot.slane %v11740_v9, 5  ;;  %v11972_v15 = vld [vmem:[#allocation49_spill] sm:$0xff]  ;;  %v11973_v4 = vld [vmem:[#allocation15_spill] sm:$0xff]  ;;  %v4687_v31 = vcombine.low %v11976_v30, %v11975_v16 }
 0x256   : > { %v9310_v17 = vsel %vm8558_vm6, %v4508_v12, %v4509_v35  ;;  %v4515_v8 = vrot.slane %v11960_v42, 4  ;;  %11961 = vst [vmem:[#allocation140_spill] sm:$0xff] %v9315_v2  ;;  %11962 = vst [vmem:[#allocation141_spill] sm:$0xff] %v9320_v34  ;;  %v11966_v12 = vld [vmem:[#allocation55_spill] sm:$0xff]  ;;  %v1451_v51 = vcombine.low %v11972_v15, %v11971_v46  ;;  %v11974_v11 = vld [vmem:[#allocation90_spill] sm:$0xff] }
 0x257   : > { %11959 = vst [vmem:[#allocation139_spill] sm:$0xff] %v9310_v17  ;;  %4991 = vrot.lane.b32.xlu0 %v9310_v17, %s7446_s21  ;;  %v9326_v35 = vpop.permute.xlu1 %5417  ;;  %v1417_v42 = vcombine.low %v11967_v58, %v11966_v12  ;;  %v4522_v27 = vrot.slane %v11970_v28, 4  ;;  %v4653_v53 = vcombine.low %v11974_v11, %v11973_v4  ;;  %v11978_v12 = vld [vmem:[#allocation16_spill] sm:$0xff]  ;;  %v11983_v11 = vrot.slane %v11808_v24, 5  ;;  %v11984_v30 = vld [vmem:[#allocation54_spill] sm:$0xff]  ;;  %v11985_v15 = vld [vmem:[#allocation47_spill] sm:$0xff] }
 0x258   : > { %11965 = vst [vmem:[#allocation94_spill] sm:$0xff] %v9326_v35  ;;  %v9333_v13 = vsel %vm8558_vm6, %v4515_v8, %v4516_v26  ;;  %v11977_v35 = vld [vmem:[#allocation95_spill] sm:$0xff]  ;;  %v11980_v26 = vld [vmem:[#allocation50_spill] sm:$0xff]  ;;  %v11981_v8 = vld [vmem:[#allocation84_spill] sm:$0xff]  ;;  %v9361_v4 = vrot.slane %v4661_v18, %v11904_v50  ;;  %v11990_v18 = vrot.slane %v11749_v10, 5  ;;  %v4551_v10 = vrot.slane %v11872_v32, 5 }
 0x259   : > { %11969 = vst [vmem:[#allocation93_spill] sm:$0xff] %v9333_v13  ;;  %v4695_v58 = vcombine.low %v11978_v12, %v11977_v35  ;;  %v9345_v63 = vpop.permute.xlu0 %5421  ;;  %4995 = vrot.lane.b32.xlu1 %v9333_v13, %s7446_s21  ;;  %v1409_v9 = vcombine.low %v11788_v57, %v11980_v26  ;;  %v4537_v28 = vrot.slane %v11981_v8, 5  ;;  %v9354_v46 = vsel %vm8558_vm6, %v4522_v27, %v4523_v47 }
 0x25a   : > { %11979 = vst [vmem:[#allocation55_spill] sm:$0xff] %v9345_v63  ;;  %11982 = vst [vmem:[#allocation48_spill] sm:$0xff] %v9354_v46  ;;  %v4529_v16 = vrot.slane %v11983_v11, 4  ;;  %v1443_v35 = vcombine.low %v11985_v15, %v11984_v30  ;;  %v11987_v12 = vmov 0   ;;  %v1424_v24 = vrot.slane %v1417_v42, %v11904_v50 }
 0x25b   : > { %11986 = vst [vmem:[#allocation83_spill] sm:$0xff] %v9361_v4  ;;  %v593_v63 = vcombine.high %v9176_v33, %v11987_v12  ;;  %v627_v57 = vcombine.high %v9179_v55, %v11987_v12  ;;  %4999 = vrot.lane.b32.xlu0 %v9354_v46, %s7446_s21  ;;  %v9369_v47 = vpop.permute.xlu1 %5425  ;;  %v4544_v27 = vrot.slane %v11868_v62, 5  ;;  %v4536_v8 = vrot.slane %v11990_v18, 4 }
 0x25c   : > { %11988 = vst [vmem:[#allocation56_spill] sm:$0xff] %v9369_v47  ;;  %v9375_v26 = vsel %vm8558_vm6, %v4529_v16, %v4530_v48  ;;  %v1458_v33 = vrot.slane %v1451_v51, %v11904_v50  ;;  %v9381_v55 = vrot.slane %v4695_v58, %v11904_v50  ;;  %v525_v11 = vcombine.high %v9154_v20, %v11987_v12 }
 0x25d   : > { %11989 = vst [vmem:[#allocation49_spill] sm:$0xff] %v9375_v26  ;;  %v559_v42 = vcombine.high %v9157_v60, %v11987_v12  ;;  %v9387_v30 = vpop.permute.xlu0 %5429  ;;  %5003 = vrot.lane.b32.xlu1 %v9375_v26, %s7446_s21  ;;  %v1416_v62 = vrot.slane %v1409_v9, %v11904_v50  ;;  %v9395_v48 = vsel %vm8558_vm6, %v4536_v8, %v4537_v28  ;;  %v11994_v51 = vrot.slane %v11756_v56, 5 }
 0x25e   : > { %11991 = vst [vmem:[#allocation15_spill] sm:$0xff] %v9381_v55  ;;  %11992 = vst [vmem:[#allocation90_spill] sm:$0xff] %v9387_v30  ;;  %v1450_v20 = vrot.slane %v1443_v35, %v11904_v50  ;;  %v9401_v60 = vrot.slane %v4653_v53, %v11904_v50  ;;  %v710_v16 = vshrl.u32 %v593_v63, 16  ;;  %v711_v15 = vshrl.u32 %v627_v57, 16 }
 0x25f   : > { %11993 = vst [vmem:[#allocation20_spill] sm:$0xff] %v9395_v48  ;;  %v4543_v58 = vrot.slane %v11994_v51, 4  ;;  %5007 = vrot.lane.b32.xlu0 %v9395_v48, %s7446_s21  ;;  %v9405_v9 = vpop.permute.xlu1 %5433  ;;  %v1425_v32 = vcombine.low %v1416_v62, %v1424_v24  ;;  %v9408_v18 = vrot.slane %v4687_v31, %v11904_v50  ;;  %v11999_v28 = vrot.slane %v11760_v45, 5 }
 0x260   : > { %11995 = vst [vmem:[#allocation92_spill] sm:$0xff] %v9401_v60  ;;  %11996 = vst [vmem:[#allocation95_spill] sm:$0xff] %v9405_v9  ;;  %v1459_v53 = vcombine.low %v1450_v20, %v1458_v33  ;;  %v4635_v8 = vcombine.low %v9315_v2, %v9320_v34  ;;  %v662_v51 = vshrl.u32 %v525_v11, 16  ;;  %v663_v47 = vshrl.u32 %v559_v42, 16 }
 0x261   : > { %11997 = vst [vmem:[#allocation16_spill] sm:$0xff] %v9408_v18  ;;  %v9412_v56 = vsel %vm8558_vm6, %v4543_v58, %v4544_v27  ;;  %v4550_v35 = vrot.slane %v11999_v28, 4  ;;  %v9418_v30 = vpop.permute.xlu0 %5437  ;;  %v4669_v31 = vcombine.low %v9401_v60, %v9361_v4  ;;  %v4703_v27 = vcombine.low %v9408_v18, %v9381_v55  ;;  %v12031_v55 = vld [vmem:[#allocation58_spill] sm:$0xff] }
 0x262   : > { %11998 = vst [vmem:[#allocation50_spill] sm:$0xff] %v9412_v56  ;;  %12000 = vst [vmem:[#allocation84_spill] sm:$0xff] %v9418_v30  ;;  %5011 = vrot.lane.b32.xlu1 %v9412_v56, %s7446_s21  ;;  %v709_v58 = vpack.i.b16 %v627_v57, %v593_v63  ;;  %v1460_v28 = vcombine.high %v1450_v20, %v1458_v33  ;;  %v12002_v2 = vcombine.high %v9090_v59, %v9093_v29 }
 0x263   : > { %v9428_v45 = vsel %vm8558_vm6, %v4550_v35, %v4551_v10  ;;  %v12004_v9 = vcombine.high %v9096_v43, %v9099_v1  ;;  %v9442_v4 = vpack.i.b16 %v711_v15, %v710_v16  ;;  %v9446_v23 = vpop.permute.xlu1 %5441  ;;  %v1426_v63 = vcombine.high %v1416_v62, %v1424_v24 }
 0x264   : > { %12001 = vst [vmem:[#allocation54_spill] sm:$0xff] %v9428_v45  ;;  %v9434_v34 = vrot.slane %v12002_v2, %v11914_v36  ;;  %5015 = vrot.lane.b32.xlu0 %v9428_v45, %s7446_s21  ;;  %12007 = vst [vmem:[#allocation144_spill] sm:$0xff] %v9446_v23  ;;  %v9449_v57 = vrot.slane %v1425_v32, %v11914_v36  ;;  %v12008_v59 = vcombine.low %v9123_v41, %v9272_v14  ;;  %v12028_v41 = vld [vmem:[#allocation62_spill] sm:$0xff]  ;;  %v12029_v14 = vld [vmem:[#allocation57_spill] sm:$0xff] }
 0x265   : > { %v9440_v60 = vrot.slane %v12004_v9, %v11914_v36  ;;  %12006 = vst [vmem:[#allocation143_spill] sm:$0xff] %v9442_v4  ;;  %v661_v43 = vpack.i.b16 %v559_v42, %v525_v11  ;;  %v9458_v1 = vrot.slane %v1459_v53, %v11914_v36  ;;  %v9461_v2 = vrot.slane %v4635_v8, %v11914_v36  ;;  %v9465_v10 = vpop.permute.xlu0 %5445  ;;  %v12032_v4 = vld [vmem:[#allocation21_spill] sm:$0xff] }
 0x266   : > { %12003 = vst [vmem:[#allocation47_spill] sm:$0xff] %v9434_v34  ;;  %v9455_v29 = vrot.slane %v12008_v59, %v11914_v36  ;;  %v9463_v33 = vpack.i.b16 %v663_v47, %v662_v51  ;;  %12012 = vst [vmem:[#allocation148_spill] sm:$0xff] %v9465_v10  ;;  %5419 = vrot.lane.b32.xlu1 %v9127_v25, %s7445_s20  ;;  %v2940_v24 = vpack.i.b16 %v9290_v44, %v9228_v19  ;;  %v12037_v34 = vld [vmem:[#allocation109_spill] sm:$0xff] }
 0x267   : > { %12005 = vst [vmem:[#allocation142_spill] sm:$0xff] %v9440_v60  ;;  %12010 = vst [vmem:[#allocation146_spill] sm:$0xff] %v9461_v2  ;;  %v9472_v62 = vrot.slane %v4669_v31, %v11914_v36  ;;  %v9475_v11 = vrot.slane %v4703_v27, %v11914_v36  ;;  %v9477_v42 = vcombine.low %v661_v43, %v709_v58  ;;  %v2942_v20 = vshrl.u32 %v9290_v44, 16  ;;  %v9487_v15 = vpop.permute.xlu1 %5449 }
 0x268   : > { %12009 = vst [vmem:[#allocation145_spill] sm:$0xff] %v9455_v29  ;;  %12011 = vst [vmem:[#allocation147_spill] sm:$0xff] %v9463_v33  ;;  %v9481_v47 = vrot.slane %v1460_v28, %v11914_v36  ;;  %5423 = vrot.lane.b32.xlu0 %v9145_v61, %s7445_s20  ;;  %v2892_v9 = vpack.i.b16 %v9150_v49, %v9120_v0  ;;  %v2894_v32 = vshrl.u32 %v9150_v49, 16  ;;  %v2941_v8 = vshrl.u32 %v9228_v19, 16  ;;  %v12027_v61 = vld [vmem:[#allocation37_spill] sm:$0xff]  ;;  %v12033_v33 = vld [vmem:[#allocation60_spill] sm:$0xff] }
 0x269   : > { %12013 = vst [vmem:[#allocation149_spill] sm:$0xff] %v9472_v62  ;;  %12014 = vst [vmem:[#allocation150_spill] sm:$0xff] %v9475_v11  ;;  %v9493_v35 = vrot.slane %v1426_v63, %v11914_v36  ;;  %v9497_v53 = vcombine.high %v9449_v57, %v11987_v12  ;;  %v2893_v51 = vshrl.u32 %v9120_v0, 16  ;;  %v9501_v31 = vpop.permute.xlu0 %5453  ;;  %v1573_v27 = vshrl.u32 %v9458_v1, 16 }
 0x26a   : > { %12015 = vst [vmem:[#allocation151_spill] sm:$0xff] %v9477_v42  ;;  %12016 = vst [vmem:[#allocation152_spill] sm:$0xff] %v9487_v15  ;;  %5427 = vrot.lane.b32.xlu1 %v9168_v38, %s7445_s20  ;;  %v9506_v58 = vcombine.low %v2892_v9, %v2940_v24  ;;  %v9510_v28 = vcombine.high %v9150_v49, %v11987_v12  ;;  %v9514_v63 = vcombine.high %v9228_v19, %v11987_v12  ;;  %v12030_v19 = vld [vmem:[#allocation64_spill] sm:$0xff]  ;;  %v12038_v42 = vld [vmem:[#allocation105_spill] sm:$0xff] }
 0x26b   : > { %12017 = vst [vmem:[#allocation153_spill] sm:$0xff] %v9501_v31  ;;  %v9518_v59 = vcombine.high %v9458_v1, %v11987_v12  ;;  %v9520_v43 = vpack.i.b16 %v2942_v20, %v2941_v8  ;;  %v9524_v16 = vcombine.high %v9290_v44, %v11987_v12  ;;  %v9528_v24 = vcombine.high %v9120_v0, %v11987_v12  ;;  %v9532_v49 = vpop.permute.xlu1 %5457  ;;  %v12026_v44 = vld [vmem:[#allocation113_spill] sm:$0xff]  ;;  %v12069_v15 = vld [vmem:[#allocation124_spill] sm:$0xff] }
 0x26c   : > { %12018 = vst [vmem:[#allocation154_spill] sm:$0xff] %v9506_v58  ;;  %12019 = vst [vmem:[#allocation155_spill] sm:$0xff] %v9510_v28  ;;  %5431 = vrot.lane.b32.xlu0 %v9191_v37, %s7445_s20  ;;  %v1572_v9 = vshrl.u32 %v9449_v57, 16  ;;  %v9539_v8 = vpack.i.b16 %v2894_v32, %v2893_v51  ;;  %v3192_v25 = vcombine.low %v12027_v61, %v12026_v44  ;;  %v1584_v38 = vshrl.u32 %v9493_v35, 16  ;;  %v12035_v51 = vld [vmem:[#allocation103_spill] sm:$0xff]  ;;  %v12036_v44 = vld [vmem:[#allocation89_spill] sm:$0xff] }
 0x26d   : > { %12020 = vst [vmem:[#allocation156_spill] sm:$0xff] %v9514_v63  ;;  %12021 = vst [vmem:[#allocation157_spill] sm:$0xff] %v9520_v43  ;;  %v1585_v37 = vshrl.u32 %v9481_v47, 16  ;;  %v1477_v18 = vcombine.low %v12029_v14, %v12028_v41  ;;  %v1511_v60 = vcombine.low %v12031_v55, %v12030_v19  ;;  %v1519_v20 = vcombine.low %v12033_v33, %v12032_v4  ;;  %v9552_v32 = vpop.permute.xlu0 %5461  ;;  %v12039_v41 = vld [vmem:[#allocation111_spill] sm:$0xff]  ;;  %v12040_v14 = vld [vmem:[#allocation106_spill] sm:$0xff] }
 0x26e   : > { %12022 = vst [vmem:[#allocation158_spill] sm:$0xff] %v9524_v16  ;;  %12023 = vst [vmem:[#allocation159_spill] sm:$0xff] %v9528_v24  ;;  %5435 = vrot.lane.b32.xlu1 %v9205_v39, %s7445_s20  ;;  %v9556_v61 = vpack.i.b16 %v1573_v27, %v1572_v9  ;;  %v3124_v0 = vcombine.low %v12036_v44, %v12035_v51  ;;  %v3184_v58 = vcombine.low %v12038_v42, %v12037_v34  ;;  %v12041_v4 = vld [vmem:[#allocation68_spill] sm:$0xff]  ;;  %v12042_v33 = vld [vmem:[#allocation59_spill] sm:$0xff] }
 0x26f   : > { %12024 = vst [vmem:[#allocation160_spill] sm:$0xff] %v9532_v49  ;;  %12025 = vst [vmem:[#allocation161_spill] sm:$0xff] %v9539_v8  ;;  %v3158_v29 = vcombine.low %v12040_v14, %v12039_v41  ;;  %v1485_v19 = vcombine.low %v12042_v33, %v12041_v4  ;;  %v9570_v27 = vpop.permute.xlu1 %5465  ;;  %v9575_v51 = vcombine.high %v9493_v35, %v11987_v12  ;;  %v12046_v42 = vld [vmem:[#allocation39_spill] sm:$0xff]  ;;  %v12047_v44 = vld [vmem:[#allocation8_spill] sm:$0xff] }
 0x270   : > { %12034 = vst [vmem:[#allocation113_spill] sm:$0xff] %v9552_v32  ;;  %5439 = vrot.lane.b32.xlu0 %v9223_v40, %s7445_s20  ;;  %12043 = vst [vmem:[#allocation37_spill] sm:$0xff] %v9570_v27  ;;  %v9579_v34 = vcombine.high %v9481_v47, %v11987_v12  ;;  %v3116_v41 = vcombine.low %v12047_v44, %v12046_v42  ;;  %v12048_v14 = vld [vmem:[#allocation42_spill] sm:$0xff]  ;;  %v12049_v4 = vld [vmem:[#allocation87_spill] sm:$0xff]  ;;  %v9588_v2 = vrot.slane %v3192_v25, %v11904_v50 }
 0x271   : > { %12044 = vst [vmem:[#allocation62_spill] sm:$0xff] %v9575_v51  ;;  %v3090_v33 = vcombine.low %v12049_v4, %v12048_v14  ;;  %v12050_v55 = vld [vmem:[#allocation108_spill] sm:$0xff]  ;;  %v12051_v40 = vld [vmem:[#allocation45_spill] sm:$0xff]  ;;  %v9591_v9 = vrot.slane %v1477_v18, %v11904_v50  ;;  %v9594_v11 = vrot.slane %v1511_v60, %v11904_v50  ;;  %v9597_v62 = vrot.slane %v1519_v20, %v11904_v50  ;;  %v12052_v8 = vld [vmem:[#allocation131_spill] sm:$0xff]  ;;  %v9601_v43 = vpop.permute.xlu0 %5469 }
 0x272   : > { %12045 = vst [vmem:[#allocation57_spill] sm:$0xff] %v9579_v34  ;;  %v3150_v39 = vcombine.low %v12051_v40, %v12050_v55  ;;  %v12053_v42 = vld [vmem:[#allocation127_spill] sm:$0xff]  ;;  %12054 = vst [vmem:[#allocation64_spill] sm:$0xff] %v9601_v43  ;;  %5443 = vrot.lane.b32.xlu1 %v9244_v5, %s7445_s20  ;;  %v12056_v25 = vld [vmem:[#allocation6_spill] sm:$0xff]  ;;  %v9608_v18 = vrot.slane %v3124_v0, %v11904_v50  ;;  %v9611_v60 = vrot.slane %v3184_v58, %v11904_v50 }
 0x273   : > { %v3656_v44 = vcombine.low %v12053_v42, %v12052_v8  ;;  %v12055_v40 = vld [vmem:[#allocation91_spill] sm:$0xff]  ;;  %v9614_v20 = vrot.slane %v3158_v29, %v11904_v50  ;;  %v9617_v14 = vrot.slane %v1485_v19, %v11904_v50  ;;  %v12058_v4 = vld [vmem:[#allocation77_spill] sm:$0xff]  ;;  %v12061_v63 = vld [vmem:[#allocation130_spill] sm:$0xff]  ;;  %v9627_v58 = vpop.permute.xlu1 %5473  ;;  %v9630_v29 = vrot.slane %v3116_v41, %v11904_v50 }
 0x274   : > { %v3082_v55 = vcombine.low %v12056_v25, %v12055_v40  ;;  %v12057_v8 = vld [vmem:[#allocation123_spill] sm:$0xff]  ;;  %v12059_v24 = vld [vmem:[#allocation129_spill] sm:$0xff]  ;;  %v12062_v40 = vld [vmem:[#allocation126_spill] sm:$0xff]  ;;  %5447 = vrot.lane.b32.xlu0 %v9263_v22, %s7445_s20  ;;  %12063 = vst [vmem:[#allocation58_spill] sm:$0xff] %v9627_v58  ;;  %v9633_v0 = vrot.slane %v3090_v33, %v11904_v50  ;;  %v9636_v19 = vrot.slane %v3150_v39, %v11904_v50 }
 0x275   : > { %v3588_v42 = vcombine.low %v12058_v4, %v12057_v8  ;;  %v12060_v5 = vld [vmem:[#allocation125_spill] sm:$0xff]  ;;  %v3622_v25 = vcombine.low %v12062_v40, %v12061_v63  ;;  %v12065_v8 = vld [vmem:[#allocation4_spill] sm:$0xff]  ;;  %v12066_v4 = vld [vmem:[#allocation122_spill] sm:$0xff]  ;;  %v9647_v41 = vrot.slane %v3656_v44, %v11904_v50  ;;  %v9649_v33 = vpop.permute.xlu0 %5477  ;;  %v1527_v39 = vcombine.low %v9594_v11, %v9597_v62 }
 0x276   : > { %v3648_v16 = vcombine.low %v12060_v5, %v12059_v24  ;;  %v3200_v5 = vcombine.low %v9611_v60, %v9588_v2  ;;  %v12064_v24 = vld [vmem:[#allocation120_spill] sm:$0xff]  ;;  %v12067_v40 = vld [vmem:[#allocation3_spill] sm:$0xff]  ;;  %5451 = vrot.lane.b32.xlu1 %v9285_v7, %s7445_s20  ;;  %v9656_v23 = vrot.slane %v3082_v55, %v11904_v50  ;;  %v1493_v30 = vcombine.low %v9591_v9, %v9617_v14 }
 0x277   : > { %v3580_v63 = vcombine.low %v12065_v8, %v12064_v24  ;;  %v3554_v22 = vcombine.low %v12067_v40, %v12066_v4  ;;  %v12068_v28 = vld [vmem:[#allocation128_spill] sm:$0xff]  ;;  %v3132_v24 = vcombine.low %v9630_v29, %v9608_v18  ;;  %v12071_v44 = vld [vmem:[#allocation115_spill] sm:$0xff]  ;;  %v9665_v4 = vrot.slane %v3588_v42, %v11904_v50  ;;  %v9675_v55 = vpop.permute.xlu1 %2988 }
 0x278   : > { %v3614_v27 = vcombine.low %v12069_v15, %v12068_v28  ;;  %v3166_v15 = vcombine.low %v9636_v19, %v9614_v20  ;;  %v12070_v28 = vld [vmem:[#allocation118_spill] sm:$0xff]  ;;  %v9668_v40 = vrot.slane %v3648_v16, %v11904_v50  ;;  %v9671_v7 = vrot.slane %v3622_v25, %v11904_v50  ;;  %5455 = vrot.lane.b32.xlu0 %v9310_v17, %s7445_s20 }
 0x279   : > { %v3546_v8 = vcombine.low %v12071_v44, %v12070_v28  ;;  %12072 = vst [vmem:[#allocation21_spill] sm:$0xff] %v9675_v55  ;;  %v3098_v28 = vcombine.low %v9656_v23, %v9633_v0  ;;  %v3208_v42 = vrot.slane %v3200_v5, %v11914_v36  ;;  %v9682_v44 = vpack.i.b16 %v1585_v37, %v1584_v38  ;;  %v9695_v49 = vpop.permute.xlu0 %2992 }
 0x27a   : > { %v9685_v16 = vrot.slane %v3580_v63, %v11904_v50  ;;  %v9688_v25 = vrot.slane %v3554_v22, %v11904_v50  ;;  %v9691_v17 = vrot.slane %v3614_v27, %v11904_v50  ;;  %v3664_v55 = vcombine.low %v9668_v40, %v9647_v41  ;;  %12074 = vst [vmem:[#allocation103_spill] sm:$0xff] %v9695_v49 }
 0x27b   : > { %12073 = vst [vmem:[#allocation60_spill] sm:$0xff] %v9682_v44  ;;  %5459 = vrot.lane.b32.xlu1 %v9333_v13, %s7445_s20  ;;  %v9700_v38 = vrot.slane %v1527_v39, %v11914_v36  ;;  %v9703_v37 = vrot.slane %v3132_v24, %v11914_v36  ;;  %v1590_v22 = vshrl.u32 %v9575_v51, 16  ;;  %v1591_v5 = vshrl.u32 %v9579_v34, 16  ;;  %v9717_v39 = vpop.permute.xlu1 %2996 }
 0x27c   : > { %v3174_v27 = vrot.slane %v3166_v15, %v11914_v36  ;;  %v9709_v63 = vrot.slane %v3546_v8, %v11904_v50  ;;  %v3596_v49 = vcombine.low %v9685_v16, %v9665_v4  ;;  %v3630_v13 = vcombine.low %v9691_v17, %v9671_v7  ;;  %5463 = vrot.lane.b32.xlu0 %v9354_v46, %s7445_s20 }
 0x27d   : > { %12075 = vst [vmem:[#allocation89_spill] sm:$0xff] %v9717_v39  ;;  %v1494_v24 = vcombine.high %v9591_v9, %v9617_v14  ;;  %v1501_v44 = vrot.slane %v1493_v30, %v11914_v36  ;;  %v1528_v15 = vcombine.high %v9594_v11, %v9597_v62  ;;  %v3106_v8 = vrot.slane %v3098_v28, %v11914_v36  ;;  %v9730_v43 = vpop.permute.xlu0 %3000 }
 0x27e   : > { %v3562_v58 = vcombine.low %v9709_v63, %v9688_v25  ;;  %v9728_v31 = vrot.slane %v3664_v55, %v11914_v36  ;;  %12076 = vst [vmem:[#allocation109_spill] sm:$0xff] %v9730_v43  ;;  %v3406_v46 = vshrl.u32 %v3208_v42, 16  ;;  %v12077_v9 = vshrl.u32 %v9497_v53, 16 }
 0x27f   : > { %5467 = vrot.lane.b32.xlu1 %v9375_v26, %s7445_s20  ;;  %v12078_v30 = vshrl.u32 %v9518_v59, 16  ;;  %v3358_v62 = vshrl.u32 %v9703_v37, 16  ;;  %v1621_v11 = vshrl.u32 %v9700_v38, 16  ;;  %v9744_v28 = vpack.i.b16 %v1591_v5, %v1590_v22 }
 0x280   : > { %v9747_v39 = vrot.slane %v3596_v49, %v11914_v36  ;;  %v9750_v26 = vrot.slane %v3630_v13, %v11914_v36  ;;  %5471 = vrot.lane.b32.xlu0 %v9395_v48, %s7445_s20  ;;  %v3405_v43 = vshrl.u32 %v3174_v27, 16  ;;  %v9760_v22 = vrot.slane %v1494_v24, %v11914_v36 }
 0x281   : > { %v9738_v14 = vpack.i.b16 %v12078_v30, %v12077_v9  ;;  %12080 = vst [vmem:[#allocation111_spill] sm:$0xff] %v9744_v28  ;;  %v9754_v9 = vpop.permute.xlu1 %3004  ;;  %v3404_v30 = vpack.i.b16 %v3208_v42, %v3174_v27  ;;  %v9763_v49 = vrot.slane %v1528_v15, %v11914_v36  ;;  %v3357_v5 = vshrl.u32 %v3106_v8, 16  ;;  %v9768_v48 = vpop.permute.xlu0 %3008 }
 0x282   : > { %12081 = vst [vmem:[#allocation106_spill] sm:$0xff] %v9754_v9  ;;  %v1620_v13 = vshrl.u32 %v1501_v44, 16  ;;  %v9766_v55 = vrot.slane %v3562_v58, %v11914_v36  ;;  %12082 = vst [vmem:[#allocation68_spill] sm:$0xff] %v9768_v48  ;;  %v3356_v9 = vpack.i.b16 %v9703_v37, %v3106_v8  ;;  %v3407_v28 = vpack.i.b16 %v3406_v46, %v3405_v43 }
 0x283   : > { %12079 = vst [vmem:[#allocation105_spill] sm:$0xff] %v9738_v14  ;;  %v7416_v14 = vld [vmem:[%s11421_s1 + $0x8] sm:$0x3f]   ;;  %5475 = vrot.lane.b32.xlu1 %v9412_v56, %s7445_s20  ;;  %v3870_v51 = vshrl.u32 %v9728_v31, 16  ;;  %v3359_v24 = vpack.i.b16 %v3358_v62, %v3357_v5  ;;  %v1619_v15 = vpack.i.b16 %v9700_v38, %v1501_v44  ;;  %v9779_v58 = vcombine.high %v1501_v44, %v11987_v12 }
 0x284   : > { %7367 = vmatprep.subr.msk.bf16.mxu0 %vm1971_vm3, %v7416_v14  ;;  %v9776_v34 = vpack.i.b16 %v1621_v11, %v1620_v13  ;;  %7368 = vmatprep.subr.msk.bf16.mxu1 %vm1971_vm3, %v7416_v14  ;;  %v6819_v46 = vcombine.low %v3356_v9, %v3404_v30  ;;  %v3868_v43 = vpack.i.b16 %v9728_v31, %v9750_v26  ;;  %v3822_v62 = vshrl.u32 %v9747_v39, 16 }
 0x285   : > { %5479 = vrot.lane.b32.xlu0 %v9428_v45, %s7445_s20  ;;  %v9784_v56 = vpop.permute.xlu1 %3012  ;;  %v3869_v5 = vshrl.u32 %v9750_v26, 16  ;;  %v3216_v11 = vcombine.high %v3208_v42, %v11987_v12  ;;  %v9793_v44 = vcombine.high %v9700_v38, %v11987_v12  ;;  %v1631_v13 = vpack.i.b16 %v9763_v49, %v9760_v22 }
 0x286   : > { %12083 = vst [vmem:[#allocation59_spill] sm:$0xff] %v9784_v56  ;;  %v4243_v45 = vsel %vm1971_vm3, %v7416_v14, 0  ;;  %v9798_v56 = vpop.permute.xlu0 %3016  ;;  %v6820_v9 = vcombine.low %v3359_v24, %v3407_v28  ;;  %v3820_v30 = vpack.i.b16 %v9747_v39, %v9766_v55  ;;  %v3821_v48 = vshrl.u32 %v9766_v55, 16 }
 0x287   : > { %12084 = vst [vmem:[#allocation39_spill] sm:$0xff] %v9798_v56  ;;  %4010 = vrot.lane.b32.xlu1 %v6819_v46, %s7463_s8  ;;  %v3871_v42 = vpack.i.b16 %v3870_v51, %v3869_v5  ;;  %7201 = vmatpush3.bf16.msra.mxu0 %v4243_v45  ;;  %v3148_v38 = vcombine.high %v9703_v37, %v11987_v12  ;;  %v1626_v46 = vshrl.u32 %v9779_v58, 16  ;;  %v1632_v37 = vshrl.u32 %v9760_v22, 16 }
 0x288   : > { %v3182_v10 = vcombine.high %v3174_v27, %v11987_v12  ;;  %v12085_v14 = vpack.i.b16 %v9458_v1, %v9449_v57  ;;  %7269 = vmatpush3.bf16.msra.mxu1 %v4243_v45  ;;  %v6835_v24 = vcombine.low %v3820_v30, %v3868_v43  ;;  %v3823_v51 = vpack.i.b16 %v3822_v62, %v3821_v48 }
 0x289   : > { %4012 = vrot.lane.b32.xlu0 %v6820_v9, %s7463_s8  ;;  %v9814_v28 = vpop.permute.xlu1 %3020  ;;  %v3114_v27 = vcombine.high %v3106_v8, %v11987_v12  ;;  %v3412_v56 = vshrl.u32 %v3216_v11, 16  ;;  %v1625_v57 = vpack.i.b16 %v9793_v44, %v9779_v58  ;;  %v1627_v1 = vshrl.u32 %v9793_v44, 16 }
 0x28a   : > { %v9810_v32 = vcombine.low %v12085_v14, %v1619_v15  ;;  %v9823_v45 = vpop.permute.xlu0 %3024  ;;  %v6836_v15 = vcombine.low %v3823_v51, %v3871_v42  ;;  %v3680_v48 = vcombine.high %v9728_v31, %v11987_v12  ;;  %v12086_v43 = vpack.i.b16 %v9481_v47, %v9493_v35 }
 0x28b   : > { %4090 = vrot.lane.b32.xlu1 %v6835_v24, %s7464_s11  ;;  %v1633_v8 = vshrl.u32 %v9763_v49, 16  ;;  %v3133_v58 = vcombine.high %v9630_v29, %v9608_v18  ;;  %v3201_v44 = vcombine.high %v9611_v60, %v9588_v2  ;;  %v3364_v9 = vshrl.u32 %v3148_v38, 16  ;;  %v12090_v24 = vld [vmem:[#allocation69_spill] sm:$0xff] }
 0x28c   : > { %v9831_v62 = vcombine.low %v12086_v43, %v1631_v13  ;;  %v3411_v30 = vshrl.u32 %v3182_v10, 16  ;;  %v3410_v31 = vpack.i.b16 %v3216_v11, %v3182_v10  ;;  %v3612_v47 = vcombine.high %v9747_v39, %v11987_v12  ;;  %v12087_v10 = vld [vmem:[#allocation18_spill] sm:$0xff] }
 0x28d   : > { %4092 = vrot.lane.b32.xlu0 %v6836_v15, %s7464_s11  ;;  %v9839_v42 = vpop.permute.xlu1 %3028  ;;  %v3646_v35 = vcombine.high %v9750_v26, %v11987_v12  ;;  %v9847_v13 = vcombine.high %v9760_v22, %v11987_v12  ;;  %v3099_v2 = vcombine.high %v9656_v23, %v9633_v0  ;;  %v3167_v18 = vcombine.high %v9636_v19, %v9614_v20 }
 0x28e   : > { %v3363_v60 = vshrl.u32 %v3114_v27, 16  ;;  %v3413_v29 = vpack.i.b16 %v3412_v56, %v3411_v30  ;;  %v9853_v14 = vpop.permute.xlu0 %3032  ;;  %v3362_v39 = vpack.i.b16 %v3148_v38, %v3114_v27  ;;  %v3578_v26 = vcombine.high %v9766_v55, %v11987_v12  ;;  %v12089_v38 = vld [vmem:[#allocation52_spill] sm:$0xff] }
 0x28f   : > { %1821 = vrot.lane.b32.xlu1 %v12087_v10, %s7464_s11  ;;  %v3876_v11 = vshrl.u32 %v3680_v48, 16  ;;  %v9861_v22 = vcombine.high %v9763_v49, %v11987_v12  ;;  %v3147_v23 = vrot.slane %v3133_v58, %v11914_v36  ;;  %v3215_v20 = vrot.slane %v3201_v44, %v11914_v36 }
 0x290   : > { %v3365_v0 = vpack.i.b16 %v3364_v9, %v3363_v60  ;;  %v12088_v56 = vpack.i.b16 %v9518_v59, %v9497_v53  ;;  %v12091_v51 = vcombine.low %v12089_v38, %v12090_v24  ;;  %v6821_v27 = vcombine.low %v3362_v39, %v3410_v31 }
 0x291   : > { %v9874_v55 = vpop.permute.xlu1 %3036  ;;  %v3874_v49 = vpack.i.b16 %v3680_v48, %v3646_v35  ;;  %v3828_v15 = vshrl.u32 %v3612_v47, 16  ;;  %v3875_v43 = vshrl.u32 %v3646_v35, 16  ;;  %v3113_v58 = vrot.slane %v3099_v2, %v11914_v36 }
 0x292   : > { %v9868_v19 = vcombine.low %v12088_v56, %v1625_v57  ;;  %1823 = vrot.lane.b32.xlu0 %v12091_v51, %s7464_s11  ;;  %v3181_v44 = vrot.slane %v3167_v18, %v11914_v36  ;;  %v6822_v9 = vcombine.low %v3365_v0, %v3413_v29  ;;  %v9878_v30 = vpack.i.b16 %v1627_v1, %v1626_v46  ;;  %v9882_v59 = vpop.permute.xlu0 %3040 }
 0x293   : > { %v3665_v53 = vcombine.high %v9668_v40, %v9647_v41  ;;  %4014 = vrot.lane.b32.xlu1 %v6821_v27, %s7463_s8  ;;  %v3826_v57 = vpack.i.b16 %v3612_v47, %v3578_v26  ;;  %v3827_v60 = vshrl.u32 %v3578_v26, 16  ;;  %v3877_v31 = vpack.i.b16 %v3876_v11, %v3875_v43 }
 0x294   : > { %v3563_v48 = vcombine.high %v9709_v63, %v9688_v25  ;;  %v3149_v35 = vcombine.high %v3147_v23, %v11987_v12  ;;  %v3217_v2 = vcombine.high %v3215_v20, %v11987_v12  ;;  %v9889_v18 = vpack.i.b16 %v1633_v8, %v1632_v37  ;;  %v12122_v37 = vld [vmem:[#allocation37_spill] sm:$0xff] }
 0x295   : > { %v3597_v46 = vcombine.high %v9685_v16, %v9665_v4  ;;  %v3631_v41 = vcombine.high %v9691_v17, %v9671_v7  ;;  %v9896_v40 = vpop.permute.xlu1 %3044  ;;  %v6837_v1 = vcombine.low %v3826_v57, %v3874_v49  ;;  %v3829_v47 = vpack.i.b16 %v3828_v15, %v3827_v60  ;;  %v12123_v60 = vld [vmem:[#allocation152_spill] sm:$0xff] }
 0x296   : > { %4016 = vrot.lane.b32.xlu0 %v6822_v9, %s7463_s8  ;;  %v3418_v29 = vshrl.u32 %v3215_v20, 16  ;;  %v3115_v25 = vcombine.high %v3113_v58, %v11987_v12  ;;  %v3183_v63 = vcombine.high %v3181_v44, %v11987_v12  ;;  %v3679_v8 = vrot.slane %v3665_v53, %v11914_v36  ;;  %v9903_v4 = vpop.permute.xlu0 %3048 }
 0x297   : > { %4094 = vrot.lane.b32.xlu1 %v6837_v1, %s7464_s11  ;;  %v6838_v7 = vcombine.low %v3829_v47, %v3877_v31  ;;  %v3369_v17 = vshrl.u32 %v3113_v58, 16  ;;  %v3370_v16 = vshrl.u32 %v3147_v23, 16  ;;  %v3416_v10 = vpack.i.b16 %v3215_v20, %v3181_v44  ;;  %v12093_v20 = vld [vmem:[#allocation23_spill] sm:$0xff] }
 0x298   : > { %v3417_v39 = vshrl.u32 %v3181_v44, 16  ;;  %v3376_v26 = vshrl.u32 %v3149_v35, 16  ;;  %v3424_v11 = vshrl.u32 %v3217_v2, 16  ;;  %v3577_v0 = vrot.slane %v3563_v48, %v11914_v36 }
 0x299   : > { %v3611_v56 = vrot.slane %v3597_v46, %v11914_v36  ;;  %v3645_v38 = vrot.slane %v3631_v41, %v11914_v36  ;;  %v9910_v24 = vpop.permute.xlu1 %3452  ;;  %v3368_v51 = vpack.i.b16 %v3147_v23, %v3113_v58  ;;  %v3422_v49 = vpack.i.b16 %v3217_v2, %v3183_v63  ;;  %v12094_v58 = vld [vmem:[#allocation51_spill] sm:$0xff] }
 0x29a   : > { %4096 = vrot.lane.b32.xlu0 %v6838_v7, %s7464_s11  ;;  %12092 = vst [vmem:[#allocation8_spill] sm:$0xff] %v9910_v24  ;;  %v3419_v27 = vpack.i.b16 %v3418_v29, %v3417_v39  ;;  %v3375_v15 = vshrl.u32 %v3115_v25, 16  ;;  %v3423_v43 = vshrl.u32 %v3183_v63, 16  ;;  %v9912_v9 = vpop.permute.xlu0 %3456  ;;  %v3371_v44 = vpack.i.b16 %v3370_v16, %v3369_v17  ;;  %v12095_v2 = vld [vmem:[#allocation75_spill] sm:$0xff] }
 0x29b   : > { %1825 = vrot.lane.b32.xlu1 %v12093_v20, %s7464_s11  ;;  %v3882_v53 = vshrl.u32 %v3679_v8, 16  ;;  %v6823_v31 = vcombine.low %v3368_v51, %v3416_v10  ;;  %v3374_v48 = vpack.i.b16 %v3149_v35, %v3115_v25  ;;  %v12096_v41 = vcombine.low %v12094_v58, %v12095_v2  ;;  %v12104_v58 = vld [vmem:[#allocation65_spill] sm:$0xff] }
 0x29c   : > { %v9918_v46 = vpack.i.b16 %v3376_v26, %v3375_v15  ;;  %v9920_v23 = vpack.i.b16 %v3424_v11, %v3423_v43  ;;  %v3880_v47 = vpack.i.b16 %v3679_v8, %v3645_v38  ;;  %v3834_v29 = vshrl.u32 %v3611_v56, 16  ;;  %v12098_v15 = vld [vmem:[#allocation78_spill] sm:$0xff] }
 0x29d   : > { %v9926_v1 = vpop.permute.xlu1 %3460  ;;  %v3881_v63 = vshrl.u32 %v3645_v38, 16  ;;  %v9929_v7 = vcombine.high %v3577_v0, %v11987_v12  ;;  %v5159_v35 = vcombine.low %v9214_v21, %v9300_v54  ;;  %v6824_v25 = vcombine.low %v3371_v44, %v3419_v27  ;;  %v12099_v43 = vld [vmem:[#allocation46_spill] sm:$0xff]  ;;  %v12100_v21 = vld [vmem:[#allocation73_spill] sm:$0xff]  ;;  %v12101_v27 = vld [vmem:[#allocation71_spill] sm:$0xff] }
 0x29e   : > { %1827 = vrot.lane.b32.xlu0 %v12096_v41, %s7464_s11  ;;  %12097 = vst [vmem:[#allocation42_spill] sm:$0xff] %v9926_v1  ;;  %v3833_v17 = vshrl.u32 %v3577_v0, 16  ;;  %v9933_v16 = vcombine.low %v3374_v48, %v3422_v49  ;;  %v9935_v10 = vpop.permute.xlu0 %3464  ;;  %v3832_v39 = vpack.i.b16 %v3611_v56, %v3577_v0  ;;  %v9939_v11 = vcombine.high %v3611_v56, %v11987_v12  ;;  %v12103_v48 = vld [vmem:[#allocation14_spill] sm:$0xff]  ;;  %v12106_v41 = vld [vmem:[#allocation43_spill] sm:$0xff] }
 0x29f   : > { %4018 = vrot.lane.b32.xlu1 %v6823_v31, %s7463_s8  ;;  %v3883_v26 = vpack.i.b16 %v3882_v53, %v3881_v63  ;;  %v9942_v51 = vcombine.high %v3645_v38, %v11987_v12  ;;  %v5091_v20 = vcombine.low %v12099_v43, %v12098_v15  ;;  %v5151_v54 = vcombine.low %v12100_v21, %v9254_v6  ;;  %v12105_v6 = vld [vmem:[#allocation40_spill] sm:$0xff]  ;;  %v12109_v21 = vld [vmem:[#allocation38_spill] sm:$0xff] }
 0x2a0   : > { %v5125_v49 = vcombine.low %v12101_v27, %v9278_v52  ;;  %v6839_v56 = vcombine.low %v3832_v39, %v3880_v47  ;;  %v3835_v53 = vpack.i.b16 %v3834_v29, %v3833_v17  ;;  %v3681_v38 = vcombine.high %v3679_v8, %v11987_v12  ;;  %v12107_v52 = vld [vmem:[#allocation12_spill] sm:$0xff] }
 0x2a1   : > { %v9953_v0 = vpop.permute.xlu1 %3468  ;;  %v3839_v31 = vshrl.u32 %v9929_v7, 16  ;;  %v5083_v2 = vcombine.low %v12104_v58, %v12103_v48  ;;  %v5057_v63 = vcombine.low %v12106_v41, %v12105_v6  ;;  %v5117_v15 = vcombine.low %v12107_v52, %v9239_v3  ;;  %v12110_v27 = vld [vmem:[#allocation132_spill] sm:$0xff]  ;;  %v12112_v6 = vld [vmem:[#allocation90_spill] sm:$0xff] }
 0x2a2   : > { %4020 = vrot.lane.b32.xlu0 %v6824_v25, %s7463_s8  ;;  %12102 = vst [vmem:[#allocation87_spill] sm:$0xff] %v9953_v0  ;;  %v9964_v43 = vrot.slane %v5159_v35, %v11904_v50  ;;  %v12108_v25 = vld [vmem:[#allocation113_spill] sm:$0xff]  ;;  %v9968_v29 = vpop.permute.xlu0 %3472  ;;  %v6840_v8 = vcombine.low %v3835_v53, %v3883_v26  ;;  %v3840_v17 = vshrl.u32 %v9939_v11, 16  ;;  %v3887_v39 = vshrl.u32 %v9942_v51, 16  ;;  %v12111_v58 = vld [vmem:[#allocation148_spill] sm:$0xff]  ;;  %v12115_v52 = vld [vmem:[#allocation58_spill] sm:$0xff] }
 0x2a3   : > { %v5623_v47 = vcombine.low %v12108_v25, %v9649_v33  ;;  %4098 = vrot.lane.b32.xlu1 %v6839_v56, %s7464_s11  ;;  %v5049_v48 = vcombine.low %v12110_v27, %v12109_v21  ;;  %v9976_v3 = vrot.slane %v5091_v20, %v11904_v50  ;;  %v9979_v35 = vrot.slane %v5151_v54, %v11904_v50  ;;  %v12113_v26 = vld [vmem:[#allocation64_spill] sm:$0xff]  ;;  %v12114_v53 = vld [vmem:[#allocation153_spill] sm:$0xff] }
 0x2a4   : > { %v9982_v33 = vrot.slane %v5125_v49, %v11904_v50  ;;  %v5555_v56 = vcombine.low %v12112_v6, %v12111_v58  ;;  %v5615_v41 = vcombine.low %v12114_v53, %v12113_v26  ;;  %v12116_v25 = vld [vmem:[#allocation160_spill] sm:$0xff]  ;;  %v3888_v20 = vshrl.u32 %v3681_v38, 16  ;;  %v12119_v26 = vld [vmem:[#allocation55_spill] sm:$0xff] }
 0x2a5   : > { %v5589_v5 = vcombine.low %v12116_v25, %v12115_v52  ;;  %v9991_v21 = vpop.permute.xlu1 %3476  ;;  %v9994_v54 = vrot.slane %v5083_v2, %v11904_v50  ;;  %v5064_v49 = vrot.slane %v5057_v63, %v11904_v50  ;;  %v9998_v27 = vrot.slane %v5117_v15, %v11904_v50  ;;  %v12118_v6 = vld [vmem:[#allocation84_spill] sm:$0xff]  ;;  %v12124_v63 = vld [vmem:[#allocation79_spill] sm:$0xff] }
 0x2a6   : > { %4100 = vrot.lane.b32.xlu0 %v6840_v8, %s7464_s11  ;;  %12117 = vst [vmem:[#allocation108_spill] sm:$0xff] %v9991_v21  ;;  %v5167_v58 = vcombine.low %v9979_v35, %v9964_v43  ;;  %v5547_v53 = vcombine.low %v12119_v26, %v12118_v6  ;;  %v12120_v52 = vld [vmem:[#allocation144_spill] sm:$0xff]  ;;  %v5581_v57 = vcombine.low %v12123_v60, %v12122_v37  ;;  %v10011_v44 = vpop.permute.xlu0 %3480  ;;  %v12126_v37 = vld [vmem:[#allocation94_spill] sm:$0xff] }
 0x2a7   : > { %v12121_v25 = vld [vmem:[#allocation56_spill] sm:$0xff]  ;;  %v10009_v2 = vrot.slane %v5623_v47, %v11904_v50  ;;  %1829 = vrot.lane.b32.xlu1 %v12124_v63, %s7464_s11  ;;  %v5056_v15 = vrot.slane %v5049_v48, %v11904_v50  ;;  %v5099_v24 = vcombine.low %v9994_v54, %v9976_v3  ;;  %v5133_v6 = vcombine.low %v9998_v27, %v9982_v33  ;;  %v12127_v48 = vld [vmem:[#allocation53_spill] sm:$0xff] }
 0x2a8   : > { %v5521_v8 = vcombine.low %v12121_v25, %v12120_v52  ;;  %v3886_v26 = vpack.i.b16 %v3681_v38, %v9942_v51  ;;  %v12125_v52 = vld [vmem:[#allocation95_spill] sm:$0xff]  ;;  %v10024_v47 = vrot.slane %v5555_v56, %v11904_v50  ;;  %v10027_v25 = vrot.slane %v5615_v41, %v11904_v50  ;;  %v12128_v0 = vld [vmem:[#allocation80_spill] sm:$0xff] }
 0x2a9   : > { %v5513_v60 = vcombine.low %v12126_v37, %v12125_v52  ;;  %v10030_v63 = vrot.slane %v5589_v5, %v11904_v50  ;;  %v12129_v1 = vcombine.low %v12127_v48, %v12128_v0  ;;  %v10036_v21 = vpop.permute.xlu1 %3484  ;;  %v5065_v51 = vcombine.low %v5056_v15, %v5064_v49 }
 0x2aa   : > { %12130 = vst [vmem:[#allocation45_spill] sm:$0xff] %v10036_v21  ;;  %v10039_v38 = vrot.slane %v5167_v58, %v11914_v36  ;;  %v3838_v56 = vpack.i.b16 %v9939_v11, %v9929_v7  ;;  %v3889_v52 = vpack.i.b16 %v3888_v20, %v3887_v39  ;;  %v10044_v41 = vrot.slane %v5547_v53, %v11904_v50  ;;  %v10054_v0 = vpop.permute.xlu0 %3488  ;;  %v12141_v21 = vld [vmem:[#allocation57_spill] sm:$0xff] }
 0x2ab   : > { %1831 = vrot.lane.b32.xlu0 %v12129_v1, %s7464_s11  ;;  %v10047_v5 = vrot.slane %v5521_v8, %v11904_v50  ;;  %v10050_v37 = vrot.slane %v5581_v57, %v11904_v50  ;;  %v5631_v1 = vcombine.low %v10027_v25, %v10009_v2  ;;  %12131 = vst [vmem:[#allocation131_spill] sm:$0xff] %v10054_v0 }
 0x2ac   : > { %4022 = vrot.lane.b32.xlu1 %v9933_v16, %s7463_s8  ;;  %v5066_v58 = vcombine.high %v5056_v15, %v5064_v49  ;;  %v5107_v7 = vrot.slane %v5099_v24, %v11914_v36  ;;  %v6841_v11 = vcombine.low %v3838_v56, %v3886_v26  ;;  %v3841_v39 = vpack.i.b16 %v3840_v17, %v3839_v31  ;;  %v12134_v17 = vld [vmem:[#allocation105_spill] sm:$0xff] }
 0x2ad   : > { %v5141_v20 = vrot.slane %v5133_v6, %v11914_v36  ;;  %v10061_v53 = vrot.slane %v5513_v60, %v11904_v50  ;;  %v5563_v57 = vcombine.low %v10044_v41, %v10024_v47  ;;  %v5597_v8 = vcombine.low %v10050_v37, %v10030_v63  ;;  %v10071_v49 = vpop.permute.xlu1 %3492 }
 0x2ae   : > { %v12132_v16 = vcombine.low %v9918_v46, %v9920_v23  ;;  %12133 = vst [vmem:[#allocation127_spill] sm:$0xff] %v10071_v49  ;;  %v5073_v24 = vrot.slane %v5065_v51, %v11914_v36  ;;  %v5100_v31 = vcombine.high %v9994_v54, %v9976_v3  ;;  %v12135_v6 = vshrl.u32 %v9847_v13, 16  ;;  %v10087_v46 = vld [vmem:[%s11421_s1 + $0x10] sm:$0x3f]   ;;  %v10094_v3 = vpop.permute.xlu0 %3496 }
 0x2af   : > { %v12136_v26 = vshrl.u32 %v9861_v22, 16  ;;  %12138 = vst [vmem:[#allocation6_spill] sm:$0xff] %v10087_v46  ;;  %v5529_v23 = vcombine.low %v10061_v53, %v10047_v5  ;;  %v10092_v48 = vrot.slane %v5631_v1, %v11914_v36  ;;  %v6842_v54 = vcombine.low %v3841_v39, %v3889_v52  ;;  %v12142_v1 = vld [vmem:[#allocation62_spill] sm:$0xff]  ;;  %7369 = vmatprep.subr.msk.bf16.mxu0 %vm1971_vm3, %v10087_v46 }
 0x2b0   : > { %4024 = vrot.lane.b32.xlu0 %v12132_v16, %s7463_s8  ;;  %4102 = vrot.lane.b32.xlu1 %v6841_v11, %s7464_s11  ;;  %v5373_v51 = vshrl.u32 %v10039_v38, 16  ;;  %v10099_v56 = vrot.slane %v5066_v58, %v11914_v36  ;;  %v5325_v16 = vshrl.u32 %v5107_v7, 16  ;;  %v12140_v15 = vpack.i.b16 %v9861_v22, %v9847_v13 }
 0x2b1   : > { %v10082_v60 = vpack.i.b16 %v12136_v26, %v12135_v6  ;;  %v12139_v6 = vld [vmem:[#allocation60_spill] sm:$0xff]  ;;  %v12143_v49 = vpack.i.b16 %v12141_v21, %v12142_v1  ;;  %v5571_v52 = vrot.slane %v5563_v57, %v11914_v36  ;;  %v5605_v58 = vrot.slane %v5597_v8, %v11914_v36  ;;  %v10116_v11 = vpop.permute.xlu1 %3500 }
 0x2b2   : > { %12145 = vst [vmem:[#allocation77_spill] sm:$0xff] %v10116_v11  ;;  %v5371_v39 = vpack.i.b16 %v10039_v38, %v5141_v20  ;;  %v5372_v26 = vshrl.u32 %v5141_v20, 16  ;;  %v10120_v13 = vrot.slane %v5100_v31, %v11914_v36  ;;  %v5134_v22 = vcombine.high %v9998_v27, %v9982_v33  ;;  %v10127_v8 = vpop.permute.xlu0 %3504 }
 0x2b3   : > { %12137 = vst [vmem:[#allocation91_spill] sm:$0xff] %v10082_v60  ;;  %v10109_v0 = vcombine.low %v12143_v49, %v12140_v15  ;;  %v5324_v21 = vshrl.u32 %v5073_v24, 16  ;;  %v5537_v57 = vrot.slane %v5529_v23, %v11914_v36  ;;  %v5837_v46 = vshrl.u32 %v10092_v48, 16 }
 0x2b4   : > { %4104 = vrot.lane.b32.xlu0 %v6842_v54, %s7464_s11  ;;  %1833 = vrot.lane.b32.xlu1 %v9810_v32, %s7464_s11  ;;  %v5323_v54 = vpack.i.b16 %v5107_v7, %v5073_v24  ;;  %v5374_v1 = vpack.i.b16 %v5373_v51, %v5372_v26  ;;  %v5168_v31 = vcombine.high %v9979_v35, %v9964_v43  ;;  %v5789_v15 = vshrl.u32 %v5571_v52, 16 }
 0x2b5   : > { %12144 = vst [vmem:[#allocation123_spill] sm:$0xff] %v10109_v0  ;;  %v5326_v0 = vpack.i.b16 %v5325_v16, %v5324_v21  ;;  %v5081_v33 = vcombine.high %v5073_v24, %v11987_v12  ;;  %v10137_v27 = vcombine.high %v10099_v56, %v11987_v12  ;;  %v12147_v23 = vcombine.low %v9556_v61, %v9776_v34  ;;  %v10143_v32 = vpop.permute.xlu1 %3508 }
 0x2b6   : > { %12148 = vst [vmem:[#allocation129_spill] sm:$0xff] %v10143_v32  ;;  %v6902_v51 = vcombine.low %v5323_v54, %v5371_v39  ;;  %v5835_v26 = vpack.i.b16 %v10092_v48, %v5605_v58  ;;  %v5836_v60 = vshrl.u32 %v5605_v58, 16  ;;  %v10147_v43 = vrot.slane %v5134_v22, %v11914_v36  ;;  %v10153_v21 = vpop.permute.xlu0 %3512 }
 0x2b7   : > { %v5115_v35 = vcombine.high %v5107_v7, %v11987_v12  ;;  %v5149_v24 = vcombine.high %v5141_v20, %v11987_v12  ;;  %v5183_v16 = vcombine.high %v10039_v38, %v11987_v12  ;;  %v6903_v61 = vcombine.low %v5326_v0, %v5374_v1 }
 0x2b8   : > { %1835 = vrot.lane.b32.xlu0 %v12147_v23, %s7464_s11  ;;  %5977 = vrot.lane.b32.xlu1 %v6902_v51, %s7463_s8  ;;  %v5787_v34 = vpack.i.b16 %v5571_v52, %v5537_v57  ;;  %v5788_v39 = vshrl.u32 %v5537_v57, 16  ;;  %v5838_v54 = vpack.i.b16 %v5837_v46, %v5836_v60  ;;  %v10157_v23 = vrot.slane %v5168_v31, %v11914_v36 }
 0x2b9   : > { %v5330_v22 = vshrl.u32 %v5081_v33, 16  ;;  %v5336_v20 = vshrl.u32 %v10099_v56, 16  ;;  %v10163_v38 = vpop.permute.xlu1 %4955  ;;  %v5337_v0 = vshrl.u32 %v10120_v13, 16  ;;  %v10168_v60 = vcombine.high %v10120_v13, %v11987_v12 }
 0x2ba   : > { %12149 = vst [vmem:[#allocation125_spill] sm:$0xff] %v10163_v38  ;;  %v6918_v49 = vcombine.low %v5787_v34, %v5835_v26  ;;  %v5790_v11 = vpack.i.b16 %v5789_v15, %v5788_v39  ;;  %v5329_v46 = vpack.i.b16 %v5115_v35, %v5081_v33  ;;  %v5331_v1 = vshrl.u32 %v5115_v35, 16  ;;  %v10171_v7 = vpop.permute.xlu0 %4959 }
 0x2bb   : > { %v5379_v31 = vshrl.u32 %v5183_v16, 16  ;;  %v5342_v51 = vshrl.u32 %v10137_v27, 16  ;;  %12150 = vst [vmem:[#allocation130_spill] sm:$0xff] %v10171_v7  ;;  %v5378_v32 = vshrl.u32 %v5149_v24, 16  ;;  %v5647_v15 = vcombine.high %v10092_v48, %v11987_v12 }
 0x2bc   : > { %5979 = vrot.lane.b32.xlu0 %v6903_v61, %s7463_s8  ;;  %6057 = vrot.lane.b32.xlu1 %v6918_v49, %s7464_s11  ;;  %v6919_v61 = vcombine.low %v5790_v11, %v5838_v54  ;;  %v5150_v26 = vcombine.high %v10147_v43, %v11987_v12  ;;  %v5564_v34 = vcombine.high %v10044_v41, %v10024_v47  ;;  %v5385_v35 = vshrl.u32 %v10157_v23, 16 }
 0x2bd   : > { %v5377_v33 = vpack.i.b16 %v5183_v16, %v5149_v24  ;;  %v5184_v39 = vcombine.high %v10157_v23, %v11987_v12  ;;  %v10184_v49 = vpop.permute.xlu1 %4963  ;;  %v5579_v11 = vcombine.high %v5571_v52, %v11987_v12  ;;  %v5613_v48 = vcombine.high %v5605_v58, %v11987_v12 }
 0x2be   : > { %v10188_v54 = vpack.i.b16 %v5337_v0, %v5336_v20  ;;  %v5343_v38 = vshrl.u32 %v10168_v60, 16  ;;  %v5530_v47 = vcombine.high %v10061_v53, %v10047_v5  ;;  %v5332_v41 = vpack.i.b16 %v5331_v1, %v5330_v22  ;;  %v10194_v7 = vpop.permute.xlu0 %4967 }
 0x2bf   : > { %v5380_v24 = vpack.i.b16 %v5379_v31, %v5378_v32  ;;  %v5384_v16 = vshrl.u32 %v10147_v43, 16  ;;  %v5545_v52 = vcombine.high %v5537_v57, %v11987_v12  ;;  %v5383_v58 = vpack.i.b16 %v10157_v23, %v10147_v43 }
 0x2c0   : > { %6059 = vrot.lane.b32.xlu0 %v6919_v61, %s7464_s11  ;;  %1837 = vrot.lane.b32.xlu1 %v9868_v19, %s7464_s11  ;;  %v5843_v61 = vshrl.u32 %v5647_v15, 16  ;;  %v5390_v20 = vshrl.u32 %v5150_v26, 16  ;;  %v10202_v0 = vrot.slane %v5564_v34, %v11914_v36  ;;  %v6904_v5 = vcombine.low %v5329_v46, %v5377_v33 }
 0x2c1   : > { %v10204_v53 = vpack.i.b16 %v5385_v35, %v5384_v16  ;;  %v5391_v32 = vshrl.u32 %v5184_v39, 16  ;;  %v5632_v22 = vcombine.high %v10027_v25, %v10009_v2  ;;  %v12151_v19 = vcombine.low %v12134_v17, %v9878_v30  ;;  %v10212_v57 = vpop.permute.xlu1 %4971  ;;  %v12152_v35 = vld [vmem:[#allocation39_spill] sm:$0xff]  ;;  %v12153_v2 = vld [vmem:[#allocation109_spill] sm:$0xff] }
 0x2c2   : > { %v5841_v1 = vpack.i.b16 %v5647_v15, %v5613_v48  ;;  %v5795_v43 = vshrl.u32 %v5579_v11, 16  ;;  %v5842_v23 = vshrl.u32 %v5613_v48, 16  ;;  %v10215_v31 = vrot.slane %v5530_v47, %v11914_v36  ;;  %v10221_v16 = vpop.permute.xlu0 %4975 }
 0x2c3   : > { %v5598_v46 = vcombine.high %v10050_v37, %v10030_v63  ;;  %v6905_v34 = vcombine.low %v5332_v41, %v5380_v24  ;;  %v5389_v33 = vpack.i.b16 %v5184_v39, %v5150_v26  ;;  %v3260_v25 = vcombine.low %v12153_v2, %v12152_v35  ;;  %v12154_v26 = vld [vmem:[#allocation68_spill] sm:$0xff]  ;;  %v12155_v39 = vld [vmem:[#allocation103_spill] sm:$0xff]  ;;  %v12163_v35 = vld [vmem:[#allocation21_spill] sm:$0xff] }
 0x2c4   : > { %1839 = vrot.lane.b32.xlu0 %v12151_v19, %s7464_s11  ;;  %5981 = vrot.lane.b32.xlu1 %v6904_v5, %s7463_s8  ;;  %v5793_v30 = vpack.i.b16 %v5579_v11, %v5545_v52  ;;  %v5794_v17 = vshrl.u32 %v5545_v52, 16  ;;  %v5844_v15 = vpack.i.b16 %v5843_v61, %v5842_v23  ;;  %v5341_v48 = vpack.i.b16 %v10168_v60, %v10137_v27  ;;  %v10243_v60 = vpop.f32.mrb[0].mxu1  ;;  %v12158_v5 = vld [vmem:[#allocation59_spill] sm:$0xff] }
 0x2c5   : > { %v10226_v47 = vpack.i.b16 %v5343_v38, %v5342_v51  ;;  %v10228_v19 = vpack.i.b16 %v5391_v32, %v5390_v20  ;;  %v10232_v63 = vcombine.high %v10202_v0, %v11987_v12  ;;  %v10235_v37 = vrot.slane %v5632_v22, %v11914_v36  ;;  %v10240_v11 = vpop.permute.xlu1 %4979  ;;  %12156 = vst [vmem:[#allocation126_spill] sm:$0xff] %v10243_v60  ;;  %v12159_v32 = vld [vmem:[#allocation89_spill] sm:$0xff] }
 0x2c6   : > { %v3252_v41 = vcombine.low %v12155_v39, %v12154_v26  ;;  %v6920_v24 = vcombine.low %v5793_v30, %v5841_v1  ;;  %v5796_v27 = vpack.i.b16 %v5795_v43, %v5794_v17  ;;  %v5612_v38 = vrot.slane %v5598_v46, %v11914_v36  ;;  %v10257_v1 = vpop.permute.xlu0 %4983  ;;  %v10259_v43 = vpop.f32.mrb[1].mxu1 }
 0x2c7   : > { %v12157_v51 = vpack.i.b16 %v10120_v13, %v10099_v56  ;;  %v6907_v61 = vcombine.low %v10188_v54, %v10204_v53  ;;  %v10250_v20 = vcombine.low %v5341_v48, %v5389_v33  ;;  %v3226_v22 = vcombine.low %v12159_v32, %v12158_v5  ;;  %12160 = vst [vmem:[#allocation120_spill] sm:$0xff] %v10259_v43  ;;  %v10266_v54 = vpop.f32.mrb[2].mxu1  ;;  %v12162_v33 = vld [vmem:[#allocation106_spill] sm:$0xff] }
 0x2c8   : > { %5983 = vrot.lane.b32.xlu0 %v6905_v34, %s7463_s8  ;;  %v10255_v23 = vrot.slane %v3260_v25, %v11904_v50  ;;  %6061 = vrot.lane.b32.xlu1 %v6920_v24, %s7464_s11  ;;  %v6921_v46 = vcombine.low %v5796_v27, %v5844_v15  ;;  %v5546_v56 = vcombine.high %v10215_v31, %v11987_v12  ;;  %v5801_v53 = vshrl.u32 %v10202_v0, 16  ;;  %v10277_v30 = vpop.f32.mrb[3].mxu1 }
 0x2c9   : > { %v6906_v52 = vcombine.low %v12157_v51, %v5383_v58  ;;  %v3328_v13 = vcombine.low %v9853_v14, %v9903_v4  ;;  %12161 = vst [vmem:[#allocation4_spill] sm:$0xff] %v10266_v54  ;;  %v5800_v58 = vshrl.u32 %v10215_v31, 16  ;;  %v6909_v34 = vcombine.low %v10226_v47, %v10228_v19  ;;  %12164 = vst [vmem:[#allocation122_spill] sm:$0xff] %v10277_v30  ;;  %v10280_v14 = vpop.permute.xlu1 %4987  ;;  %v12200_v54 = vld [vmem:[#allocation88_spill] sm:$0xff] }
 0x2ca   : > { %v3218_v2 = vcombine.low %v12163_v35, %v12162_v33  ;;  %v10275_v25 = vrot.slane %v3252_v41, %v11904_v50  ;;  %v5849_v4 = vshrl.u32 %v10235_v37, 16  ;;  %v5807_v17 = vshrl.u32 %v10232_v63, 16  ;;  %v10296_v27 = vpop.permute.xlu0 %4991 }
 0x2cb   : > { %v3320_v15 = vcombine.low %v9823_v45, %v9882_v59  ;;  %v5799_v48 = vpack.i.b16 %v10202_v0, %v10215_v31  ;;  %v5614_v26 = vcombine.high %v5612_v38, %v11987_v12  ;;  %v5648_v39 = vcombine.high %v10235_v37, %v11987_v12 }
 0x2cc   : > { %6063 = vrot.lane.b32.xlu0 %v6921_v46, %s7464_s11  ;;  %v10292_v41 = vrot.slane %v3226_v22, %v11904_v50  ;;  %v3268_v24 = vcombine.low %v10275_v25, %v10255_v23  ;;  %1841 = vrot.lane.b32.xlu1 %v9831_v62, %s7464_s11  ;;  %v5848_v45 = vshrl.u32 %v5612_v38, 16  ;;  %v5806_v59 = vshrl.u32 %v5546_v56, 16 }
 0x2cd   : > { %v3294_v0 = vcombine.low %v9839_v42, %v9896_v40  ;;  %v10303_v31 = vrot.slane %v3328_v13, %v11904_v50  ;;  %v5847_v51 = vpack.i.b16 %v10235_v37, %v5612_v38  ;;  %v5802_v5 = vpack.i.b16 %v5801_v53, %v5800_v58  ;;  %v4996_v62 = vpop.permute.xlu1 %4995 }
 0x2ce   : > { %v10307_v32 = vrot.slane %v3218_v2, %v11904_v50  ;;  %v12165_v22 = vcombine.low %v12139_v6, %v9889_v18  ;;  %v5850_v46 = vpack.i.b16 %v5849_v4, %v5848_v45  ;;  %v5805_v33 = vpack.i.b16 %v10232_v63, %v5546_v56  ;;  %v5000_v63 = vpop.permute.xlu0 %4999  ;;  %v12166_v4 = vld [vmem:[#allocation131_spill] sm:$0xff]  ;;  %v12170_v45 = vld [vmem:[#allocation42_spill] sm:$0xff] }
 0x2cf   : > { %v10314_v35 = vpack.i.b16 %v5807_v17, %v5806_v59  ;;  %v3286_v42 = vcombine.low %v9814_v28, %v9874_v55  ;;  %v10319_v40 = vrot.slane %v3320_v15, %v11904_v50  ;;  %v5853_v37 = vpack.i.b16 %v5648_v39, %v5614_v26  ;;  %v12168_v17 = vld [vmem:[#allocation127_spill] sm:$0xff] }
 0x2d0   : > { %1843 = vrot.lane.b32.xlu0 %v12165_v22, %s7464_s11  ;;  %v5854_v38 = vshrl.u32 %v5614_v26, 16  ;;  %v3234_v13 = vcombine.low %v10307_v32, %v10292_v41  ;;  %v10324_v18 = vrot.slane %v3268_v24, %v11914_v36  ;;  %v3792_v6 = vcombine.low %v10094_v3, %v10153_v21  ;;  %5985 = vrot.lane.b32.xlu1 %v6906_v52, %s7463_s8  ;;  %v12167_v21 = vld [vmem:[#allocation129_spill] sm:$0xff]  ;;  %v12169_v24 = vld [vmem:[#allocation108_spill] sm:$0xff] }
 0x2d1   : > { %v5855_v56 = vshrl.u32 %v5648_v39, 16  ;;  %v10330_v28 = vrot.slane %v3294_v0, %v11904_v50  ;;  %v3336_v55 = vcombine.low %v10319_v40, %v10303_v31  ;;  %v3724_v58 = vcombine.low %v9935_v10, %v10011_v44  ;;  %v5004_v15 = vpop.permute.xlu1 %5003  ;;  %v12171_v44 = vld [vmem:[#allocation77_spill] sm:$0xff] }
 0x2d2   : > { %v6922_v53 = vcombine.low %v5799_v48, %v5847_v51  ;;  %v3716_v2 = vcombine.low %v9912_v9, %v9968_v29  ;;  %v3784_v3 = vcombine.low %v12166_v4, %v10127_v8  ;;  %v3758_v52 = vcombine.low %v12168_v17, %v12167_v21  ;;  %v12172_v48 = vld [vmem:[#allocation45_spill] sm:$0xff]  ;;  %v12180_v21 = vld [vmem:[#allocation130_spill] sm:$0xff] }
 0x2d3   : > { %v6923_v26 = vcombine.low %v5802_v5, %v5850_v46  ;;  %v10344_v39 = vrot.slane %v3286_v42, %v11904_v50  ;;  %v3690_v10 = vcombine.low %v12170_v45, %v12169_v24  ;;  %v3750_v59 = vcombine.low %v12172_v48, %v12171_v44  ;;  %v12174_v46 = vld [vmem:[#allocation87_spill] sm:$0xff] }
 0x2d4   : > { %5987 = vrot.lane.b32.xlu0 %v6907_v61, %s7463_s8  ;;  %v10350_v9 = vcombine.low %v5805_v33, %v5853_v37  ;;  %v10353_v29 = vrot.slane %v3234_v13, %v11914_v36  ;;  %v10356_v8 = vrot.slane %v3792_v6, %v11904_v50  ;;  %v5008_v61 = vpop.permute.xlu0 %5007  ;;  %6065 = vrot.lane.b32.xlu1 %v6922_v53, %s7464_s11  ;;  %v3382_v51 = vshrl.u32 %v10324_v18, 16  ;;  %v12175_v33 = vld [vmem:[#allocation8_spill] sm:$0xff]  ;;  %v12187_v44 = vld [vmem:[#allocation91_spill] sm:$0xff] }
 0x2d5   : > { %v10359_v0 = vpack.i.b16 %v5855_v56, %v5854_v38  ;;  %v3302_v5 = vcombine.low %v10344_v39, %v10330_v28  ;;  %v10365_v22 = vrot.slane %v3336_v55, %v11914_v36  ;;  %v3682_v42 = vcombine.low %v12175_v33, %v12174_v46  ;;  %v5012_v55 = vpop.permute.xlu1 %5011 }
 0x2d6   : > { %12173 = vst [vmem:[#allocation3_spill] sm:$0xff] %v10356_v8  ;;  %v10370_v37 = vrot.slane %v3724_v58, %v11904_v50  ;;  %v10373_v13 = vrot.slane %v3716_v2, %v11904_v50  ;;  %v10376_v38 = vrot.slane %v3784_v3, %v11904_v50  ;;  %v10379_v6 = vrot.slane %v3758_v52, %v11904_v50 }
 0x2d7   : > { %v5227_v56 = vcombine.low %v10194_v7, %v10257_v1  ;;  %v10385_v53 = vrot.slane %v3690_v10, %v11904_v50  ;;  %v10388_v58 = vrot.slane %v3750_v59, %v11904_v50  ;;  %v5287_v2 = vcombine.low %v10296_v27, %v5008_v61  ;;  %v12186_v10 = vld [vmem:[#allocation111_spill] sm:$0xff] }
 0x2d8   : > { %12176 = vst [vmem:[#allocation128_spill] sm:$0xff] %v10376_v38  ;;  %12177 = vst [vmem:[#allocation124_spill] sm:$0xff] %v10379_v6  ;;  %6067 = vrot.lane.b32.xlu0 %v6923_v26, %s7464_s11  ;;  %v5261_v4 = vcombine.low %v4996_v62, %v5012_v55  ;;  %v3800_v3 = vcombine.low %v10376_v38, %v10356_v8  ;;  %v5219_v17 = vcombine.low %v12180_v21, %v10221_v16  ;;  %v5016_v52 = vpop.permute.xlu0 %5015  ;;  %v12181_v26 = vld [vmem:[#allocation123_spill] sm:$0xff] }
 0x2d9   : > { %12178 = vst [vmem:[#allocation118_spill] sm:$0xff] %v10385_v53  ;;  %12179 = vst [vmem:[#allocation115_spill] sm:$0xff] %v10388_v58  ;;  %v5193_v7 = vcombine.low %v10184_v49, %v10240_v11  ;;  %v5253_v1 = vcombine.low %v10280_v14, %v5004_v15  ;;  %1845 = vrot.lane.b32.xlu1 %v12181_v26, %s7464_s11  ;;  %v10401_v24 = vrot.slane %v3302_v5, %v11914_v36  ;;  %v12183_v49 = vld [vmem:[#allocation125_spill] sm:$0xff]  ;;  %v10422_v59 = vpop.permute.xlu1 %5419 }
 0x2da   : > { %v10404_v27 = vrot.slane %v3682_v42, %v11904_v50  ;;  %v3732_v62 = vcombine.low %v10373_v13, %v10370_v37  ;;  %v5295_v45 = vcombine.low %v5000_v63, %v5016_v52  ;;  %v3766_v16 = vcombine.low %v10388_v58, %v10379_v6 }
 0x2db   : > { %v5185_v11 = vcombine.low %v12183_v49, %v10212_v57  ;;  %v10413_v14 = vrot.slane %v5227_v56, %v11904_v50  ;;  %v10416_v15 = vrot.slane %v5261_v4, %v11904_v50  ;;  %v12188_v48 = vcombine.low %v12186_v10, %v12187_v44 }
 0x2dc   : > { %12182 = vst [vmem:[#allocation18_spill] sm:$0xff] %v10404_v27  ;;  %v3698_v63 = vcombine.low %v10404_v27, %v10385_v53  ;;  %v10427_v61 = vrot.slane %v5287_v2, %v11904_v50  ;;  %v10430_v57 = vrot.slane %v5295_v45, %v11904_v50  ;;  %v3430_v5 = vshrl.u32 %v10365_v22, 16  ;;  %v10445_v55 = vpop.permute.xlu0 %5423 }
 0x2dd   : > { %12184 = vst [vmem:[#allocation52_spill] sm:$0xff] %v10413_v14  ;;  %12185 = vst [vmem:[#allocation69_spill] sm:$0xff] %v10416_v15  ;;  %1847 = vrot.lane.b32.xlu0 %v12188_v48, %s7464_s11  ;;  %v10434_v46 = vrot.slane %v3800_v3, %v11914_v36  ;;  %v10437_v33 = vrot.slane %v5219_v17, %v11904_v50  ;;  %v10440_v42 = vrot.slane %v5193_v7, %v11904_v50  ;;  %v10471_v52 = vpop.permute.xlu1 %5427 }
 0x2de   : > { %12189 = vst [vmem:[#allocation23_spill] sm:$0xff] %v10427_v61  ;;  %12190 = vst [vmem:[#allocation51_spill] sm:$0xff] %v10430_v57  ;;  %v10443_v56 = vrot.slane %v5253_v1, %v11904_v50  ;;  %5989 = vrot.lane.b32.xlu1 %v10250_v20, %s7463_s8  ;;  %v10450_v2 = vrot.slane %v3732_v62, %v11914_v36  ;;  %v5303_v4 = vcombine.low %v10427_v61, %v10430_v57 }
 0x2df   : > { %12191 = vst [vmem:[#allocation75_spill] sm:$0xff] %v10437_v33  ;;  %12192 = vst [vmem:[#allocation78_spill] sm:$0xff] %v10440_v42  ;;  %v3428_v3 = vpack.i.b16 %v10365_v22, %v10401_v24  ;;  %v3429_v21 = vshrl.u32 %v10401_v24, 16  ;;  %v10458_v17 = vrot.slane %v3766_v16, %v11914_v36  ;;  %v10461_v7 = vrot.slane %v5185_v11, %v11904_v50 }
 0x2e0   : > { %12193 = vst [vmem:[#allocation46_spill] sm:$0xff] %v10443_v56  ;;  %v5235_v20 = vcombine.low %v10437_v33, %v10413_v14  ;;  %v5269_v1 = vcombine.low %v10443_v56, %v10416_v15  ;;  %v10474_v26 = vrot.slane %v3698_v63, %v11914_v36  ;;  %v3380_v62 = vpack.i.b16 %v10324_v18, %v10353_v29  ;;  %v10484_v10 = vpop.permute.xlu0 %5431  ;;  %v12195_v63 = vld [vmem:[#allocation155_spill] sm:$0xff] }
 0x2e1   : > { %12194 = vst [vmem:[#allocation73_spill] sm:$0xff] %v10461_v7  ;;  %5991 = vrot.lane.b32.xlu0 %v6909_v34, %s7463_s8  ;;  %v3381_v45 = vshrl.u32 %v10353_v29, 16  ;;  %v3431_v16 = vpack.i.b16 %v3430_v5, %v3429_v21  ;;  %v5201_v49 = vcombine.low %v10461_v7, %v10440_v42  ;;  %v10482_v11 = vrot.slane %v5303_v4, %v11914_v36  ;;  %v12202_v42 = vld [vmem:[#allocation159_spill] sm:$0xff] }
 0x2e2   : > { %6069 = vrot.lane.b32.xlu1 %v10350_v9, %s7464_s11  ;;  %v6925_v47 = vcombine.low %v10314_v35, %v10359_v0  ;;  %v3894_v19 = vshrl.u32 %v10434_v46, 16  ;;  %v6827_v34 = vcombine.low %v3380_v62, %v3428_v3  ;;  %v3846_v48 = vshrl.u32 %v10450_v2, 16  ;;  %v10500_v9 = vpop.permute.xlu1 %5435  ;;  %v12197_v62 = vld [vmem:[#allocation156_spill] sm:$0xff] }
 0x2e3   : > { %v3383_v44 = vpack.i.b16 %v3382_v51, %v3381_v45  ;;  %v2900_v5 = vshrl.u32 %v12195_v63, 16  ;;  %v10494_v21 = vrot.slane %v5235_v20, %v11914_v36  ;;  %v10497_v4 = vrot.slane %v5269_v1, %v11914_v36  ;;  %v12198_v45 = vld [vmem:[#allocation158_spill] sm:$0xff]  ;;  %v12199_v20 = vld [vmem:[#allocation133_spill] sm:$0xff] }
 0x2e4   : > { %v3892_v35 = vpack.i.b16 %v10434_v46, %v10458_v17  ;;  %v3893_v0 = vshrl.u32 %v10458_v17, 16  ;;  %v3845_v3 = vshrl.u32 %v10474_v26, 16  ;;  %v2946_v30 = vpack.i.b16 %v12198_v45, %v12197_v62  ;;  %v10514_v60 = vpop.permute.xlu0 %5439 }
 0x2e5   : > { %12196 = vst [vmem:[#allocation71_spill] sm:$0xff] %v10497_v4  ;;  %6071 = vrot.lane.b32.xlu0 %v6925_v47, %s7464_s11  ;;  %v6828_v51 = vcombine.low %v3383_v44, %v3431_v16  ;;  %v2952_v43 = vpack.i.b16 %v12200_v54, %v12199_v20  ;;  %v10511_v1 = vrot.slane %v5201_v49, %v11914_v36  ;;  %v5397_v47 = vshrl.u32 %v10482_v11, 16 }
 0x2e6   : > { %4026 = vrot.lane.b32.xlu1 %v6827_v34, %s7463_s8  ;;  %v3844_v16 = vpack.i.b16 %v10450_v2, %v10474_v26  ;;  %v3895_v44 = vpack.i.b16 %v3894_v19, %v3893_v0  ;;  %v3847_v7 = vpack.i.b16 %v3846_v48, %v3845_v3  ;;  %v2898_v56 = vpack.i.b16 %v12195_v63, %v12202_v42  ;;  %v10526_v14 = vpop.permute.xlu1 %5443  ;;  %v12203_v0 = vld [vmem:[#allocation13_spill] sm:$0xff] }
 0x2e7   : > { %12201 = vst [vmem:[#allocation14_spill] sm:$0xff] %v10511_v1  ;;  %v2948_v15 = vshrl.u32 %v12198_v45, 16  ;;  %v2753_v49 = vcombine.high %v12200_v54, %v11987_v12  ;;  %v5396_v33 = vshrl.u32 %v10497_v4, 16  ;;  %v5395_v61 = vpack.i.b16 %v10482_v11, %v10497_v4 }
 0x2e8   : > { %v6843_v34 = vcombine.low %v3844_v16, %v3892_v35  ;;  %v5349_v19 = vshrl.u32 %v10494_v21, 16  ;;  %v2947_v48 = vshrl.u32 %v12197_v62, 16  ;;  %v2954_v63 = vshrl.u32 %v12200_v54, 16  ;;  %v5448_v57 = vpop.permute.xlu0 %5447 }
 0x2e9   : > { %4028 = vrot.lane.b32.xlu0 %v6828_v51, %s7463_s8  ;;  %v2685_v3 = vcombine.high %v12203_v0, %v11987_v12  ;;  %v2719_v45 = vcombine.high %v12199_v20, %v11987_v12  ;;  %v6844_v51 = vcombine.low %v3847_v7, %v3895_v44  ;;  %v5347_v35 = vpack.i.b16 %v10494_v21, %v10511_v1  ;;  %v12204_v44 = vld [vmem:[#allocation86_spill] sm:$0xff] }
 0x2ea   : > { %4106 = vrot.lane.b32.xlu1 %v6843_v34, %s7464_s11  ;;  %v5348_v16 = vshrl.u32 %v10511_v1, 16  ;;  %v5398_v58 = vpack.i.b16 %v5397_v47, %v5396_v33  ;;  %v10541_v6 = vpack.i.b16 %v2948_v15, %v2947_v48  ;;  %v2899_v54 = vshrl.u32 %v12202_v42, 16  ;;  %v10547_v53 = vpop.permute.xlu1 %5451  ;;  %v12205_v1 = vld [vmem:[#allocation157_spill] sm:$0xff] }
 0x2eb   : > { %v2906_v62 = vshrl.u32 %v12203_v0, 16  ;;  %v2953_v27 = vshrl.u32 %v12199_v20, 16  ;;  %v6910_v34 = vcombine.low %v5347_v35, %v5395_v61  ;;  %v2651_v38 = vcombine.high %v12204_v44, %v11987_v12  ;;  %v12206_v33 = vld [vmem:[#allocation161_spill] sm:$0xff] }
 0x2ec   : > { %v5350_v7 = vpack.i.b16 %v5349_v19, %v5348_v16  ;;  %v2960_v8 = vshrl.u32 %v2753_v49, 16  ;;  %v2904_v42 = vpack.i.b16 %v12203_v0, %v12204_v44  ;;  %v2905_v20 = vshrl.u32 %v12204_v44, 16  ;;  %v10558_v48 = vpop.permute.xlu0 %5455 }
 0x2ed   : > { %4108 = vrot.lane.b32.xlu0 %v6844_v51, %s7464_s11  ;;  %v10555_v47 = vpack.i.b16 %v2954_v63, %v2953_v27  ;;  %v10561_v19 = vpack.i.b16 %v2900_v5, %v2899_v54  ;;  %v2912_v51 = vshrl.u32 %v2685_v3, 16  ;;  %v2959_v35 = vshrl.u32 %v2719_v45, 16  ;;  %v12208_v5 = vld [vmem:[#allocation149_spill] sm:$0xff]  ;;  %v12209_v54 = vld [vmem:[#allocation150_spill] sm:$0xff] }
 0x2ee   : > { %5993 = vrot.lane.b32.xlu1 %v6910_v34, %s7463_s8  ;;  %v6911_v61 = vcombine.low %v5350_v7, %v5398_v58  ;;  %v10563_v16 = vcombine.low %v2898_v56, %v2946_v30  ;;  %v10565_v4 = vcombine.low %v2904_v42, %v2952_v43  ;;  %v10567_v15 = vpack.i.b16 %v2906_v62, %v2905_v20  ;;  %v5460_v27 = vpop.permute.xlu1 %5459  ;;  %v12210_v56 = vld [vmem:[#allocation146_spill] sm:$0xff]  ;;  %v12212_v20 = vld [vmem:[#allocation145_spill] sm:$0xff] }
 0x2ef   : > { %v2958_v0 = vpack.i.b16 %v2753_v49, %v2719_v45  ;;  %v10572_v44 = vpack.i.b16 %v2960_v8, %v2959_v35  ;;  %v2911_v58 = vshrl.u32 %v2651_v38, 16  ;;  %v4907_v34 = vpack.i.b16 %v12209_v54, %v12208_v5  ;;  %v12219_v63 = vld [vmem:[#allocation25_spill] sm:$0xff] }
 0x2f0   : > { %v2910_v43 = vpack.i.b16 %v2685_v3, %v2651_v38  ;;  %v4861_v62 = vshrl.u32 %v12210_v56, 16  ;;  %v4909_v49 = vshrl.u32 %v12209_v54, 16  ;;  %v3235_v45 = vcombine.high %v10307_v32, %v10292_v41  ;;  %v5464_v42 = vpop.permute.xlu0 %5463 }
 0x2f1   : > { %5995 = vrot.lane.b32.xlu0 %v6911_v61, %s7463_s8  ;;  %12207 = vst [vmem:[#allocation65_spill] sm:$0xff] %v10572_v44  ;;  %v5691_v7 = vcombine.low %v10484_v10, %v5448_v57  ;;  %v10583_v8 = vpack.i.b16 %v2912_v51, %v2911_v58  ;;  %v4859_v61 = vpack.i.b16 %v12210_v56, %v12212_v20  ;;  %v4860_v38 = vshrl.u32 %v12212_v20, 16  ;;  %v12215_v58 = vld [vmem:[#allocation19_spill] sm:$0xff]  ;;  %v12224_v10 = vld [vmem:[#allocation136_spill] sm:$0xff]  ;;  %v12240_v44 = vld [vmem:[#allocation6_spill] sm:$0xff] }
 0x2f2   : > { %v3269_v35 = vcombine.high %v10275_v25, %v10255_v23  ;;  %v10589_v30 = vcombine.low %v2910_v43, %v2958_v0  ;;  %v4908_v3 = vshrl.u32 %v12208_v5, 16  ;;  %v5683_v41 = vcombine.low %v10445_v55, %v10514_v60  ;;  %v5468_v57 = vpop.permute.xlu1 %5467  ;;  %v12216_v23 = vld [vmem:[#allocation24_spill] sm:$0xff]  ;;  %v12217_v0 = vld [vmem:[#allocation22_spill] sm:$0xff]  ;;  %v12218_v43 = vld [vmem:[#allocation17_spill] sm:$0xff] }
 0x2f3   : > { %12211 = vst [vmem:[#allocation40_spill] sm:$0xff] %v10583_v8  ;;  %v5657_v32 = vcombine.low %v10471_v52, %v10526_v14  ;;  %v10599_v51 = vcombine.low %v4859_v61, %v4907_v34  ;;  %v10604_v25 = vsel %vm1849_vm7, %v12216_v23, %v12215_v58  ;;  %v12220_v5 = vcombine.low %v12218_v43, %v12219_v63  ;;  %v12223_v52 = vld [vmem:[#allocation96_spill] sm:$0xff]  ;;  %v12226_v23 = vld [vmem:[#allocation26_spill] sm:$0xff] }
 0x2f4   : > { %12213 = vst [vmem:[#allocation43_spill] sm:$0xff] %v10589_v30  ;;  %v10613_v55 = vpack.i.b16 %v4861_v62, %v4860_v38  ;;  %v10615_v14 = vpack.i.b16 %v4909_v49, %v4908_v3  ;;  %v10620_v34 = vsel %vm1849_vm7, %v12224_v10, %v12223_v52  ;;  %v10623_v61 = vrot.slane %v3235_v45, %v11914_v36  ;;  %v12227_v62 = vld [vmem:[#allocation31_spill] sm:$0xff]  ;;  %v12228_v38 = vld [vmem:[#allocation97_spill] sm:$0xff]  ;;  %v12229_v3 = vld [vmem:[#allocation30_spill] sm:$0xff] }
 0x2f5   : > { %12214 = vst [vmem:[#allocation12_spill] sm:$0xff] %v10599_v51  ;;  %v10611_v60 = vsel %vm1849_vm7, %v12220_v5, %v12217_v0  ;;  %12225 = vst [vmem:[#allocation132_spill] sm:$0xff] %v10620_v34  ;;  %v5649_v58 = vcombine.low %v10422_v59, %v10500_v9  ;;  %v10628_v63 = vrot.slane %v5691_v7, %v11904_v50  ;;  %v5472_v5 = vpop.permute.xlu0 %5471  ;;  %v12230_v0 = vld [vmem:[#allocation32_spill] sm:$0xff] }
 0x2f6   : > { %12221 = vst [vmem:[#allocation113_spill] sm:$0xff] %v10613_v55  ;;  %12222 = vst [vmem:[#allocation38_spill] sm:$0xff] %v10615_v14  ;;  %v10633_v49 = vsel %vm1849_vm7, %v12227_v62, %v12226_v23  ;;  %v12231_v10 = vcombine.low %v12229_v3, %v12230_v0  ;;  %v10643_v45 = vrot.slane %v3269_v35, %v11914_v36  ;;  %v5476_v23 = vpop.permute.xlu1 %5475  ;;  %v12233_v3 = vld [vmem:[#allocation33_spill] sm:$0xff]  ;;  %v12236_v0 = vld [vmem:[#allocation35_spill] sm:$0xff] }
 0x2f7   : > { %v5717_v59 = vcombine.low %v10547_v53, %v5468_v57  ;;  %v3303_v9 = vcombine.high %v10344_v39, %v10330_v28  ;;  %v10649_v7 = vrot.slane %v5683_v41, %v11904_v50  ;;  %v10652_v52 = vrot.slane %v5657_v32, %v11904_v50  ;;  %v12234_v53 = vld [vmem:[#allocation99_spill] sm:$0xff]  ;;  %v12235_v57 = vld [vmem:[#allocation34_spill] sm:$0xff] }
 0x2f8   : > { %v10640_v43 = vsel %vm1849_vm7, %v12231_v10, %v12228_v38  ;;  %v10656_v62 = vcombine.high %v10324_v18, %v11987_v12  ;;  %v12232_v38 = vld [vmem:[#allocation98_spill] sm:$0xff]  ;;  %v12237_v28 = vcombine.low %v12235_v57, %v12236_v0  ;;  %v5751_v41 = vcombine.low %v10558_v48, %v5472_v5 }
 0x2f9   : > { %v10661_v35 = vsel %vm1849_vm7, %v12233_v3, %v12232_v38  ;;  %v5725_v32 = vcombine.low %v5460_v27, %v5476_v23  ;;  %v10672_v10 = vrot.slane %v5649_v58, %v11904_v50  ;;  %v5699_v18 = vcombine.low %v10649_v7, %v10628_v63  ;;  %v5480_v56 = vpop.permute.xlu0 %5479  ;;  %v12239_v14 = vld [vmem:[#allocation154_spill] sm:$0xff] }
 0x2fa   : > { %v10668_v39 = vsel %vm1849_vm7, %v12237_v28, %v12234_v53  ;;  %v10678_v38 = vcombine.high %v10353_v29, %v11987_v12  ;;  %v3393_v3 = vshrl.u32 %v10623_v61, 16  ;;  %v3337_v53 = vcombine.high %v10319_v40, %v10303_v31  ;;  %v4011_v29 = vpop.permute.xlu1 %4010 }
 0x2fb   : > { %v10684_v57 = vrot.slane %v5717_v59, %v11904_v50  ;;  %v10687_v48 = vrot.slane %v5725_v32, %v11904_v50  ;;  %v5759_v27 = vcombine.low %v5464_v42, %v5480_v56  ;;  %v10690_v58 = vrot.slane %v3303_v9, %v11914_v36 }
 0x2fc   : > { %v5665_v5 = vcombine.low %v10672_v10, %v10652_v52  ;;  %v3388_v23 = vshrl.u32 %v10656_v62, 16  ;;  %v3394_v0 = vshrl.u32 %v10643_v45, 16  ;;  %v10697_v31 = vrot.slane %v5751_v41, %v11904_v50 }
 0x2fd   : > { %v5733_v40 = vcombine.low %v10684_v57, %v10687_v48  ;;  %v10702_v59 = vrot.slane %v5759_v27, %v11904_v50  ;;  %v10706_v56 = vcombine.high %v10365_v22, %v11987_v12  ;;  %v10709_v42 = vrot.slane %v5699_v18, %v11914_v36  ;;  %v4013_v9 = vpop.permute.xlu0 %4012 }
 0x2fe   : > { %v3387_v28 = vshrl.u32 %v10678_v38, 16  ;;  %v10716_v32 = vcombine.high %v10643_v45, %v11987_v12  ;;  %v10719_v27 = vrot.slane %v3337_v53, %v11914_v36  ;;  %v3318_v18 = vcombine.high %v10401_v24, %v11987_v12  ;;  %v4091_v54 = vpop.permute.xlu1 %4090 }
 0x2ff   : > { %v5767_v22 = vcombine.low %v10697_v31, %v10702_v59  ;;  %v3386_v50 = vpack.i.b16 %v10656_v62, %v10678_v38  ;;  %v10728_v51 = vrot.slane %v5665_v5, %v11914_v36  ;;  %v10731_v41 = vrot.slane %v5733_v40, %v11914_v36 }
 0x300   : > { %12238 = vst [vmem:[#allocation148_spill] sm:$0xff] %v10716_v32  ;;  %v10733_v55 = vpack.i.b16 %v3388_v23, %v3387_v28  ;;  %v10735_v53 = vpack.i.b16 %v3394_v0, %v3393_v3  ;;  %v4124_v20 = vsel %vm1849_vm7, %v12239_v14, %v4011_v29  ;;  %v3436_v34 = vshrl.u32 %v10706_v56, 16 }
 0x301   : > { %v3441_v24 = vshrl.u32 %v10690_v58, 16  ;;  %v6210_v62 = vsel %vm1971_vm3, %v12240_v44, 0  ;;  %v5813_v38 = vshrl.u32 %v10709_v42, 16  ;;  %v5775_v5 = vrot.slane %v5767_v22, %v11914_v36  ;;  %v4093_v0 = vpop.permute.xlu0 %4092 }
 0x302   : > { %v12241_v23 = vcombine.low %v12206_v33, %v12205_v1  ;;  %v4171_v40 = vsel %vm1898_vm8, %v4124_v20, %v4091_v54  ;;  %v3435_v29 = vshrl.u32 %v3318_v18, 16  ;;  %v10754_v44 = vcombine.high %v10434_v46, %v11987_v12 }
 0x303   : > { %7202 = vmatprep.mubr.msk.bf16.mxu0 %vm1938_vm9, %v4171_v40  ;;  %v3442_v28 = vshrl.u32 %v10719_v27, 16  ;;  %v5812_v22 = vshrl.u32 %v10728_v51, 16  ;;  %v5860_v1 = vshrl.u32 %v10731_v41, 16  ;;  %v5861_v33 = vshrl.u32 %v5775_v5, 16 }
 0x304   : > { %v4127_v3 = vsel %vm1849_vm7, %v12241_v23, %v4013_v9  ;;  %v1822_v9 = vpop.permute.xlu1 %1821  ;;  %v3748_v54 = vcombine.high %v10450_v2, %v11987_v12  ;;  %v5811_v46 = vpack.i.b16 %v10709_v42, %v10728_v51  ;;  %v5859_v23 = vpack.i.b16 %v5775_v5, %v10731_v41 }
 0x305   : > { %v4173_v14 = vsel %vm1898_vm8, %v4127_v3, %v4093_v0  ;;  %v1904_v20 = vsel %vm1898_vm8, %v10633_v49, %v1822_v9  ;;  %v3782_v3 = vcombine.high %v10458_v17, %v11987_v12  ;;  %v1824_v0 = vpop.permute.xlu0 %1823  ;;  %v5814_v40 = vpack.i.b16 %v5813_v38, %v5812_v22  ;;  %v12242_v22 = vld [vmem:[#allocation71_spill] sm:$0xff] }
 0x306   : > { %7203 = vmatmul.mubr.msk.bf16.vlgmr.msra.gmra.mrb[0].mxu0 %vm1938_vm9, %v4173_v14  ;;  %7172 = vmatprep.mubr.msk.bf16.mxu1 %vm1938_vm9, %v1904_v20  ;;  %v5862_v14 = vpack.i.b16 %v5861_v33, %v5860_v1  ;;  %v3434_v8 = vpack.i.b16 %v10706_v56, %v3318_v18  ;;  %v3437_v2 = vpack.i.b16 %v3436_v34, %v3435_v29  ;;  %v3900_v32 = vshrl.u32 %v10754_v44, 16 }
 0x307   : > { %7235 = vmatpush3.bf16.msra.mxu0 %v6210_v62  ;;  %v1906_v49 = vsel %vm1898_vm8, %v10640_v43, %v1824_v0  ;;  %v6926_v9 = vcombine.low %v5811_v46, %v5859_v23  ;;  %v3714_v30 = vcombine.high %v10474_v26, %v11987_v12  ;;  %v10778_v17 = vcombine.high %v10482_v11, %v11987_v12 }
 0x308   : > { %7173 = vmatmul.mubr.msk.bf16.gmra.mrb[4].mxu1 %vm1938_vm9, %v1906_v49  ;;  %v4015_v62 = vpop.permute.xlu1 %4014  ;;  %v6927_v38 = vcombine.low %v5814_v40, %v5862_v14  ;;  %v3440_v34 = vpack.i.b16 %v10719_v27, %v10690_v58  ;;  %v10785_v43 = vcombine.high %v10690_v58, %v11987_v12  ;;  %v3852_v26 = vshrl.u32 %v3748_v54, 16 }
 0x309   : > { %6073 = vrot.lane.b32.xlu1 %v6926_v9, %s7464_s11  ;;  %v3899_v56 = vshrl.u32 %v3782_v3, 16  ;;  %v5251_v18 = vcombine.high %v10494_v21, %v11987_v12  ;;  %v10790_v11 = vpack.i.b16 %v3442_v28, %v3441_v24  ;;  %v3733_v29 = vcombine.high %v10373_v13, %v10370_v37  ;;  %v4017_v33 = vpop.permute.xlu0 %4016  ;;  %v12243_v13 = vld [vmem:[#allocation14_spill] sm:$0xff]  ;;  %v12244_v9 = vld [vmem:[#allocation3_spill] sm:$0xff] }
 0x30a   : > { %v5285_v1 = vcombine.high %v12242_v22, %v11987_v12  ;;  %6075 = vrot.lane.b32.xlu0 %v6927_v38, %s7464_s11  ;;  %v6829_v20 = vcombine.low %v3386_v50, %v3434_v8  ;;  %v6830_v46 = vcombine.low %v10733_v55, %v3437_v2  ;;  %v3850_v23 = vpack.i.b16 %v3748_v54, %v3714_v30  ;;  %v12245_v50 = vld [vmem:[#allocation128_spill] sm:$0xff] }
 0x30b   : > { %v3898_v0 = vpack.i.b16 %v10754_v44, %v3782_v3  ;;  %v3851_v40 = vshrl.u32 %v3714_v30, 16  ;;  %v3901_v14 = vpack.i.b16 %v3900_v32, %v3899_v56  ;;  %v5783_v21 = vcombine.high %v5775_v5, %v11987_v12 }
 0x30c   : > { %v4130_v24 = vsel %vm1849_vm7, %v10563_v16, %v4015_v62  ;;  %v4095_v37 = vpop.permute.xlu1 %4094  ;;  %v5217_v28 = vcombine.high %v12243_v13, %v11987_v12  ;;  %v5403_v49 = vshrl.u32 %v10778_v17, 16  ;;  %v3801_v8 = vcombine.high %v12245_v50, %v12244_v9 }
 0x30d   : > { %4030 = vrot.lane.b32.xlu1 %v6829_v20, %s7463_s8  ;;  %v4175_v55 = vsel %vm1898_vm8, %v4130_v24, %v4095_v37  ;;  %v3853_v30 = vpack.i.b16 %v3852_v26, %v3851_v40  ;;  %v5355_v32 = vshrl.u32 %v5251_v18, 16  ;;  %v5715_v5 = vcombine.high %v10709_v42, %v11987_v12  ;;  %v4097_v3 = vpop.permute.xlu0 %4096  ;;  %v12248_v20 = vld [vmem:[#allocation18_spill] sm:$0xff]  ;;  %v12249_v40 = vld [vmem:[#allocation124_spill] sm:$0xff]  ;;  %v12250_v24 = vld [vmem:[#allocation115_spill] sm:$0xff] }
 0x30e   : > { %v5749_v16 = vcombine.high %v10731_v41, %v11987_v12  ;;  %v12246_v44 = vcombine.low %v10561_v19, %v10541_v6  ;;  %4032 = vrot.lane.b32.xlu0 %v6830_v46, %s7463_s8  ;;  %7206 = vmatprep.mubr.msk.bf16.mxu0 %vm1938_vm9, %v4175_v55  ;;  %v5402_v2 = vshrl.u32 %v5285_v1, 16  ;;  %v6845_v38 = vcombine.low %v3850_v23, %v3898_v0 }
 0x30f   : > { %v6846_v26 = vcombine.low %v3853_v30, %v3901_v14  ;;  %v5401_v42 = vpack.i.b16 %v10778_v17, %v5285_v1  ;;  %v5681_v41 = vcombine.high %v10728_v51, %v11987_v12  ;;  %v5354_v6 = vshrl.u32 %v5217_v28, 16 }
 0x310   : > { %v4133_v54 = vsel %vm1849_vm7, %v12246_v44, %v4017_v33  ;;  %v1826_v56 = vpop.permute.xlu1 %1825  ;;  %v5404_v19 = vpack.i.b16 %v5403_v49, %v5402_v2  ;;  %v5867_v22 = vshrl.u32 %v5783_v21, 16  ;;  %v12247_v33 = vld [vmem:[#allocation118_spill] sm:$0xff]  ;;  %v3767_v37 = vcombine.high %v12250_v24, %v12249_v40 }
 0x311   : > { %v4177_v62 = vsel %vm1898_vm8, %v4133_v54, %v4097_v3  ;;  %v3699_v46 = vcombine.high %v12248_v20, %v12247_v33  ;;  %4110 = vrot.lane.b32.xlu1 %v6845_v38, %s7464_s11  ;;  %v1908_v17 = vsel %vm1898_vm8, %v10604_v25, %v1826_v56  ;;  %v5353_v1 = vpack.i.b16 %v5251_v18, %v5217_v28  ;;  %v1828_v23 = vpop.permute.xlu0 %1827  ;;  %v12251_v18 = vld [vmem:[#allocation51_spill] sm:$0xff]  ;;  %v12253_v3 = vld [vmem:[#allocation52_spill] sm:$0xff]  ;;  %v12256_v38 = vld [vmem:[#allocation46_spill] sm:$0xff] }
 0x312   : > { %7207 = vmatmul.mubr.msk.bf16.gmra.mrb[4].mxu0 %vm1938_vm9, %v4177_v62  ;;  %v10832_v51 = vrot.slane %v3733_v29, %v11914_v36  ;;  %4112 = vrot.lane.b32.xlu0 %v6846_v26, %s7464_s11  ;;  %v5356_v0 = vpack.i.b16 %v5355_v32, %v5354_v6  ;;  %v5819_v14 = vshrl.u32 %v5715_v5, 16  ;;  %v5866_v13 = vshrl.u32 %v5749_v16, 16  ;;  %v12252_v28 = vld [vmem:[#allocation23_spill] sm:$0xff]  ;;  %v12255_v62 = vld [vmem:[#allocation69_spill] sm:$0xff] }
 0x313   : > { %7176 = vmatprep.mubr.msk.bf16.mxu1 %vm1938_vm9, %v1908_v17  ;;  %v10837_v49 = vrot.slane %v3801_v8, %v11914_v36  ;;  %v1910_v9 = vsel %vm1898_vm8, %v10611_v60, %v1828_v23  ;;  %v6912_v50 = vcombine.low %v5353_v1, %v5401_v42  ;;  %v5865_v25 = vpack.i.b16 %v5783_v21, %v5749_v16  ;;  %v12254_v8 = vld [vmem:[#allocation75_spill] sm:$0xff]  ;;  %v12259_v33 = vld [vmem:[#allocation73_spill] sm:$0xff] }
 0x314   : > { %v5304_v29 = vcombine.high %v12252_v28, %v12251_v18  ;;  %7177 = vmatmul.mubr.msk.bf16.gmra.mrb[8].mxu1 %vm1938_vm9, %v1910_v9  ;;  %v4019_v55 = vpop.permute.xlu1 %4018  ;;  %v6913_v30 = vcombine.low %v5356_v0, %v5404_v19  ;;  %v5818_v44 = vshrl.u32 %v5681_v41, 16  ;;  %v5868_v54 = vpack.i.b16 %v5867_v22, %v5866_v13  ;;  %v12258_v22 = vld [vmem:[#allocation78_spill] sm:$0xff] }
 0x315   : > { %v10845_v32 = vrot.slane %v3767_v37, %v11914_v36  ;;  %v5236_v2 = vcombine.high %v12254_v8, %v12253_v3  ;;  %v5270_v60 = vcombine.high %v12256_v38, %v12255_v62  ;;  %5997 = vrot.lane.b32.xlu1 %v6912_v50, %s7463_s8  ;;  %v5817_v21 = vpack.i.b16 %v5715_v5, %v5681_v41  ;;  %v4021_v26 = vpop.permute.xlu0 %4020  ;;  %v12261_v38 = vld [vmem:[#allocation29_spill] sm:$0xff] }
 0x316   : > { %v10853_v16 = vrot.slane %v3699_v46, %v11914_v36  ;;  %5999 = vrot.lane.b32.xlu0 %v6913_v30, %s7463_s8  ;;  %v5820_v42 = vpack.i.b16 %v5819_v14, %v5818_v44  ;;  %v12257_v56 = vpack.i.b16 %v10643_v45, %v10623_v61  ;;  %v6832_v19 = vcombine.low %v10735_v53, %v10790_v11 }
 0x317   : > { %v5202_v5 = vcombine.high %v12259_v33, %v12258_v22  ;;  %v6928_v41 = vcombine.low %v5817_v21, %v5865_v25  ;;  %v3858_v20 = vshrl.u32 %v10832_v51, 16  ;;  %v3906_v46 = vshrl.u32 %v10837_v49, 16  ;;  %v12263_v21 = vld [vmem:[#allocation135_spill] sm:$0xff] }
 0x318   : > { %v6831_v6 = vcombine.low %v12257_v56, %v3440_v34  ;;  %v10869_v40 = vrot.slane %v5304_v29, %v11914_v36  ;;  %v5768_v58 = vcombine.high %v10697_v31, %v10702_v59  ;;  %v4136_v45 = vsel %vm1849_vm7, %v10565_v4, %v4019_v55  ;;  %v4099_v34 = vpop.permute.xlu1 %4098 }
 0x319   : > { %v6929_v24 = vcombine.low %v5820_v42, %v5868_v54  ;;  %v10876_v53 = vrot.slane %v5236_v2, %v11914_v36  ;;  %v10879_v11 = vrot.slane %v5270_v60, %v11914_v36  ;;  %6077 = vrot.lane.b32.xlu1 %v6928_v41, %s7464_s11  ;;  %v4179_v37 = vsel %vm1898_vm8, %v4136_v45, %v4099_v34  ;;  %v4101_v23 = vpop.permute.xlu0 %4100  ;;  %v12262_v60 = vld [vmem:[#allocation134_spill] sm:$0xff] }
 0x31a   : > { %v3905_v17 = vshrl.u32 %v10845_v32, 16  ;;  %v5700_v31 = vcombine.high %v10649_v7, %v10628_v63  ;;  %v5734_v4 = vcombine.high %v10684_v57, %v10687_v48  ;;  %v12260_v59 = vcombine.low %v10567_v15, %v10555_v47  ;;  %7210 = vmatprep.mubr.msk.bf16.mxu0 %vm1938_vm9, %v4179_v37 }
 0x31b   : > { %6079 = vrot.lane.b32.xlu0 %v6929_v24, %s7464_s11  ;;  %v3904_v14 = vpack.i.b16 %v10837_v49, %v10845_v32  ;;  %v3857_v63 = vshrl.u32 %v10853_v16, 16  ;;  %v10899_v57 = vrot.slane %v5202_v5, %v11914_v36  ;;  %v5409_v15 = vshrl.u32 %v10869_v40, 16  ;;  %v12266_v24 = vld [vmem:[#allocation43_spill] sm:$0xff] }
 0x31c   : > { %v4139_v1 = vsel %vm1849_vm7, %v12260_v59, %v4021_v26  ;;  %v3907_v7 = vpack.i.b16 %v3906_v46, %v3905_v17  ;;  %v5666_v47 = vcombine.high %v10672_v10, %v10652_v52  ;;  %v10905_v48 = vrot.slane %v5768_v58, %v11914_v36  ;;  %v1830_v13 = vpop.permute.xlu1 %1829 }
 0x31d   : > { %v4181_v0 = vsel %vm1898_vm8, %v4139_v1, %v4101_v23  ;;  %4034 = vrot.lane.b32.xlu1 %v6831_v6, %s7463_s8  ;;  %v1912_v9 = vsel %vm1898_vm8, %v10661_v35, %v1830_v13  ;;  %v3856_v50 = vpack.i.b16 %v10832_v51, %v10853_v16  ;;  %v3859_v25 = vpack.i.b16 %v3858_v20, %v3857_v63  ;;  %v1832_v29 = vpop.permute.xlu0 %1831  ;;  %v12265_v6 = vld [vmem:[#allocation148_spill] sm:$0xff] }
 0x31e   : > { %7211 = vmatmul.mubr.msk.bf16.gmra.mrb[8].mxu0 %vm1938_vm9, %v4181_v0  ;;  %v10915_v18 = vcombine.high %v10719_v27, %v11987_v12  ;;  %v5408_v52 = vshrl.u32 %v10879_v11, 16  ;;  %v10919_v10 = vrot.slane %v5700_v31, %v11914_v36  ;;  %v10922_v28 = vrot.slane %v5734_v4, %v11914_v36  ;;  %7180 = vmatprep.mubr.msk.bf16.mxu1 %vm1938_vm9, %v1912_v9  ;;  %v12267_v0 = vld [vmem:[#allocation40_spill] sm:$0xff] }
 0x31f   : > { %4036 = vrot.lane.b32.xlu0 %v6832_v19, %s7463_s8  ;;  %v5361_v35 = vshrl.u32 %v10876_v53, 16  ;;  %v1914_v55 = vsel %vm1898_vm8, %v10668_v39, %v1832_v29  ;;  %v6847_v27 = vcombine.low %v3856_v50, %v3904_v14  ;;  %v6848_v30 = vcombine.low %v3859_v25, %v3907_v7  ;;  %v12268_v14 = vld [vmem:[#allocation65_spill] sm:$0xff] }
 0x320   : > { %v5407_v44 = vpack.i.b16 %v10869_v40, %v10879_v11  ;;  %v10932_v54 = vrot.slane %v5666_v47, %v11914_v36  ;;  %v5873_v3 = vshrl.u32 %v10905_v48, 16  ;;  %7181 = vmatmul.mubr.msk.bf16.gmra.mrb[12].mxu1 %vm1938_vm9, %v1914_v55  ;;  %v4023_v8 = vpop.permute.xlu1 %4022  ;;  %v5360_v2 = vshrl.u32 %v10899_v57, 16 }
 0x321   : > { %v5410_v62 = vpack.i.b16 %v5409_v15, %v5408_v52  ;;  %v12264_v39 = vcombine.low %v12262_v60, %v12263_v21  ;;  %4114 = vrot.lane.b32.xlu1 %v6847_v27, %s7464_s11  ;;  %v5359_v42 = vpack.i.b16 %v10876_v53, %v10899_v57  ;;  %v3251_v56 = vcombine.high %v10623_v61, %v11987_v12 }
 0x322   : > { %v3400_v19 = vshrl.u32 %v12265_v6, 16  ;;  %v5825_v22 = vshrl.u32 %v10919_v10, 16  ;;  %v5872_v33 = vshrl.u32 %v10922_v28, 16  ;;  %v4025_v5 = vpop.permute.xlu0 %4024  ;;  %v5362_v41 = vpack.i.b16 %v5361_v35, %v5360_v2 }
 0x323   : > { %v1879_v26 = vsel %vm1849_vm7, %v12264_v39, %v12261_v38  ;;  %4116 = vrot.lane.b32.xlu0 %v6848_v30, %s7464_s11  ;;  %v3446_v20 = vpack.i.b16 %v10915_v18, %v10785_v43  ;;  %v6914_v46 = vcombine.low %v5359_v42, %v5407_v44  ;;  %v5871_v58 = vpack.i.b16 %v10905_v48, %v10922_v28 }
 0x324   : > { %v3448_v45 = vshrl.u32 %v10915_v18, 16  ;;  %v3817_v61 = vcombine.high %v10837_v49, %v11987_v12  ;;  %v5824_v34 = vshrl.u32 %v10932_v54, 16  ;;  %v4142_v37 = vsel %vm1849_vm7, %v12266_v24, %v4023_v8  ;;  %v4103_v17 = vpop.permute.xlu1 %4102 }
 0x325   : > { %v6915_v31 = vcombine.low %v5362_v41, %v5410_v62  ;;  %v5874_v4 = vpack.i.b16 %v5873_v3, %v5872_v33  ;;  %6001 = vrot.lane.b32.xlu1 %v6914_v46, %s7463_s8  ;;  %v4183_v59 = vsel %vm1898_vm8, %v4142_v37, %v4103_v17  ;;  %v5823_v1 = vpack.i.b16 %v10919_v10, %v10932_v54  ;;  %v12274_v41 = vld [vmem:[#allocation150_spill] sm:$0xff] }
 0x326   : > { %v3749_v23 = vcombine.high %v10832_v51, %v11987_v12  ;;  %v3783_v49 = vcombine.high %v10845_v32, %v11987_v12  ;;  %v12269_v63 = vcombine.low %v12267_v0, %v12268_v14  ;;  %v4105_v15 = vpop.permute.xlu0 %4104  ;;  %7214 = vmatprep.mubr.msk.bf16.mxu0 %vm1938_vm9, %v4183_v59  ;;  %v5826_v47 = vpack.i.b16 %v5825_v22, %v5824_v34  ;;  %v12276_v0 = vld [vmem:[#allocation146_spill] sm:$0xff] }
 0x327   : > { %6003 = vrot.lane.b32.xlu0 %v6915_v31, %s7463_s8  ;;  %v3447_v13 = vshrl.u32 %v10785_v43, 16  ;;  %v3715_v9 = vcombine.high %v10853_v16, %v11987_v12  ;;  %v6930_v50 = vcombine.low %v5823_v1, %v5871_v58  ;;  %v3399_v32 = vshrl.u32 %v3251_v56, 16  ;;  %v12270_v43 = vld [vmem:[#allocation132_spill] sm:$0xff] }
 0x328   : > { %v4145_v7 = vsel %vm1849_vm7, %v12269_v63, %v4025_v5  ;;  %v3912_v25 = vshrl.u32 %v3817_v61, 16  ;;  %v5320_v18 = vcombine.high %v10869_v40, %v11987_v12  ;;  %v1834_v52 = vpop.permute.xlu1 %1833  ;;  %v6931_v29 = vcombine.low %v5826_v47, %v5874_v4  ;;  %v12275_v4 = vld [vmem:[#allocation12_spill] sm:$0xff]  ;;  %v12277_v63 = vld [vmem:[#allocation149_spill] sm:$0xff] }
 0x329   : > { %v4185_v51 = vsel %vm1898_vm8, %v4145_v7, %v4105_v15  ;;  %v3398_v35 = vpack.i.b16 %v12265_v6, %v3251_v56  ;;  %v3449_v55 = vpack.i.b16 %v3448_v45, %v3447_v13  ;;  %6081 = vrot.lane.b32.xlu1 %v6930_v50, %s7464_s11  ;;  %v1916_v16 = vsel %vm1898_vm8, %v12270_v43, %v1834_v52  ;;  %v12279_v52 = vld [vmem:[#allocation151_spill] sm:$0xff] }
 0x32a   : > { %7215 = vmatmul.mubr.msk.bf16.gmra.mrb[12].mxu0 %vm1938_vm9, %v4185_v51  ;;  %v3401_v27 = vpack.i.b16 %v3400_v19, %v3399_v32  ;;  %v3864_v30 = vshrl.u32 %v3749_v23, 16  ;;  %v3911_v44 = vshrl.u32 %v3783_v49, 16  ;;  %v5286_v3 = vcombine.high %v10879_v11, %v11987_v12  ;;  %v1836_v40 = vpop.permute.xlu0 %1835  ;;  %7184 = vmatprep.mubr.msk.bf16.mxu1 %vm1938_vm9, %v1916_v16  ;;  %v12271_v19 = vld [vmem:[#allocation145_spill] sm:$0xff] }
 0x32b   : > { %6083 = vrot.lane.b32.xlu0 %v6931_v29, %s7464_s11  ;;  %v6833_v8 = vcombine.low %v3398_v35, %v3446_v20  ;;  %v3863_v2 = vshrl.u32 %v3715_v9, 16  ;;  %v5252_v62 = vcombine.high %v10876_v53, %v11987_v12  ;;  %v1918_v38 = vsel %vm1898_vm8, %v1879_v26, %v1836_v40  ;;  %v12272_v53 = vld [vmem:[#allocation38_spill] sm:$0xff]  ;;  %v12273_v26 = vld [vmem:[#allocation113_spill] sm:$0xff] }
 0x32c   : > { %v3910_v60 = vpack.i.b16 %v3817_v61, %v3783_v49  ;;  %v3913_v21 = vpack.i.b16 %v3912_v25, %v3911_v44  ;;  %v5218_v39 = vcombine.high %v10899_v57, %v11987_v12  ;;  %v10997_v11 = vcombine.high %v10905_v48, %v11987_v12  ;;  %7185 = vmatmul.mubr.msk.bf16.gmra.mrb[16].mxu1 %vm1938_vm9, %v1918_v38  ;;  %v5978_v42 = vpop.permute.xlu1 %5977 }
 0x32d   : > { %v6834_v56 = vcombine.low %v3401_v27, %v3449_v55  ;;  %v5415_v6 = vshrl.u32 %v5320_v18, 16  ;;  %v11002_v22 = vcombine.high %v12271_v19, %v11987_v12  ;;  %4038 = vrot.lane.b32.xlu1 %v6833_v8, %s7463_s8  ;;  %v6887_v33 = vcombine.low %v12273_v26, %v12272_v53  ;;  %v12280_v27 = vld [vmem:[#allocation47_spill] sm:$0xff]  ;;  %v12281_v8 = vld [vmem:[#allocation101_spill] sm:$0xff]  ;;  %v12287_v53 = vld [vmem:[#allocation16_spill] sm:$0xff] }
 0x32e   : > { %v3862_v5 = vpack.i.b16 %v3749_v23, %v3715_v9  ;;  %v3865_v57 = vpack.i.b16 %v3864_v30, %v3863_v2  ;;  %v11009_v48 = vcombine.high %v12274_v41, %v11987_v12  ;;  %v5716_v20 = vcombine.high %v10919_v10, %v11987_v12  ;;  %v5980_v58 = vpop.permute.xlu0 %5979  ;;  %v12282_v2 = vld [vmem:[#allocation147_spill] sm:$0xff] }
 0x32f   : > { %v5750_v46 = vcombine.high %v10922_v28, %v11987_v12  ;;  %4040 = vrot.lane.b32.xlu0 %v6834_v56, %s7463_s8  ;;  %v5367_v45 = vshrl.u32 %v5252_v62, 16  ;;  %v5414_v61 = vshrl.u32 %v5286_v3, 16  ;;  %v5413_v37 = vpack.i.b16 %v5320_v18, %v5286_v3  ;;  %v12278_v18 = vld [vmem:[#allocation100_spill] sm:$0xff]  ;;  %v12285_v56 = vld [vmem:[#allocation142_spill] sm:$0xff]  ;;  %v12286_v19 = vld [vmem:[#allocation15_spill] sm:$0xff] }
 0x330   : > { %v6849_v34 = vcombine.low %v3862_v5, %v3910_v60  ;;  %v6850_v24 = vcombine.low %v3865_v57, %v3913_v21  ;;  %v5366_v17 = vshrl.u32 %v5218_v39, 16  ;;  %v5682_v31 = vcombine.high %v10932_v54, %v11987_v12  ;;  %v6058_v1 = vpop.permute.xlu1 %6057 }
 0x331   : > { %v6091_v59 = vsel %vm1849_vm7, %v12275_v4, %v5978_v42  ;;  %v5416_v10 = vpack.i.b16 %v5415_v6, %v5414_v61  ;;  %v5879_v23 = vshrl.u32 %v10997_v11, 16  ;;  %v5365_v49 = vpack.i.b16 %v5252_v62, %v5218_v39  ;;  %v12283_v62 = vld [vmem:[#allocation143_spill] sm:$0xff] }
 0x332   : > { %4118 = vrot.lane.b32.xlu1 %v6849_v34, %s7464_s11  ;;  %v6138_v28 = vsel %vm1898_vm8, %v6091_v59, %v6058_v1  ;;  %v4651_v14 = vcombine.high %v12276_v0, %v11987_v12  ;;  %v4685_v7 = vcombine.high %v12277_v63, %v11987_v12  ;;  %v6094_v54 = vsel %vm1849_vm7, %v6887_v33, %v5980_v58  ;;  %v6060_v15 = vpop.permute.xlu0 %6059  ;;  %v12289_v34 = vld [vmem:[#allocation141_spill] sm:$0xff]  ;;  %v12293_v59 = vld [vmem:[#allocation138_spill] sm:$0xff] }
 0x333   : > { %4120 = vrot.lane.b32.xlu0 %v6850_v24, %s7464_s11  ;;  %7236 = vmatprep.mubr.msk.bf16.mxu0 %vm1938_vm9, %v6138_v28  ;;  %v5368_v47 = vpack.i.b16 %v5367_v45, %v5366_v17  ;;  %v5831_v13 = vshrl.u32 %v5716_v20, 16  ;;  %v5878_v9 = vshrl.u32 %v5750_v46, 16  ;;  %v6140_v51 = vsel %vm1898_vm8, %v6094_v54, %v6060_v15  ;;  %v12288_v45 = vld [vmem:[#allocation5_spill] sm:$0xff]  ;;  %v12290_v24 = vld [vmem:[#allocation140_spill] sm:$0xff]  ;;  %v12291_v17 = vld [vmem:[#allocation83_spill] sm:$0xff] }
 0x334   : > { %v6916_v50 = vcombine.low %v5365_v49, %v5413_v37  ;;  %v5877_v32 = vpack.i.b16 %v10997_v11, %v5750_v46  ;;  %v4915_v25 = vshrl.u32 %v11009_v48, 16  ;;  %v1882_v29 = vsel %vm1849_vm7, %v12279_v52, %v12278_v18  ;;  %v1838_v35 = vpop.permute.xlu1 %1837  ;;  %7237 = vmatmul.mubr.msk.bf16.vlgmr.msra.gmra.mrb[0].mxu0 %vm1938_vm9, %v6140_v51 }
 0x335   : > { %v6917_v55 = vcombine.low %v5368_v47, %v5416_v10  ;;  %v5830_v43 = vshrl.u32 %v5682_v31, 16  ;;  %v5880_v16 = vpack.i.b16 %v5879_v23, %v5878_v9  ;;  %v716_v30 = vshrl.u32 %v12280_v27, 16  ;;  %v12294_v10 = vld [vmem:[#allocation7_spill] sm:$0xff] }
 0x336   : > { %6005 = vrot.lane.b32.xlu1 %v6916_v50, %s7463_s8  ;;  %v1920_v44 = vsel %vm1898_vm8, %v1882_v29, %v1838_v35  ;;  %v5829_v3 = vpack.i.b16 %v5716_v20, %v5682_v31  ;;  %v4913_v40 = vpack.i.b16 %v11009_v48, %v4685_v7  ;;  %v12284_v38 = vcombine.low %v12282_v2, %v12283_v62  ;;  %v1840_v21 = vpop.permute.xlu0 %1839  ;;  %v12292_v31 = vld [vmem:[#allocation92_spill] sm:$0xff]  ;;  %v12295_v23 = vld [vmem:[#allocation11_spill] sm:$0xff] }
 0x337   : > { %6007 = vrot.lane.b32.xlu0 %v6917_v55, %s7463_s8  ;;  %7188 = vmatprep.mubr.msk.bf16.mxu1 %vm1938_vm9, %v1920_v44  ;;  %v5832_v39 = vpack.i.b16 %v5831_v13, %v5830_v43  ;;  %v4867_v11 = vshrl.u32 %v4651_v14, 16  ;;  %v4914_v42 = vshrl.u32 %v4685_v7, 16  ;;  %v717_v6 = vshrl.u32 %v12285_v56, 16 }
 0x338   : > { %v1885_v60 = vsel %vm1849_vm7, %v12284_v38, %v12281_v8  ;;  %v4704_v26 = vcombine.high %v12287_v53, %v12286_v19  ;;  %v6932_v5 = vcombine.low %v5829_v3, %v5877_v32  ;;  %v4865_v57 = vpack.i.b16 %v4651_v14, %v11002_v22  ;;  %v5982_v41 = vpop.permute.xlu1 %5981  ;;  %v12296_v3 = vld [vmem:[#allocation28_spill] sm:$0xff] }
 0x339   : > { %v1922_v33 = vsel %vm1898_vm8, %v1885_v60, %v1840_v21  ;;  %v6933_v48 = vcombine.low %v5832_v39, %v5880_v16  ;;  %v4866_v20 = vshrl.u32 %v11002_v22, 16  ;;  %v4916_v46 = vpack.i.b16 %v4915_v25, %v4914_v42  ;;  %v12297_v42 = vld [vmem:[#allocation27_spill] sm:$0xff] }
 0x33a   : > { %7189 = vmatmul.mubr.msk.bf16.gmra.mrb[20].mxu1 %vm1938_vm9, %v1922_v33  ;;  %v715_v58 = vpack.i.b16 %v12285_v56, %v12280_v27  ;;  %v668_v61 = vshrl.u32 %v12288_v45, 16  ;;  %v4636_v37 = vcombine.high %v12290_v24, %v12289_v34  ;;  %v4670_v4 = vcombine.high %v12292_v31, %v12291_v17  ;;  %6085 = vrot.lane.b32.xlu1 %v6932_v5, %s7464_s11  ;;  %v5984_v0 = vpop.permute.xlu0 %5983  ;;  %v12302_v17 = vld [vmem:[#allocation66_spill] sm:$0xff]  ;;  %v12303_v31 = vld [vmem:[#allocation61_spill] sm:$0xff] }
 0x33b   : > { %v669_v1 = vshrl.u32 %v12293_v59, 16  ;;  %v4602_v28 = vcombine.high %v12295_v23, %v12294_v10  ;;  %v6888_v22 = vcombine.low %v4865_v57, %v4913_v40  ;;  %6087 = vrot.lane.b32.xlu0 %v6933_v48, %s7464_s11  ;;  %v4868_v49 = vpack.i.b16 %v4867_v11, %v4866_v20  ;;  %v12299_v48 = vld [vmem:[#allocation72_spill] sm:$0xff]  ;;  %v12305_v10 = vld [vmem:[#allocation63_spill] sm:$0xff] }
 0x33c   : > { %v667_v14 = vpack.i.b16 %v12293_v59, %v12288_v45  ;;  %v4718_v63 = vrot.slane %v4704_v26, %v11914_v36  ;;  %v594_v7 = vcombine.high %v12280_v27, %v11987_v12  ;;  %v628_v54 = vcombine.high %v12285_v56, %v11987_v12  ;;  %v6062_v51 = vpop.permute.xlu1 %6061 }
 0x33d   : > { %v718_v15 = vpack.i.b16 %v717_v6, %v716_v30  ;;  %v526_v47 = vcombine.high %v12288_v45, %v11987_v12  ;;  %v6097_v13 = vsel %vm1849_vm7, %v6888_v22, %v5982_v41  ;;  %v6889_v9 = vcombine.low %v4868_v49, %v4916_v46  ;;  %v12298_v41 = vld [vmem:[#allocation119_spill] sm:$0xff]  ;;  %v12300_v46 = vld [vmem:[#allocation121_spill] sm:$0xff]  ;;  %v12307_v22 = vld [vmem:[#allocation112_spill] sm:$0xff] }
 0x33e   : > { %v4650_v50 = vrot.slane %v4636_v37, %v11914_v36  ;;  %v4684_v32 = vrot.slane %v4670_v4, %v11914_v36  ;;  %v560_v25 = vcombine.high %v12293_v59, %v11987_v12  ;;  %v6142_v18 = vsel %vm1898_vm8, %v6097_v13, %v6062_v51  ;;  %v6064_v43 = vpop.permute.xlu0 %6063  ;;  %v12310_v13 = vld [vmem:[#allocation107_spill] sm:$0xff] }
 0x33f   : > { %v6750_v52 = vcombine.low %v667_v14, %v715_v58  ;;  %v670_v29 = vpack.i.b16 %v669_v1, %v668_v61  ;;  %v11083_v35 = vrot.slane %v4602_v28, %v11914_v36  ;;  %v6100_v55 = vsel %vm1849_vm7, %v6889_v9, %v5984_v0  ;;  %7240 = vmatprep.mubr.msk.bf16.mxu0 %vm1938_vm9, %v6142_v18  ;;  %v12301_v58 = vld [vmem:[#allocation74_spill] sm:$0xff]  ;;  %v12306_v28 = vld [vmem:[#allocation116_spill] sm:$0xff]  ;;  %v12308_v0 = vld [vmem:[#allocation117_spill] sm:$0xff] }
 0x340   : > { %v722_v16 = vshrl.u32 %v594_v7, 16  ;;  %v723_v27 = vshrl.u32 %v628_v54, 16  ;;  %v6144_v30 = vsel %vm1898_vm8, %v6100_v55, %v6064_v43  ;;  %v4921_v44 = vshrl.u32 %v4718_v63, 16  ;;  %v1842_v38 = vpop.permute.xlu1 %1841  ;;  %v12304_v1 = vld [vmem:[#allocation110_spill] sm:$0xff]  ;;  %v12311_v9 = vld [vmem:[#allocation41_spill] sm:$0xff] }
 0x341   : > { %v1888_v40 = vsel %vm1849_vm7, %v6750_v52, %v12296_v3  ;;  %v6751_v8 = vcombine.low %v670_v29, %v718_v15  ;;  %v721_v2 = vpack.i.b16 %v628_v54, %v594_v7  ;;  %v674_v62 = vshrl.u32 %v526_v47, 16  ;;  %7241 = vmatmul.mubr.msk.bf16.gmra.mrb[4].mxu0 %vm1938_vm9, %v6144_v30  ;;  %v12309_v14 = vld [vmem:[#allocation114_spill] sm:$0xff]  ;;  %v12313_v29 = vld [vmem:[#allocation104_spill] sm:$0xff]  ;;  %v12314_v43 = vld [vmem:[#allocation9_spill] sm:$0xff] }
 0x342   : > { %v675_v60 = vshrl.u32 %v560_v25, 16  ;;  %v1924_v21 = vsel %vm1898_vm8, %v1888_v40, %v1842_v38  ;;  %v4873_v39 = vshrl.u32 %v4650_v50, 16  ;;  %v4920_v11 = vshrl.u32 %v4684_v32, 16  ;;  %v1844_v19 = vpop.permute.xlu0 %1843  ;;  %v12312_v52 = vld [vmem:[#allocation10_spill] sm:$0xff] }
 0x343   : > { %v1891_v56 = vsel %vm1849_vm7, %v6751_v8, %v12297_v42  ;;  %v673_v6 = vpack.i.b16 %v560_v25, %v526_v47  ;;  %7192 = vmatprep.mubr.msk.bf16.mxu1 %vm1938_vm9, %v1924_v21  ;;  %v4919_v53 = vpack.i.b16 %v4718_v63, %v4684_v32  ;;  %v724_v26 = vpack.i.b16 %v723_v27, %v722_v16  ;;  %v12315_v42 = vld [vmem:[#allocation36_spill] sm:$0xff] }
 0x344   : > { %v1926_v33 = vsel %vm1898_vm8, %v1891_v56, %v1844_v19  ;;  %v4872_v5 = vshrl.u32 %v11083_v35, 16  ;;  %v4922_v57 = vpack.i.b16 %v4921_v44, %v4920_v11  ;;  %v2830_v20 = vcombine.low %v12299_v48, %v12298_v41  ;;  %v5986_v34 = vpop.permute.xlu1 %5985 }
 0x345   : > { %v2864_v45 = vcombine.low %v12301_v58, %v12300_v46  ;;  %7193 = vmatmul.mubr.msk.bf16.gmra.mrb[24].mxu1 %vm1938_vm9, %v1926_v33  ;;  %v4871_v61 = vpack.i.b16 %v4650_v50, %v11083_v35  ;;  %v6752_v24 = vcombine.low %v673_v6, %v721_v2  ;;  %v676_v37 = vpack.i.b16 %v675_v60, %v674_v62 }
 0x346   : > { %v2762_v4 = vcombine.low %v12303_v31, %v12302_v17  ;;  %v4874_v59 = vpack.i.b16 %v4873_v39, %v4872_v5  ;;  %v2796_v23 = vcombine.low %v12305_v10, %v12304_v1  ;;  %v2822_v49 = vcombine.low %v12307_v22, %v12306_v28  ;;  %v5988_v15 = vpop.permute.xlu0 %5987 }
 0x347   : > { %v2856_v7 = vcombine.low %v12309_v14, %v12308_v0  ;;  %v6890_v54 = vcombine.low %v4871_v61, %v4919_v53  ;;  %v6753_v47 = vcombine.low %v676_v37, %v724_v26  ;;  %v2754_v51 = vcombine.low %v12311_v9, %v12310_v13 }
 0x348   : > { %v6891_v25 = vcombine.low %v4874_v59, %v4922_v57  ;;  %v4720_v18 = vcombine.high %v4718_v63, %v11987_v12  ;;  %v2788_v55 = vcombine.low %v12313_v29, %v12312_v52  ;;  %v11117_v16 = vrot.slane %v2830_v20, %v12314_v43  ;;  %v6066_v44 = vpop.permute.xlu1 %6065  ;;  %v12316_v57 = vld [vmem:[#allocation102_spill] sm:$0xff] }
 0x349   : > { %v11120_v27 = vrot.slane %v2864_v45, %v12314_v43  ;;  %v6103_v30 = vsel %vm1849_vm7, %v6890_v54, %v5986_v34  ;;  %v11124_v3 = vrot.slane %v2762_v4, %v12314_v43  ;;  %v4652_v8 = vcombine.high %v4650_v50, %v11987_v12 }
 0x34a   : > { %v6146_v40 = vsel %vm1898_vm8, %v6103_v30, %v6066_v44  ;;  %v4686_v63 = vcombine.high %v4684_v32, %v11987_v12  ;;  %v11130_v2 = vrot.slane %v2796_v23, %v12314_v43  ;;  %v11133_v62 = vrot.slane %v2822_v49, %v12314_v43  ;;  %v6068_v21 = vpop.permute.xlu0 %6067 }
 0x34b   : > { %v11136_v38 = vrot.slane %v2856_v7, %v12314_v43  ;;  %v6106_v60 = vsel %vm1849_vm7, %v6891_v25, %v5988_v15  ;;  %7244 = vmatprep.mubr.msk.bf16.mxu0 %vm1938_vm9, %v6146_v40  ;;  %v11141_v39 = vrot.slane %v2754_v51, %v12314_v43  ;;  %v4618_v32 = vcombine.high %v11083_v35, %v11987_v12 }
 0x34c   : > { %v6148_v50 = vsel %vm1898_vm8, %v6106_v60, %v6068_v21  ;;  %v4927_v11 = vshrl.u32 %v4720_v18, 16  ;;  %v1894_v56 = vsel %vm1849_vm7, %v6752_v24, %v12315_v42  ;;  %v11149_v6 = vrot.slane %v2788_v55, %v12314_v43  ;;  %v1846_v26 = vpop.permute.xlu1 %1845 }
 0x34d   : > { %v2838_v19 = vcombine.low %v11133_v62, %v11117_v16  ;;  %v2872_v53 = vcombine.low %v11136_v38, %v11120_v27  ;;  %7245 = vmatmul.mubr.msk.bf16.gmra.mrb[8].mxu0 %vm1938_vm9, %v6148_v50  ;;  %v1928_v33 = vsel %vm1898_vm8, %v1894_v56, %v1846_v26  ;;  %v4925_v5 = vpack.i.b16 %v4720_v18, %v4686_v63  ;;  %v12319_v56 = vld [vmem:[#allocation54_spill] sm:$0xff] }
 0x34e   : > { %v4879_v35 = vshrl.u32 %v4652_v8, 16  ;;  %v1897_v41 = vsel %vm1849_vm7, %v6753_v47, %v12316_v57  ;;  %v2770_v48 = vcombine.low %v11141_v39, %v11124_v3  ;;  %v2804_v20 = vcombine.low %v11149_v6, %v11130_v2  ;;  %7196 = vmatprep.mubr.msk.bf16.mxu1 %vm1938_vm9, %v1928_v33  ;;  %v12321_v26 = vld [vmem:[#allocation82_spill] sm:$0xff]  ;;  %v12322_v33 = vld [vmem:[#allocation85_spill] sm:$0xff] }
 0x34f   : > { %v1848_v46 = vpop.permute.xlu0 %1847  ;;  %v4926_v58 = vshrl.u32 %v4686_v63, 16  ;;  %v4877_v61 = vpack.i.b16 %v4652_v8, %v4618_v32  ;;  %v11166_v34 = vrot.slane %v2838_v19, %v11914_v36  ;;  %v11169_v24 = vrot.slane %v2872_v53, %v11914_v36  ;;  %v12320_v19 = vld [vmem:[#allocation48_spill] sm:$0xff]  ;;  %v12324_v57 = vld [vmem:[#allocation81_spill] sm:$0xff] }
 0x350   : > { %v1930_v45 = vsel %vm1898_vm8, %v1897_v41, %v1848_v46  ;;  %v5990_v37 = vpop.permute.xlu1 %5989  ;;  %v4878_v17 = vshrl.u32 %v4618_v32, 16  ;;  %v11173_v4 = vrot.slane %v2770_v48, %v11914_v36  ;;  %v11176_v59 = vrot.slane %v2804_v20, %v11914_v36  ;;  %v12317_v32 = vld [vmem:[#allocation50_spill] sm:$0xff]  ;;  %v12325_v48 = vld [vmem:[#allocation49_spill] sm:$0xff] }
 0x351   : > { %7197 = vmatmul.mubr.msk.bf16.gmra.mrb[28].mxu1 %vm1938_vm9, %v1930_v45  ;;  %v4928_v31 = vpack.i.b16 %v4927_v11, %v4926_v58  ;;  %v6892_v1 = vcombine.low %v4877_v61, %v4925_v5  ;;  %v2965_v0 = vshrl.u32 %v11166_v34, 16  ;;  %v2966_v14 = vshrl.u32 %v11169_v24, 16  ;;  %v12318_v11 = vld [vmem:[#allocation93_spill] sm:$0xff]  ;;  %v12326_v20 = vld [vmem:[#allocation2_spill] sm:$0xff]  ;;  %v12327_v58 = vld [vmem:[#allocation20_spill] sm:$0xff] }
 0x352   : > { %v4880_v10 = vpack.i.b16 %v4879_v35, %v4878_v17  ;;  %v2964_v47 = vpack.i.b16 %v11169_v24, %v11166_v34  ;;  %v2917_v13 = vshrl.u32 %v11173_v4, 16  ;;  %v2918_v9 = vshrl.u32 %v11176_v59, 16  ;;  %v12323_v35 = vld [vmem:[#allocation137_spill] sm:$0xff]  ;;  %v12328_v45 = vld [vmem:[#allocation139_spill] sm:$0xff]  ;;  %v12330_v17 = vld [vmem:[#allocation44_spill] sm:$0xff] }
 0x353   : > { %v5992_v23 = vpop.permute.xlu0 %5991  ;;  %v6109_v28 = vsel %vm1849_vm7, %v6892_v1, %v5990_v37  ;;  %v2916_v25 = vpack.i.b16 %v11176_v59, %v11173_v4  ;;  %v2967_v52 = vpack.i.b16 %v2966_v14, %v2965_v0  ;;  %v4797_v42 = vcombine.low %v12318_v11, %v12317_v32  ;;  %v12329_v37 = vld [vmem:[#allocation76_spill] sm:$0xff]  ;;  %v12331_v1 = vld [vmem:[#allocation67_spill] sm:$0xff] }
 0x354   : > { %v6893_v22 = vcombine.low %v4880_v10, %v4928_v31  ;;  %v6070_v49 = vpop.permute.xlu1 %6069  ;;  %v2919_v55 = vpack.i.b16 %v2918_v9, %v2917_v13  ;;  %v4831_v53 = vcombine.low %v12320_v19, %v12319_v56  ;;  %v4729_v5 = vcombine.low %v12322_v33, %v12321_v26  ;;  %v12332_v10 = vld [vmem:[#allocation70_spill] sm:$0xff] }
 0x355   : > { %v6150_v7 = vsel %vm1898_vm8, %v6109_v28, %v6070_v49  ;;  %v6811_v29 = vcombine.low %v2916_v25, %v2964_v47  ;;  %v4763_v41 = vcombine.low %v12324_v57, %v12323_v35  ;;  %v4789_v46 = vcombine.low %v12326_v20, %v12325_v48 }
 0x356   : > { %v6112_v54 = vsel %vm1849_vm7, %v6893_v22, %v5992_v23  ;;  %7248 = vmatprep.mubr.msk.bf16.mxu0 %vm1938_vm9, %v6150_v7  ;;  %v6812_v40 = vcombine.low %v2919_v55, %v2967_v52  ;;  %v4823_v61 = vcombine.low %v12328_v45, %v12327_v58  ;;  %v4721_v31 = vcombine.low %v12330_v17, %v12329_v37 }
 0x357   : > { %v6072_v15 = vpop.permute.xlu0 %6071  ;;  %v4755_v23 = vcombine.low %v12332_v10, %v12331_v1  ;;  %v11215_v28 = vrot.slane %v4797_v42, %v12314_v43  ;;  %v11218_v22 = vrot.slane %v4831_v53, %v12314_v43  ;;  %v11221_v49 = vrot.slane %v4729_v5, %v12314_v43 }
 0x358   : > { %v6152_v51 = vsel %vm1898_vm8, %v6112_v54, %v6072_v15  ;;  %v4027_v18 = vpop.permute.xlu1 %4026  ;;  %v11224_v0 = vrot.slane %v4763_v41, %v12314_v43  ;;  %v11227_v14 = vrot.slane %v4789_v46, %v12314_v43  ;;  %v11230_v7 = vrot.slane %v4823_v61, %v12314_v43 }
 0x359   : > { %7249 = vmatmul.mubr.msk.bf16.gmra.mrb[12].mxu0 %vm1938_vm9, %v6152_v51  ;;  %v4148_v44 = vsel %vm1849_vm7, %v6811_v29, %v4027_v18  ;;  %v11233_v54 = vrot.slane %v4721_v31, %v12314_v43  ;;  %v11236_v15 = vrot.slane %v4755_v23, %v12314_v43  ;;  %v2786_v42 = vcombine.high %v11173_v4, %v11987_v12 }
 0x35a   : > { %v4805_v47 = vcombine.low %v11227_v14, %v11215_v28  ;;  %v4839_v13 = vcombine.low %v11230_v7, %v11218_v22  ;;  %v2820_v56 = vcombine.high %v11176_v59, %v11987_v12  ;;  %v2839_v10 = vcombine.high %v11133_v62, %v11117_v16 }
 0x35b   : > { %v4029_v30 = vpop.permute.xlu0 %4028  ;;  %v4737_v9 = vcombine.low %v11233_v54, %v11221_v49  ;;  %v4771_v51 = vcombine.low %v11236_v15, %v11224_v0  ;;  %v2923_v41 = vshrl.u32 %v2786_v42, 16 }
 0x35c   : > { %v4107_v8 = vpop.permute.xlu1 %4106  ;;  %v4151_v60 = vsel %vm1849_vm7, %v6812_v40, %v4029_v30  ;;  %v4813_v25 = vrot.slane %v4805_v47, %v11914_v36  ;;  %v4847_v18 = vrot.slane %v4839_v13, %v11914_v36  ;;  %v2924_v48 = vshrl.u32 %v2820_v56, 16 }
 0x35d   : > { %v4187_v63 = vsel %vm1898_vm8, %v4148_v44, %v4107_v8  ;;  %v4745_v52 = vrot.slane %v4737_v9, %v11914_v36  ;;  %v4779_v43 = vrot.slane %v4771_v51, %v11914_v36  ;;  %v2922_v45 = vpack.i.b16 %v2820_v56, %v2786_v42 }
 0x35e   : > { %7218 = vmatprep.mubr.msk.bf16.mxu1 %vm1938_vm9, %v4187_v63  ;;  %v4932_v29 = vshrl.u32 %v4813_v25, 16  ;;  %v4933_v55 = vshrl.u32 %v4847_v18, 16  ;;  %v4931_v40 = vpack.i.b16 %v4847_v18, %v4813_v25  ;;  %v2854_v63 = vcombine.high %v11166_v34, %v11987_v12 }
 0x35f   : > { %v4109_v21 = vpop.permute.xlu0 %4108  ;;  %v4884_v30 = vshrl.u32 %v4745_v52, 16  ;;  %v4885_v44 = vshrl.u32 %v4779_v43, 16  ;;  %v4821_v46 = vcombine.high %v4813_v25, %v11987_v12  ;;  %v4855_v58 = vcombine.high %v4847_v18, %v11987_v12 }
 0x360   : > { %v4189_v50 = vsel %vm1898_vm8, %v4151_v60, %v4109_v21  ;;  %v4934_v8 = vpack.i.b16 %v4933_v55, %v4932_v29  ;;  %v2888_v60 = vcombine.high %v11169_v24, %v11987_v12  ;;  %v4883_v21 = vpack.i.b16 %v4779_v43, %v4745_v52 }
 0x361   : > { %7219 = vmatmul.mubr.msk.bf16.vlgmr.msra.gmra.mrb[16].mxu1 %vm1938_vm9, %v4189_v50  ;;  %v5994_v50 = vpop.permute.xlu1 %5993  ;;  %v4886_v32 = vpack.i.b16 %v4885_v44, %v4884_v30  ;;  %v2971_v26 = vshrl.u32 %v2854_v63, 16  ;;  %v2925_v37 = vpack.i.b16 %v2924_v48, %v2923_v41  ;;  %v4753_v31 = vcombine.high %v4745_v52, %v11987_v12 }
 0x362   : > { %v6894_v19 = vcombine.low %v4883_v21, %v4931_v40  ;;  %v2972_v33 = vshrl.u32 %v2888_v60, 16  ;;  %v2970_v4 = vpack.i.b16 %v2888_v60, %v2854_v63  ;;  %v4787_v1 = vcombine.high %v4779_v43, %v11987_v12 }
 0x363   : > { %v5996_v11 = vpop.permute.xlu0 %5995  ;;  %v6895_v53 = vcombine.low %v4886_v32, %v4934_v8  ;;  %v2873_v47 = vcombine.high %v11136_v38, %v11120_v27  ;;  %v4938_v9 = vshrl.u32 %v4821_v46, 16  ;;  %v4939_v51 = vshrl.u32 %v4855_v58, 16 }
 0x364   : > { %v6115_v5 = vsel %vm1849_vm7, %v6894_v19, %v5994_v50  ;;  %v2973_v59 = vpack.i.b16 %v2972_v33, %v2971_v26  ;;  %v6813_v23 = vcombine.low %v2922_v45, %v2970_v4  ;;  %v2771_v25 = vcombine.high %v11141_v39, %v11124_v3 }
 0x365   : > { %v6118_v35 = vsel %vm1849_vm7, %v6895_v53, %v5996_v11  ;;  %v2805_v18 = vcombine.high %v11149_v6, %v11130_v2  ;;  %v4890_v55 = vshrl.u32 %v4753_v31, 16  ;;  %v4891_v30 = vshrl.u32 %v4787_v1, 16 }
 0x366   : > { %v6814_v13 = vcombine.low %v2925_v37, %v2973_v59  ;;  %v4937_v38 = vpack.i.b16 %v4855_v58, %v4821_v46  ;;  %v2853_v3 = vrot.slane %v2839_v10, %v11914_v36  ;;  %v2887_v39 = vrot.slane %v2873_v47, %v11914_v36 }
 0x367   : > { %v4940_v2 = vpack.i.b16 %v4939_v51, %v4938_v9  ;;  %v4889_v6 = vpack.i.b16 %v4787_v1, %v4753_v31  ;;  %v2785_v40 = vrot.slane %v2771_v25, %v11914_v36  ;;  %v2819_v8 = vrot.slane %v2805_v18, %v11914_v36 }
 0x368   : > { %v4892_v63 = vpack.i.b16 %v4891_v30, %v4890_v55  ;;  %v4806_v21 = vcombine.high %v11227_v14, %v11215_v28  ;;  %v4840_v32 = vcombine.high %v11230_v7, %v11218_v22  ;;  %v2977_v42 = vshrl.u32 %v2853_v3, 16 }
 0x369   : > { %v6896_v50 = vcombine.low %v4889_v6, %v4937_v38  ;;  %v2978_v56 = vshrl.u32 %v2887_v39, 16  ;;  %v4738_v19 = vcombine.high %v11233_v54, %v11221_v49  ;;  %v4772_v53 = vcombine.high %v11236_v15, %v11224_v0 }
 0x36a   : > { %v6897_v11 = vcombine.low %v4892_v63, %v4940_v2  ;;  %v2976_v7 = vpack.i.b16 %v2887_v39, %v2853_v3  ;;  %v4820_v49 = vrot.slane %v4806_v21, %v11914_v36  ;;  %v4854_v54 = vrot.slane %v4840_v32, %v11914_v36 }
 0x36b   : > { %v2979_v0 = vpack.i.b16 %v2978_v56, %v2977_v42  ;;  %v2928_v15 = vpack.i.b16 %v2819_v8, %v2785_v40  ;;  %v4786_v41 = vrot.slane %v4772_v53, %v11914_v36  ;;  %v2889_v9 = vcombine.high %v2887_v39, %v11987_v12 }
 0x36c   : > { %v4944_v46 = vshrl.u32 %v4820_v49, 16  ;;  %v4945_v58 = vshrl.u32 %v4854_v54, 16  ;;  %v4856_v21 = vcombine.high %v4854_v54, %v11987_v12 }
 0x36d   : > { %v6815_v4 = vcombine.low %v2928_v15, %v2976_v7  ;;  %v4897_v10 = vshrl.u32 %v4786_v41, 16  ;;  %v2984_v30 = vshrl.u32 %v2889_v9, 16 }
 0x36e   : > { %v4946_v47 = vpack.i.b16 %v4945_v58, %v4944_v46 }
 0x37b   : > { %v6074_v34 = vpop.permute.xlu1 %6073 }
 0x37c   : > { %v6154_v24 = vsel %vm1898_vm8, %v6115_v5, %v6074_v34  ;;  %v6076_v57 = vpop.permute.xlu0 %6075  ;;  %v2929_v34 = vshrl.u32 %v2785_v40, 16 }
 0x37d   : > { %v6156_v20 = vsel %vm1898_vm8, %v6118_v35, %v6076_v57  ;;  %7252 = vmatprep.mubr.msk.bf16.mxu0 %vm1938_vm9, %v6154_v24  ;;  %v2930_v35 = vshrl.u32 %v2819_v8, 16  ;;  %v4752_v57 = vrot.slane %v4738_v19, %v11914_v36  ;;  %v4943_v36 = vpack.i.b16 %v4854_v54, %v4820_v49 }
 0x37e   : > { %7253 = vmatmul.mubr.msk.bf16.gmra.mrb[16].mxu0 %vm1938_vm9, %v6156_v20  ;;  %v4788_v19 = vcombine.high %v4786_v41, %v11987_v12 }
 0x37f   : > { %v4031_v61 = vpop.permute.xlu1 %4030  ;;  %v2931_v48 = vpack.i.b16 %v2930_v35, %v2929_v34  ;;  %v4896_v1 = vshrl.u32 %v4752_v57, 16  ;;  %v4895_v51 = vpack.i.b16 %v4786_v41, %v4752_v57  ;;  %v4754_v56 = vcombine.high %v4752_v57, %v11987_v12 }
 0x380   : > { %v4033_v17 = vpop.permute.xlu0 %4032  ;;  %v4154_v52 = vsel %vm1849_vm7, %v6813_v23, %v4031_v61 }
 0x381   : > { %v4157_v43 = vsel %vm1849_vm7, %v6814_v13, %v4033_v17  ;;  %v6816_v59 = vcombine.low %v2931_v48, %v2979_v0  ;;  %v2855_v13 = vcombine.high %v2853_v3, %v11987_v12  ;;  %v4898_v18 = vpack.i.b16 %v4897_v10, %v4896_v1 }
 0x382   : > { %v4902_v7 = vshrl.u32 %v4754_v56, 16  ;;  %v4901_v15 = vpack.i.b16 %v4788_v19, %v4754_v56 }
 0x383   : > { %v4111_v29 = vpop.permute.xlu1 %4110  ;;  %v2983_v55 = vshrl.u32 %v2855_v13, 16 }
 0x384   : > { %v4191_v16 = vsel %vm1898_vm8, %v4154_v52, %v4111_v29  ;;  %v4113_v62 = vpop.permute.xlu0 %4112  ;;  %v2787_v29 = vcombine.high %v2785_v40, %v11987_v12  ;;  %v2982_v40 = vpack.i.b16 %v2889_v9, %v2855_v13 }
 0x385   : > { %v4193_v27 = vsel %vm1898_vm8, %v4157_v43, %v4113_v62  ;;  %7222 = vmatprep.mubr.msk.bf16.mxu1 %vm1938_vm9, %v4191_v16  ;;  %v2821_v43 = vcombine.high %v2819_v8, %v11987_v12  ;;  %v6898_v16 = vcombine.low %v4895_v51, %v4943_v36  ;;  %v6899_v62 = vcombine.low %v4898_v18, %v4946_v47  ;;  %v11347_v18 = vld [vmem:[%s11422_s2] ss:$0 sm:$0xff] }
 0x386   : > { %7223 = vmatmul.mubr.msk.bf16.gmra.mrb[20].mxu1 %vm1938_vm9, %v4193_v27  ;;  %v2935_v6 = vshrl.u32 %v2787_v29, 16  ;;  %v2985_v8 = vpack.i.b16 %v2984_v30, %v2983_v55  ;;  %v12335_v55 = vld [vmem:[#allocation4_spill] sm:$0xff] }
 0x387   : > { %v5998_v44 = vpop.permute.xlu1 %5997  ;;  %v2139_v30 = vadd.f32 %v12335_v55, %v11347_v18 }
 0x388   : > { %v6000_v60 = vpop.permute.xlu0 %5999  ;;  %v6121_v26 = vsel %vm1849_vm7, %v6896_v50, %v5998_v44  ;;  %v2936_v44 = vshrl.u32 %v2821_v43, 16  ;;  %v2934_v50 = vpack.i.b16 %v2821_v43, %v2787_v29  ;;  %v12334_v43 = vld [vmem:[#allocation120_spill] sm:$0xff] }
 0x389   : > { %v6124_v5 = vsel %vm1849_vm7, %v6897_v11, %v6000_v60  ;;  %v4822_v60 = vcombine.high %v4820_v49, %v11987_v12  ;;  %v4903_v49 = vshrl.u32 %v4788_v19, 16 }
 0x38a   : > { %v2937_v11 = vpack.i.b16 %v2936_v44, %v2935_v6  ;;  %v6817_v53 = vcombine.low %v2934_v50, %v2982_v40 }
 0x38b   : > { %v6078_v33 = vpop.permute.xlu1 %6077  ;;  %v4949_v0 = vpack.i.b16 %v4856_v21, %v4822_v60  ;;  %v4904_v57 = vpack.i.b16 %v4903_v49, %v4902_v7 }
 0x38c   : > { %v6158_v28 = vsel %vm1898_vm8, %v6121_v26, %v6078_v33  ;;  %v6818_v26 = vcombine.low %v2937_v11, %v2985_v8  ;;  %v4950_v33 = vshrl.u32 %v4822_v60, 16 }
 0x38d   : > { %v6080_v14 = vpop.permute.xlu0 %6079  ;;  %7256 = vmatprep.mubr.msk.bf16.mxu0 %vm1938_vm9, %v6158_v28  ;;  %v6900_v48 = vcombine.low %v4901_v15, %v4949_v0 }
 0x38e   : > { %v6160_v22 = vsel %vm1898_vm8, %v6124_v5, %v6080_v14  ;;  %v4951_v5 = vshrl.u32 %v4856_v21, 16 }
 0x38f   : > { %7257 = vmatmul.mubr.msk.bf16.gmra.mrb[20].mxu0 %vm1938_vm9, %v6160_v22  ;;  %v4035_v24 = vpop.permute.xlu1 %4034 }
 0x390   : > { %v4160_v45 = vsel %vm1849_vm7, %v6815_v4, %v4035_v24  ;;  %v4952_v12 = vpack.i.b16 %v4951_v5, %v4950_v33 }
 0x391   : > { %v4037_v20 = vpop.permute.xlu0 %4036 }
 0x392   : > { %v4163_v37 = vsel %vm1849_vm7, %v6816_v59, %v4037_v20  ;;  %v6901_v20 = vcombine.low %v4904_v57, %v4952_v12 }
 0x393   : > { %v4115_v61 = vpop.permute.xlu1 %4114 }
 0x394   : > { %v4195_v17 = vsel %vm1898_vm8, %v4160_v45, %v4115_v61 }
 0x395   : > { %v4117_v31 = vpop.permute.xlu0 %4116  ;;  %7226 = vmatprep.mubr.msk.bf16.mxu1 %vm1938_vm9, %v4195_v17 }
 0x396   : > { %v4197_v23 = vsel %vm1898_vm8, %v4163_v37, %v4117_v31 }
 0x397   : > { %7227 = vmatmul.mubr.msk.bf16.gmra.mrb[24].mxu1 %vm1938_vm9, %v4197_v23  ;;  %v6002_v25 = vpop.permute.xlu1 %6001 }
 0x398   : > { %v6127_v27 = vsel %vm1849_vm7, %v6898_v16, %v6002_v25  ;;  %v2136_v16 = vadd.f32 %v11347_v18, %v12334_v43 }
 0x399   : > { %v6004_v52 = vpop.permute.xlu0 %6003 }
 0x39a   : > { %v6130_v2 = vsel %vm1849_vm7, %v6899_v62, %v6004_v52  ;;  %v12333_v52 = vld [vmem:[#allocation126_spill] sm:$0xff] }
 0x39b   : > { %v6082_v38 = vpop.permute.xlu1 %6081  ;;  %v2138_v29 = vadd.f32 %v12333_v52, %v11347_v18 }
 0x39c   : > { %v6162_v3 = vsel %vm1898_vm8, %v6127_v27, %v6082_v38 }
 0x39d   : > { %v6084_v39 = vpop.permute.xlu0 %6083  ;;  %7260 = vmatprep.mubr.msk.bf16.mxu0 %vm1938_vm9, %v6162_v3 }
 0x39e   : > { %v6164_v63 = vsel %vm1898_vm8, %v6130_v2, %v6084_v39  ;;  %v12336_v2 = vld [vmem:[#allocation122_spill] sm:$0xff] }
 0x39f   : > { %7261 = vmatmul.mubr.msk.bf16.gmra.mrb[24].mxu0 %vm1938_vm9, %v6164_v63  ;;  %v4039_v32 = vpop.permute.xlu1 %4038  ;;  %v2137_v3 = vadd.f32 %v11347_v18, %v12336_v2 }
 0x3a0   : > { %v4166_v28 = vsel %vm1849_vm7, %v6817_v53, %v4039_v32 }
 0x3a1   : > { %v4041_v42 = vpop.permute.xlu0 %4040 }
 0x3a2   : > { %v4169_v34 = vsel %vm1849_vm7, %v6818_v26, %v4041_v42 }
 0x3a4   : > { %v4119_v14 = vpop.permute.xlu1 %4118 }
 0x3a5   : > { %v4199_v35 = vsel %vm1898_vm8, %v4166_v28, %v4119_v14  ;;  %v4121_v22 = vpop.permute.xlu0 %4120 }
 0x3a6   : > { %v4201_v54 = vsel %vm1898_vm8, %v4169_v34, %v4121_v22  ;;  %7230 = vmatprep.mubr.msk.bf16.mxu1 %vm1938_vm9, %v4199_v35 }
 0x3a7   : > { %7231 = vmatmul.mubr.msk.bf16.gmra.mrb[28].mxu1 %vm1938_vm9, %v4201_v54 }
 0x3a8   : > { %v6006_v24 = vpop.permute.xlu1 %6005 }
 0x3a9   : > { %v6008_v41 = vpop.permute.xlu0 %6007  ;;  %v6133_v4 = vsel %vm1849_vm7, %v6900_v48, %v6006_v24 }
 0x3aa   : > { %v6136_v46 = vsel %vm1849_vm7, %v6901_v20, %v6008_v41 }
 0x3ac   : > { %v6086_v59 = vpop.permute.xlu1 %6085 }
 0x3ad   : > { %v6166_v58 = vsel %vm1898_vm8, %v6133_v4, %v6086_v59  ;;  %v6088_v45 = vpop.permute.xlu0 %6087 }
 0x3ae   : > { %v6168_v61 = vsel %vm1898_vm8, %v6136_v46, %v6088_v45  ;;  %7264 = vmatprep.mubr.msk.bf16.mxu0 %vm1938_vm9, %v6166_v58 }
 0x3af   : > { %7265 = vmatmul.mubr.msk.bf16.gmra.mrb[28].mxu0 %vm1938_vm9, %v6168_v61 }
 0x3db   : > { %v7174_v37 = vpop.f32.mrb[4].mxu1 }
 0x3dc   : > { %v2025_v17 = vpop.f32.mrb[5].mxu1  ;;  %v2142_v42 = vadd.f32 %v7174_v37, %v11347_v18 }
 0x3dd   : > { %v7175_v31 = vpop.f32.mrb[6].mxu1  ;;  %v2140_v56 = vadd.f32 %v11347_v18, %v2025_v17 }
 0x3de   : > { %v2028_v1 = vpop.f32.mrb[7].mxu1  ;;  %v2143_v53 = vadd.f32 %v7175_v31, %v11347_v18 }
 0x3df   : > { %v2141_v5 = vadd.f32 %v11347_v18, %v2028_v1 }
 0x3e7   : > { %v7178_v10 = vpop.f32.mrb[8].mxu1 }
 0x3e8   : > { %v2041_v23 = vpop.f32.mrb[9].mxu1  ;;  %v2146_v24 = vadd.f32 %v7178_v10, %v11347_v18 }
 0x3e9   : > { %v7179_v36 = vpop.f32.mrb[10].mxu1  ;;  %v2144_v57 = vadd.f32 %v11347_v18, %v2041_v23 }
 0x3ea   : > { %v2044_v47 = vpop.f32.mrb[11].mxu1  ;;  %v2147_v48 = vadd.f32 %v7179_v36, %v11347_v18 }
 0x3eb   : > { %v2145_v59 = vadd.f32 %v11347_v18, %v2044_v47 }
 0x3f3   : > { %v11336_v13 = vpop.f32.mrb[12].mxu1 }
 0x3f4   : > { %v11338_v9 = vpop.f32.mrb[13].mxu1  ;;  %v2150_v36 = vadd.f32 %v11336_v13, %v11347_v18 }
 0x3f5   : > { %v11340_v51 = vpop.f32.mrb[14].mxu1 }
 0x3f6   : > { %v11342_v25 = vpop.f32.mrb[15].mxu1  ;;  %v2151_v43 = vadd.f32 %v11340_v51, %v11347_v18 }
 0x3f7   : > { %v2149_v55 = vadd.f32 %v11347_v18, %v11342_v25 }
 0x407   : > { %v7238_v62 = vpop.f32.mrb[0].mxu0 }
 0x408   : > { %v7271_v27 = vadd.f32 %v7238_v62, %v2138_v29  ;;  %v6246_v38 = vpop.f32.mrb[1].mxu0  ;;  %v2148_v29 = vadd.f32 %v11347_v18, %v11338_v9 }
 0x409   : > { %v7273_v39 = vadd.f32 %v6246_v38, %v2136_v16  ;;  %v7239_v6 = vpop.f32.mrb[2].mxu0 }
 0x40a   : > { %v7275_v44 = vadd.f32 %v7239_v6, %v2139_v30  ;;  %v6249_v63 = vpop.f32.mrb[3].mxu0  ;;  %v6407_v8 = vmax.f32 %v7271_v27, 0.0 }
 0x40b   : > { %v7277_v40 = vadd.f32 %v6249_v63, %v2137_v3  ;;  %v6405_v21 = vmax.f32 %v7273_v39, 0.0 }
 0x40c   : > { %v6408_v60 = vmax.f32 %v7275_v44, 0.0 }
 0x40d   : > { %v6406_v50 = vmax.f32 %v7277_v40, 0.0 }
 0x40e   : > { %v7028_v32 = vpack.c.bf16 %v6408_v60, %v6407_v8 }
 0x40f   : > { %v7023_v11 = vpack.c.bf16 %v6406_v50, %v6405_v21 }
 0x410   : > { %7100 = vst [vmem:[%s11361_s25 + $0x8] sm:$0xff] %v7028_v32  }
 0x411   : > { %7024 = vst [vmem:[%s11361_s25] sm:$0xff] %v7023_v11  }
 0x414   : > { %v7242_v19 = vpop.f32.mrb[4].mxu0 }
 0x415   : > { %v7279_v26 = vadd.f32 %v7242_v19, %v2142_v42  ;;  %v6262_v33 = vpop.f32.mrb[5].mxu0 }
 0x416   : > { %v7281_v28 = vadd.f32 %v6262_v33, %v2140_v56  ;;  %v7243_v14 = vpop.f32.mrb[6].mxu0 }
 0x417   : > { %v7283_v34 = vadd.f32 %v7243_v14, %v2143_v53  ;;  %v6265_v35 = vpop.f32.mrb[7].mxu0  ;;  %v6411_v7 = vmax.f32 %v7279_v26, 0.0 }
 0x418   : > { %v7285_v22 = vadd.f32 %v6265_v35, %v2141_v5  ;;  %v6409_v54 = vmax.f32 %v7281_v28, 0.0 }
 0x419   : > { %v6412_v49 = vmax.f32 %v7283_v34, 0.0 }
 0x41a   : > { %v6410_v0 = vmax.f32 %v7285_v22, 0.0 }
 0x41b   : > { %v7038_v12 = vpack.c.bf16 %v6412_v49, %v6411_v7 }
 0x41c   : > { %v7033_v15 = vpack.c.bf16 %v6410_v0, %v6409_v54 }
 0x41d   : > { %7102 = vst [vmem:[%s11361_s25 + $0x18] sm:$0xff] %v7038_v12  }
 0x41e   : > { %7101 = vst [vmem:[%s11361_s25 + $0x10] sm:$0xff] %v7033_v15  }
 0x420   : > { %v7246_v41 = vpop.f32.mrb[8].mxu0 }
 0x421   : > { %v7287_v20 = vadd.f32 %v7246_v41, %v2146_v24  ;;  %v6278_v4 = vpop.f32.mrb[9].mxu0 }
 0x422   : > { %v7289_v46 = vadd.f32 %v6278_v4, %v2144_v57  ;;  %v7247_v58 = vpop.f32.mrb[10].mxu0 }
 0x423   : > { %v7291_v45 = vadd.f32 %v7247_v58, %v2147_v48  ;;  %v6281_v61 = vpop.f32.mrb[11].mxu0  ;;  %v6415_v17 = vmax.f32 %v7287_v20, 0.0 }
 0x424   : > { %v7293_v37 = vadd.f32 %v6281_v61, %v2145_v59  ;;  %v6413_v1 = vmax.f32 %v7289_v46, 0.0 }
 0x425   : > { %v6416_v31 = vmax.f32 %v7291_v45, 0.0 }
 0x426   : > { %v6414_v10 = vmax.f32 %v7293_v37, 0.0 }
 0x427   : > { %v7048_v52 = vpack.c.bf16 %v6416_v31, %v6415_v17 }
 0x428   : > { %v7043_v23 = vpack.c.bf16 %v6414_v10, %v6413_v1 }
 0x429   : > { %7104 = vst [vmem:[%s11361_s25 + $0x28] sm:$0xff] %v7048_v52  }
 0x42a   : > { %7103 = vst [vmem:[%s11361_s25 + $0x20] sm:$0xff] %v7043_v23  }
 0x42c   : > { %v7250_v47 = vpop.f32.mrb[12].mxu0 }
 0x42d   : > { %v7295_v16 = vadd.f32 %v7250_v47, %v2150_v36  ;;  %v6294_v62 = vpop.f32.mrb[13].mxu0 }
 0x42e   : > { %v7297_v30 = vadd.f32 %v6294_v62, %v2148_v29  ;;  %v7251_v27 = vpop.f32.mrb[14].mxu0 }
 0x42f   : > { %v7299_v38 = vadd.f32 %v7251_v27, %v2151_v43  ;;  %v6297_v2 = vpop.f32.mrb[15].mxu0  ;;  %v6419_v13 = vmax.f32 %v7295_v16, 0.0 }
 0x430   : > { %v7301_v3 = vadd.f32 %v6297_v2, %v2149_v55  ;;  %v6417_v6 = vmax.f32 %v7297_v30, 0.0 }
 0x431   : > { %v6420_v39 = vmax.f32 %v7299_v38, 0.0 }
 0x432   : > { %v6418_v9 = vmax.f32 %v7301_v3, 0.0 }
 0x433   : > { %v7058_v44 = vpack.c.bf16 %v6420_v39, %v6419_v13 }
 0x434   : > { %v7053_v63 = vpack.c.bf16 %v6418_v9, %v6417_v6  ;;  %v7220_v40 = vpop.f32.mrb[16].mxu1 }
 0x435   : > { %7106 = vst [vmem:[%s11361_s25 + $0x38] sm:$0xff] %v7058_v44   ;;  %v4343_v51 = vpop.f32.mrb[17].mxu1  ;;  %v7302_v21 = vadd.f32 %v7220_v40, %v11347_v18 }
 0x436   : > { %7105 = vst [vmem:[%s11361_s25 + $0x30] sm:$0xff] %v7053_v63   ;;  %v7221_v8 = vpop.f32.mrb[18].mxu1  ;;  %v7304_v25 = vadd.f32 %v11347_v18, %v4343_v51 }
 0x437   : > { %v4346_v60 = vpop.f32.mrb[19].mxu1  ;;  %v7306_v32 = vadd.f32 %v7221_v8, %v11347_v18 }
 0x438   : > { %v7308_v56 = vadd.f32 %v11347_v18, %v4346_v60 }
 0x451   : > { %v7254_v50 = vpop.f32.mrb[16].mxu0 }
 0x452   : > { %v7303_v11 = vadd.f32 %v7302_v21, %v7254_v50  ;;  %v6310_v42 = vpop.f32.mrb[17].mxu0 }
 0x453   : > { %v7305_v19 = vadd.f32 %v7304_v25, %v6310_v42  ;;  %v7255_v53 = vpop.f32.mrb[18].mxu0 }
 0x454   : > { %v7307_v26 = vadd.f32 %v7306_v32, %v7255_v53  ;;  %v6313_v33 = vpop.f32.mrb[19].mxu0  ;;  %v6423_v28 = vmax.f32 %v7303_v11, 0.0 }
 0x455   : > { %v7309_v5 = vadd.f32 %v7308_v56, %v6313_v33  ;;  %v6421_v34 = vmax.f32 %v7305_v19, 0.0 }
 0x456   : > { %v6424_v14 = vmax.f32 %v7307_v26, 0.0 }
 0x457   : > { %v6422_v35 = vmax.f32 %v7309_v5, 0.0 }
 0x458   : > { %v7068_v22 = vpack.c.bf16 %v6424_v14, %v6423_v28 }
 0x459   : > { %v7063_v7 = vpack.c.bf16 %v6422_v35, %v6421_v34  ;;  %v7224_v49 = vpop.f32.mrb[20].mxu1 }
 0x45a   : > { %7108 = vst [vmem:[%s11361_s25 + $0x48] sm:$0xff] %v7068_v22   ;;  %v4359_v54 = vpop.f32.mrb[21].mxu1  ;;  %v7310_v15 = vadd.f32 %v7224_v49, %v11347_v18 }
 0x45b   : > { %7107 = vst [vmem:[%s11361_s25 + $0x40] sm:$0xff] %v7063_v7   ;;  %v7225_v0 = vpop.f32.mrb[22].mxu1  ;;  %v7312_v24 = vadd.f32 %v11347_v18, %v4359_v54 }
 0x45c   : > { %v4362_v12 = vpop.f32.mrb[23].mxu1  ;;  %v7314_v41 = vadd.f32 %v7225_v0, %v11347_v18 }
 0x45d   : > { %v7316_v4 = vadd.f32 %v11347_v18, %v4362_v12 }
 0x462   : > { %v7258_v57 = vpop.f32.mrb[20].mxu0 }
 0x463   : > { %v7311_v48 = vadd.f32 %v7310_v15, %v7258_v57  ;;  %v6326_v20 = vpop.f32.mrb[21].mxu0 }
 0x464   : > { %v7313_v59 = vadd.f32 %v7312_v24, %v6326_v20  ;;  %v7259_v46 = vpop.f32.mrb[22].mxu0 }
 0x465   : > { %v7315_v58 = vadd.f32 %v7314_v41, %v7259_v46  ;;  %v6329_v45 = vpop.f32.mrb[23].mxu0  ;;  %v6427_v37 = vmax.f32 %v7311_v48, 0.0 }
 0x466   : > { %v7317_v61 = vadd.f32 %v7316_v4, %v6329_v45  ;;  %v6425_v31 = vmax.f32 %v7313_v59, 0.0 }
 0x467   : > { %v6428_v17 = vmax.f32 %v7315_v58, 0.0 }
 0x468   : > { %v6426_v1 = vmax.f32 %v7317_v61, 0.0 }
 0x469   : > { %v7078_v10 = vpack.c.bf16 %v6428_v17, %v6427_v37 }
 0x46a   : > { %v7073_v52 = vpack.c.bf16 %v6426_v1, %v6425_v31  ;;  %v7228_v23 = vpop.f32.mrb[24].mxu1 }
 0x46b   : > { %7110 = vst [vmem:[%s11361_s25 + $0x58] sm:$0xff] %v7078_v10   ;;  %v4375_v36 = vpop.f32.mrb[25].mxu1  ;;  %v7318_v43 = vadd.f32 %v7228_v23, %v11347_v18 }
 0x46c   : > { %7109 = vst [vmem:[%s11361_s25 + $0x50] sm:$0xff] %v7073_v52   ;;  %v7229_v29 = vpop.f32.mrb[26].mxu1  ;;  %v7320_v16 = vadd.f32 %v11347_v18, %v4375_v36 }
 0x46d   : > { %v4378_v47 = vpop.f32.mrb[27].mxu1  ;;  %v7322_v55 = vadd.f32 %v7229_v29, %v11347_v18 }
 0x46e   : > { %v7324_v38 = vadd.f32 %v11347_v18, %v4378_v47 }
 0x472   : > { %v7262_v62 = vpop.f32.mrb[24].mxu0 }
 0x473   : > { %v7319_v30 = vadd.f32 %v7318_v43, %v7262_v62  ;;  %v6342_v27 = vpop.f32.mrb[25].mxu0 }
 0x474   : > { %v7321_v2 = vadd.f32 %v7320_v16, %v6342_v27  ;;  %v7263_v3 = vpop.f32.mrb[26].mxu0 }
 0x475   : > { %v7323_v13 = vadd.f32 %v7322_v55, %v7263_v3  ;;  %v6345_v39 = vpop.f32.mrb[27].mxu0  ;;  %v6431_v9 = vmax.f32 %v7319_v30, 0.0 }
 0x476   : > { %v7325_v6 = vadd.f32 %v7324_v38, %v6345_v39  ;;  %v6429_v63 = vmax.f32 %v7321_v2, 0.0 }
 0x477   : > { %v6432_v44 = vmax.f32 %v7323_v13, 0.0 }
 0x478   : > { %v6430_v40 = vmax.f32 %v7325_v6, 0.0 }
 0x479   : > { %v7088_v51 = vpack.c.bf16 %v6432_v44, %v6431_v9 }
 0x47a   : > { %v7083_v8 = vpack.c.bf16 %v6430_v40, %v6429_v63  ;;  %v7232_v60 = vpop.f32.mrb[28].mxu1 }
 0x47b   : > { %7112 = vst [vmem:[%s11361_s25 + $0x68] sm:$0xff] %v7088_v51   ;;  %v4391_v21 = vpop.f32.mrb[29].mxu1  ;;  %v7326_v32 = vadd.f32 %v7232_v60, %v11347_v18 }
 0x47c   : > { %7111 = vst [vmem:[%s11361_s25 + $0x60] sm:$0xff] %v7083_v8   ;;  %v7233_v25 = vpop.f32.mrb[30].mxu1  ;;  %v7328_v11 = vadd.f32 %v11347_v18, %v4391_v21 }
 0x47d   : > { %v4394_v50 = vpop.f32.mrb[31].mxu1  ;;  %v7330_v56 = vadd.f32 %v7233_v25, %v11347_v18 }
 0x47e   : > { %v7332_v26 = vadd.f32 %v11347_v18, %v4394_v50 }
 0x482   : > { %v7266_v42 = vpop.f32.mrb[28].mxu0 }
 0x483   : > { %v7327_v19 = vadd.f32 %v7326_v32, %v7266_v42  ;;  %v6358_v53 = vpop.f32.mrb[29].mxu0 }
 0x484   : > { %v7329_v33 = vadd.f32 %v7328_v11, %v6358_v53  ;;  %v7267_v5 = vpop.f32.mrb[30].mxu0 }
 0x485   : > { %v7331_v28 = vadd.f32 %v7330_v56, %v7267_v5  ;;  %v6361_v14 = vpop.f32.mrb[31].mxu0  ;;  %v6435_v35 = vmax.f32 %v7327_v19, 0.0 }
 0x486   : > { %v7333_v34 = vadd.f32 %v7332_v26, %v6361_v14  ;;  %v6433_v7 = vmax.f32 %v7329_v33, 0.0 }
 0x487   : > { %v6436_v22 = vmax.f32 %v7331_v28, 0.0 }
 0x488   : > { %v6434_v49 = vmax.f32 %v7333_v34, 0.0 }
 0x489   : > { %v7098_v54 = vpack.c.bf16 %v6436_v22, %v6435_v35 }
 0x48a   : > { %v7093_v0 = vpack.c.bf16 %v6434_v49, %v6433_v7 }
 0x48b   : > { %7114 = vst [vmem:[%s11361_s25 + $0x78] sm:$0xff] %v7098_v54  }
 0x48c   : > { %7113 = vst [vmem:[%s11361_s25 + $0x70] sm:$0xff] %v7093_v0  }
 0x48d PF: > { %s13_s14 = sadd.s32 1, %s7443_s14   ;;  %s12337_s12 = smov %s7439_s13 }
 0x48e   : > { %p10_p5 = scmp.ge.s32.totalorder %s13_s14, 4   ;;  %s12338_s13 = smov %s12340_s15 }
 0x490   :  { %12 = sbr.rel (!%p10_p5) target bundleno = 2 (0x2), region = 70 }

</bundles_post_ra>
